<compile_context>
chip_gen: v7x
topology: tpu7x:2x2x1
jax: 0.10.0
libtpu: 0.0.40
codegen_flags: <defaults>
</compile_context>

<pallas_src>
import functools

import jax
import jax.numpy as jnp
from jax.experimental import pallas as pl
from jax.experimental.pallas import tpu as pltpu

KH = KW = 3  # 3x3 conv, SAME padding, stride 1


def _round_up(x, m):
    return (x + m - 1) // m * m


def _images_per_step(n):
    # Amortize per-step overhead, but keep >= 2 grid steps so both v7x
    # TensorCores get work under dimension_semantics=("parallel",).
    for ips in (8, 4, 2):
        if n % ips == 0 and n // ips >= 2:
            return ips
    return 1


def _row_chunk(r_out):
    # Largest multiple-of-8 divisor of r_out <= 128: the per-chunk f32
    # accumulator stays in <= 16 vregs (no spill) across the 9 taps.
    for rc in range(min(128, r_out), 7, -1):
        if r_out % rc == 0 and rc % 8 == 0:
            return rc
    return r_out


# -----------------------------------------------------------------------------
# Fused backbone kernel (processes `ips` images per grid step):
#   p1_ref  : (ips, R_OUT, 9*Cin) bf16  layer-1 im2col patches (wrapped rows)
#   w1_ref  : (9*Cin, C1)         bf16
#   b1_ref  : (1, C1)             f32
#   w2_ref  : (9, C1, C2)         bf16  one (C1, C2) tap per (kh, kw)
#   b2_ref  : (1, C2)             f32
#   mask_ref: (R_OUT, 1)          f32   1.0 on real pixels, 0.0 on wrapped cols
#   wh_ref  : (C2, CLS_PAD)       bf16
#   bh_ref  : (1, CLS_PAD)        f32
#   o_ref   : (ips, 1, CLS_PAD)   f32
#   x2_ref  : (N_ROWS, C1)        bf16  VMEM scratch = zero-padded layer-2 input
# -----------------------------------------------------------------------------
def _fused_backbone_kernel(p1_ref, w1_ref, b1_ref, w2_ref, b2_ref, mask_ref,
                           wh_ref, bh_ref, o_ref, x2_ref, *,
                           wp, r_out, rc, ips, data_start, inv_hw):
    c1 = w1_ref.shape[-1]
    n_rows = x2_ref.shape[0]
    offs = tuple(kh * wp + kw for kh in range(KH) for kw in range(KW))
    shift = data_start - (wp + 1)       # scratch row s  <->  padded flat row s-shift
    nchunks = r_out // rc

    # Zero only the padding-ring rows of the scratch; the data rows
    # [data_start, data_start + r_out) are fully overwritten for every image.
    x2_ref[pl.ds(0, data_start), :] = jnp.zeros((data_start, c1), x2_ref.dtype)
    tail0 = data_start + r_out
    x2_ref[pl.ds(tail0, n_rows - tail0), :] = jnp.zeros(
        (n_rows - tail0, c1), x2_ref.dtype)

    for img in range(ips):
        # ------- layer 1: one K = 9*Cin MXU dot per 96-row chunk -------------
        for c in range(nchunks):
            r0 = c * rc
            patch = p1_ref[img, pl.ds(r0, rc), :]                 # (rc, 9*Cin) bf16
            y = jnp.dot(patch, w1_ref[...],
                        preferred_element_type=jnp.float32)       # (rc, C1) f32
            y = jnp.maximum(y + b1_ref[...], 0.0)
            y = y * mask_ref[pl.ds(r0, rc), :]                    # zero wrapped cols
            # aligned store into the zero-padded layer-2 input (shift trick:
            # padded_flat[r + wp + 1] = masked_wrapped_out[r])
            x2_ref[pl.ds(data_start + r0, rc), :] = y.astype(x2_ref.dtype)

        # ------- layer 2 + masked global-avg-pool (acc stays in vregs) -------
        pooled = jnp.zeros((1, w2_ref.shape[-1]), jnp.float32)
        for c in range(nchunks):
            r0 = c * rc
            acc = jnp.dot(x2_ref[pl.ds(shift + r0 + offs[0], rc), :], w2_ref[0],
                          preferred_element_type=jnp.float32)
            for t in range(1, KH * KW):                           # unrolled taps
                acc += jnp.dot(x2_ref[pl.ds(shift + r0 + offs[t], rc), :],
                               w2_ref[t], preferred_element_type=jnp.float32)
            y = jnp.maximum(acc + b2_ref[...], 0.0)               # (rc, C2) f32
            y = y * mask_ref[pl.ds(r0, rc), :]
            pooled = pooled + jnp.sum(y, axis=0, keepdims=True)

        # ------- classifier head (bf16 MXU, f32 accumulate) ------------------
        pooled = (pooled * inv_hw).astype(jnp.bfloat16)           # (1, C2)
        logits = jnp.dot(pooled, wh_ref[...],
                         preferred_element_type=jnp.float32) + bh_ref[...]
        o_ref[img] = logits.astype(o_ref.dtype)                   # (1, CLS_PAD)


def fused_backbone(p1, w1f, b1, w2t, b2, mask, whp, bhp, *, h, w, ips):
    n, r_out, k1 = p1.shape
    c1 = w1f.shape[-1]
    c2 = w2t.shape[-1]
    cls_pad = whp.shape[-1]
    wp = w + 2
    data_start = _round_up(wp + 1, 16)            # 16-row aligned layer-1 stores
    off_max = (KH - 1) * wp + (KW - 1)
    n_rows = _round_up((data_start - (wp + 1)) + off_max + r_out, 8)
    rc = _row_chunk(r_out)

    kernel = functools.partial(
        _fused_backbone_kernel, wp=wp, r_out=r_out, rc=rc, ips=ips,
        data_start=data_start, inv_hw=1.0 / float(h * w))

    return pl.pallas_call(
        kernel,
        out_shape=jax.ShapeDtypeStruct((n, 1, cls_pad), jnp.float32),
        grid_spec=pltpu.PrefetchScalarGridSpec(
            num_scalar_prefetch=0,
            grid=(n // ips,),
            in_specs=[
                pl.BlockSpec((ips, r_out, k1), lambda i: (i, 0, 0)),
                pl.BlockSpec((k1, c1), lambda i: (0, 0)),
                pl.BlockSpec((1, c1), lambda i: (0, 0)),
                pl.BlockSpec((KH * KW, c1, c2), lambda i: (0, 0, 0)),
                pl.BlockSpec((1, c2), lambda i: (0, 0)),
                pl.BlockSpec((r_out, 1), lambda i: (0, 0)),
                pl.BlockSpec((c2, cls_pad), lambda i: (0, 0)),
                pl.BlockSpec((1, cls_pad), lambda i: (0, 0)),
            ],
            out_specs=pl.BlockSpec((ips, 1, cls_pad), lambda i: (i, 0, 0)),
            scratch_shapes=[pltpu.VMEM((n_rows, c1), jnp.bfloat16)],
        ),
        compiler_params=pltpu.CompilerParams(
            dimension_semantics=("parallel",)),
    )(p1, w1f, b1, w2t, b2, mask, whp, bhp)


# -----------------------------------------------------------------------------
# Cheap JAX glue: layer-1 im2col (first layer only; raw input is tiny so the
# 9x duplication is ~20 KB/img and endorsed over 9 K=4 MXU pushes).
# -----------------------------------------------------------------------------
def _build_l1_patches(x_nhwc, r_out, wp, offs):
    n, h, w, cin = x_nhwc.shape
    xp = jnp.pad(x_nhwc, ((0, 0), (1, 1), (1, 1), (0, 0)))
    xf = xp.reshape(n, (h + 2) * (w + 2), cin)
    need = offs[-1] + r_out
    if need > xf.shape[1]:
        xf = jnp.pad(xf, ((0, 0), (0, need - xf.shape[1]), (0, 0)))
    taps = [jax.lax.slice_in_dim(xf, o, o + r_out, axis=1) for o in offs]
    return jnp.concatenate(taps, axis=-1)         # (n, r_out, 9*cin)


# -----------------------------------------------------------------------------
# Model: CustomModel.forward(x) == backbone(x)   (NCHW in, logits out)
# -----------------------------------------------------------------------------
def init_params(key, cin=4, c1=128, c2=128, num_classes=10):
    # c1 = c2 = 128 keeps every kernel operand/output lane-dense.
    k1, k2, k3, k4, k5 = jax.random.split(key, 5)
    return {
        "w1": jax.random.normal(k1, (3, 3, cin, c1), jnp.float32) * 0.05,
        "b1": jax.random.normal(k4, (1, c1), jnp.float32) * 0.01,
        "w2": jax.random.normal(k2, (3, 3, c1, c2), jnp.float32) * 0.05,
        "b2": jax.random.normal(k5, (1, c2), jnp.float32) * 0.01,
        "wh": jax.random.normal(k3, (c2, num_classes), jnp.float32) * 0.05,
        "bh": jnp.zeros((1, num_classes), jnp.float32),
    }


@jax.jit
def custom_model_forward(x_nchw, params):
    n, cin, h, w = x_nchw.shape
    wp = w + 2
    r_out = h * wp
    offs = tuple(kh * wp + kw for kh in range(KH) for kw in range(KW))

    c1 = params["w1"].shape[-1]
    c2 = params["w2"].shape[-1]
    num_classes = params["wh"].shape[-1]
    cls_pad = _round_up(num_classes, 128)
    ips = _images_per_step(n)

    x = jnp.transpose(x_nchw, (0, 2, 3, 1))                       # NCHW -> NHWC
    p1 = _build_l1_patches(x, r_out, wp, offs).astype(jnp.bfloat16)

    w1f = params["w1"].reshape(KH * KW * cin, c1).astype(jnp.bfloat16)
    w2t = params["w2"].reshape(KH * KW, c1, c2).astype(jnp.bfloat16)
    whp = jnp.pad(params["wh"],
                  ((0, 0), (0, cls_pad - num_classes))).astype(jnp.bfloat16)
    bhp = jnp.pad(params["bh"], ((0, 0), (0, cls_pad - num_classes)))
    mask = (jnp.arange(r_out) % wp < w).astype(jnp.float32).reshape(r_out, 1)

    logits = fused_backbone(p1, w1f, params["b1"], w2t, params["b2"], mask,
                            whp, bhp, h=h, w=w, ips=ips)
    return logits[:, 0, :num_classes]                             # (N, num_classes) f32


def _reference_forward(x_nchw, params):
    x = jnp.transpose(x_nchw, (0, 2, 3, 1))

    def conv(x, wgt, b):
        y = jax.lax.conv_general_dilated(
            x, wgt, window_strides=(1, 1), padding="SAME",
            dimension_numbers=("NHWC", "HWIO", "NHWC"))
        return jax.nn.relu(y + b.reshape(1, 1, 1, -1))

    x = conv(x, params["w1"], params["b1"])
    x = conv(x, params["w2"], params["b2"])
    pooled = jnp.mean(x, axis=(1, 2))
    return pooled @ params["wh"] + params["bh"]


if __name__ == "__main__":
    key = jax.random.PRNGKey(0)
    k_x, k_p = jax.random.split(key)
    x = jax.random.normal(k_x, (2, 4, 16, 16), jnp.float32)       # NCHW like PyTorch
    params = init_params(k_p, cin=4, c1=128, c2=128, num_classes=10)

    logits = custom_model_forward(x, params)
    jax.block_until_ready(logits)
    assert logits.shape == (2, 10) and logits.dtype == jnp.float32

    ref = _reference_forward(x, params)
    assert bool(jnp.allclose(logits, ref, rtol=5e-2, atol=5e-2)), "mismatch vs reference"
    print("KERNEL_OK")
</pallas_src>

<mosaic_0001>
module attributes {stable_mosaic.version = 11 : i64} {
  func.func @_fused_backbone_kernel(%arg0: i32, %arg1: memref<1x288x36xbf16, #tpu.memory_space<vmem>>, %arg2: memref<36x128xbf16, #tpu.memory_space<vmem>>, %arg3: memref<1x128xf32, #tpu.memory_space<vmem>>, %arg4: memref<9x128x128xbf16, #tpu.memory_space<vmem>>, %arg5: memref<1x128xf32, #tpu.memory_space<vmem>>, %arg6: memref<288x1xf32, #tpu.memory_space<vmem>>, %arg7: memref<128x128xbf16, #tpu.memory_space<vmem>>, %arg8: memref<1x128xf32, #tpu.memory_space<vmem>>, %arg9: memref<1x1x128xf32, #tpu.memory_space<vmem>>, %arg10: memref<344x128xbf16, #tpu.memory_space<vmem>>) attributes {dimension_semantics = [#tpu.dimension_semantics<parallel>], iteration_bounds = array<i64: 2>, scalar_prefetch = 0 : i64, scratch_operands = 1 : i64, tpu.core_type = #tpu.core_type<tc>, window_params = [{transform_indices = @transform_0, window_bounds = array<i64: 1, 288, 36>}, {pipeline_mode = #tpu.pipeline_mode<synchronous>, transform_indices = @transform_1, window_bounds = array<i64: 36, 128>}, {pipeline_mode = #tpu.pipeline_mode<synchronous>, transform_indices = @transform_2, window_bounds = array<i64: 1, 128>}, {pipeline_mode = #tpu.pipeline_mode<synchronous>, transform_indices = @transform_3, window_bounds = array<i64: 9, 128, 128>}, {pipeline_mode = #tpu.pipeline_mode<synchronous>, transform_indices = @transform_4, window_bounds = array<i64: 1, 128>}, {pipeline_mode = #tpu.pipeline_mode<synchronous>, transform_indices = @transform_5, window_bounds = array<i64: 288, 1>}, {pipeline_mode = #tpu.pipeline_mode<synchronous>, transform_indices = @transform_6, window_bounds = array<i64: 128, 128>}, {pipeline_mode = #tpu.pipeline_mode<synchronous>, transform_indices = @transform_7, window_bounds = array<i64: 1, 128>}, {transform_indices = @transform_8, window_bounds = array<i64: 1, 1, 128>}]} {
    %cst = arith.constant 0.000000e+00 : bf16
    %0 = vector.broadcast %cst : bf16 to vector<32x128xbf16>
    %c0 = arith.constant 0 : index
    %c0_0 = arith.constant 0 : index
    %1 = vector.load %arg10[%c0, %c0_0] : memref<344x128xbf16, #tpu.memory_space<vmem>>, vector<32x128xbf16>
    tpu.vector_store %arg10[%c0, %c0_0], %0 {strides = array<i32>} : memref<344x128xbf16, #tpu.memory_space<vmem>>, vector<32x128xbf16>,
    %cst_1 = arith.constant 0.000000e+00 : bf16
    %2 = vector.broadcast %cst_1 : bf16 to vector<24x128xbf16>
    %c320 = arith.constant 320 : index
    %c0_2 = arith.constant 0 : index
    %3 = vector.load %arg10[%c320, %c0_2] : memref<344x128xbf16, #tpu.memory_space<vmem>>, vector<24x128xbf16>
    tpu.vector_store %arg10[%c320, %c0_2], %2 {strides = array<i32>} : memref<344x128xbf16, #tpu.memory_space<vmem>>, vector<24x128xbf16>,
    %c0_3 = arith.constant 0 : index
    %c0_4 = arith.constant 0 : index
    %c0_5 = arith.constant 0 : index
    %4 = vector.load %arg1[%c0_3, %c0_4, %c0_5] : memref<1x288x36xbf16, #tpu.memory_space<vmem>>, vector<1x96x36xbf16>
    %5 = vector.shape_cast %4 : vector<1x96x36xbf16> to vector<96x36xbf16>
    %c0_6 = arith.constant 0 : index
    %c0_7 = arith.constant 0 : index
    %6 = vector.load %arg2[%c0_6, %c0_7] : memref<36x128xbf16, #tpu.memory_space<vmem>>, vector<36x128xbf16>
    %cst_8 = arith.constant dense<0.000000e+00> : vector<96x128xf32>
    %7 = tpu.matmul %5, %6, %cst_8 {dimension_numbers = #tpu.dot_dimension_numbers<[1], [0], [0], [1], [0, 0, 1, 1], [], []>} : vector<96x36xbf16>, vector<36x128xbf16>, vector<96x128xf32> -> vector<96x128xf32>
    %c0_9 = arith.constant 0 : index
    %c0_10 = arith.constant 0 : index
    %8 = vector.load %arg3[%c0_9, %c0_10] : memref<1x128xf32, #tpu.memory_space<vmem>>, vector<1x128xf32>
    %9 = vector.broadcast %8 : vector<1x128xf32> to vector<96x128xf32>
    %10 = arith.addf %7, %9 : vector<96x128xf32>
    %cst_11 = arith.constant 0.000000e+00 : f32
    %11 = vector.broadcast %cst_11 : f32 to vector<96x128xf32>
    %12 = arith.maximumf %10, %11 : vector<96x128xf32>
    %c0_12 = arith.constant 0 : index
    %c0_13 = arith.constant 0 : index
    %13 = vector.load %arg6[%c0_12, %c0_13] : memref<288x1xf32, #tpu.memory_space<vmem>>, vector<96x1xf32>
    %14 = vector.broadcast %13 : vector<96x1xf32> to vector<96x128xf32>
    %15 = arith.mulf %12, %14 : vector<96x128xf32>
    %16 = arith.truncf %15 : vector<96x128xf32> to vector<96x128xbf16>
    %c32 = arith.constant 32 : index
    %c0_14 = arith.constant 0 : index
    %17 = vector.load %arg10[%c32, %c0_14] : memref<344x128xbf16, #tpu.memory_space<vmem>>, vector<96x128xbf16>
    tpu.vector_store %arg10[%c32, %c0_14], %16 {strides = array<i32>} : memref<344x128xbf16, #tpu.memory_space<vmem>>, vector<96x128xbf16>,
    %c0_15 = arith.constant 0 : index
    %c96 = arith.constant 96 : index
    %c0_16 = arith.constant 0 : index
    %18 = vector.load %arg1[%c0_15, %c96, %c0_16] : memref<1x288x36xbf16, #tpu.memory_space<vmem>>, vector<1x96x36xbf16>
    %19 = vector.shape_cast %18 : vector<1x96x36xbf16> to vector<96x36xbf16>
    %c0_17 = arith.constant 0 : index
    %c0_18 = arith.constant 0 : index
    %20 = vector.load %arg2[%c0_17, %c0_18] : memref<36x128xbf16, #tpu.memory_space<vmem>>, vector<36x128xbf16>
    %cst_19 = arith.constant dense<0.000000e+00> : vector<96x128xf32>
    %21 = tpu.matmul %19, %20, %cst_19 {dimension_numbers = #tpu.dot_dimension_numbers<[1], [0], [0], [1], [0, 0, 1, 1], [], []>} : vector<96x36xbf16>, vector<36x128xbf16>, vector<96x128xf32> -> vector<96x128xf32>
    %c0_20 = arith.constant 0 : index
    %c0_21 = arith.constant 0 : index
    %22 = vector.load %arg3[%c0_20, %c0_21] : memref<1x128xf32, #tpu.memory_space<vmem>>, vector<1x128xf32>
    %23 = vector.broadcast %22 : vector<1x128xf32> to vector<96x128xf32>
    %24 = arith.addf %21, %23 : vector<96x128xf32>
    %cst_22 = arith.constant 0.000000e+00 : f32
    %25 = vector.broadcast %cst_22 : f32 to vector<96x128xf32>
    %26 = arith.maximumf %24, %25 : vector<96x128xf32>
    %c96_23 = arith.constant 96 : index
    %c0_24 = arith.constant 0 : index
    %27 = vector.load %arg6[%c96_23, %c0_24] : memref<288x1xf32, #tpu.memory_space<vmem>>, vector<96x1xf32>
    %28 = vector.broadcast %27 : vector<96x1xf32> to vector<96x128xf32>
    %29 = arith.mulf %26, %28 : vector<96x128xf32>
    %30 = arith.truncf %29 : vector<96x128xf32> to vector<96x128xbf16>
    %c128 = arith.constant 128 : index
    %c0_25 = arith.constant 0 : index
    %31 = vector.load %arg10[%c128, %c0_25] : memref<344x128xbf16, #tpu.memory_space<vmem>>, vector<96x128xbf16>
    tpu.vector_store %arg10[%c128, %c0_25], %30 {strides = array<i32>} : memref<344x128xbf16, #tpu.memory_space<vmem>>, vector<96x128xbf16>,
    %c0_26 = arith.constant 0 : index
    %c192 = arith.constant 192 : index
    %c0_27 = arith.constant 0 : index
    %32 = vector.load %arg1[%c0_26, %c192, %c0_27] : memref<1x288x36xbf16, #tpu.memory_space<vmem>>, vector<1x96x36xbf16>
    %33 = vector.shape_cast %32 : vector<1x96x36xbf16> to vector<96x36xbf16>
    %c0_28 = arith.constant 0 : index
    %c0_29 = arith.constant 0 : index
    %34 = vector.load %arg2[%c0_28, %c0_29] : memref<36x128xbf16, #tpu.memory_space<vmem>>, vector<36x128xbf16>
    %cst_30 = arith.constant dense<0.000000e+00> : vector<96x128xf32>
    %35 = tpu.matmul %33, %34, %cst_30 {dimension_numbers = #tpu.dot_dimension_numbers<[1], [0], [0], [1], [0, 0, 1, 1], [], []>} : vector<96x36xbf16>, vector<36x128xbf16>, vector<96x128xf32> -> vector<96x128xf32>
    %c0_31 = arith.constant 0 : index
    %c0_32 = arith.constant 0 : index
    %36 = vector.load %arg3[%c0_31, %c0_32] : memref<1x128xf32, #tpu.memory_space<vmem>>, vector<1x128xf32>
    %37 = vector.broadcast %36 : vector<1x128xf32> to vector<96x128xf32>
    %38 = arith.addf %35, %37 : vector<96x128xf32>
    %cst_33 = arith.constant 0.000000e+00 : f32
    %39 = vector.broadcast %cst_33 : f32 to vector<96x128xf32>
    %40 = arith.maximumf %38, %39 : vector<96x128xf32>
    %c192_34 = arith.constant 192 : index
    %c0_35 = arith.constant 0 : index
    %41 = vector.load %arg6[%c192_34, %c0_35] : memref<288x1xf32, #tpu.memory_space<vmem>>, vector<96x1xf32>
    %42 = vector.broadcast %41 : vector<96x1xf32> to vector<96x128xf32>
    %43 = arith.mulf %40, %42 : vector<96x128xf32>
    %44 = arith.truncf %43 : vector<96x128xf32> to vector<96x128xbf16>
    %c224 = arith.constant 224 : index
    %c0_36 = arith.constant 0 : index
    %45 = vector.load %arg10[%c224, %c0_36] : memref<344x128xbf16, #tpu.memory_space<vmem>>, vector<96x128xbf16>
    tpu.vector_store %arg10[%c224, %c0_36], %44 {strides = array<i32>} : memref<344x128xbf16, #tpu.memory_space<vmem>>, vector<96x128xbf16>,
    %cst_37 = arith.constant 0.000000e+00 : f32
    %46 = vector.broadcast %cst_37 : f32 to vector<1x128xf32>
    %c13 = arith.constant 13 : index
    %c0_38 = arith.constant 0 : index
    %47 = vector.load %arg10[%c13, %c0_38] : memref<344x128xbf16, #tpu.memory_space<vmem>>, vector<96x128xbf16>
    %c0_39 = arith.constant 0 : index
    %c0_40 = arith.constant 0 : index
    %c0_41 = arith.constant 0 : index
    %48 = vector.load %arg4[%c0_39, %c0_40, %c0_41] : memref<9x128x128xbf16, #tpu.memory_space<vmem>>, vector<1x128x128xbf16>
    %49 = vector.shape_cast %48 : vector<1x128x128xbf16> to vector<128x128xbf16>
    %cst_42 = arith.constant dense<0.000000e+00> : vector<96x128xf32>
    %50 = tpu.matmul %47, %49, %cst_42 {dimension_numbers = #tpu.dot_dimension_numbers<[1], [0], [0], [1], [0, 0, 1, 1], [], []>} : vector<96x128xbf16>, vector<128x128xbf16>, vector<96x128xf32> -> vector<96x128xf32>
    %c14 = arith.constant 14 : index
    %c0_43 = arith.constant 0 : index
    %51 = vector.load %arg10[%c14, %c0_43] : memref<344x128xbf16, #tpu.memory_space<vmem>>, vector<96x128xbf16>
    %c1 = arith.constant 1 : index
    %c0_44 = arith.constant 0 : index
    %c0_45 = arith.constant 0 : index
    %52 = vector.load %arg4[%c1, %c0_44, %c0_45] : memref<9x128x128xbf16, #tpu.memory_space<vmem>>, vector<1x128x128xbf16>
    %53 = vector.shape_cast %52 : vector<1x128x128xbf16> to vector<128x128xbf16>
    %cst_46 = arith.constant dense<0.000000e+00> : vector<96x128xf32>
    %54 = tpu.matmul %51, %53, %cst_46 {dimension_numbers = #tpu.dot_dimension_numbers<[1], [0], [0], [1], [0, 0, 1, 1], [], []>} : vector<96x128xbf16>, vector<128x128xbf16>, vector<96x128xf32> -> vector<96x128xf32>
    %55 = arith.addf %50, %54 : vector<96x128xf32>
    %c15 = arith.constant 15 : index
    %c0_47 = arith.constant 0 : index
    %56 = vector.load %arg10[%c15, %c0_47] : memref<344x128xbf16, #tpu.memory_space<vmem>>, vector<96x128xbf16>
    %c2 = arith.constant 2 : index
    %c0_48 = arith.constant 0 : index
    %c0_49 = arith.constant 0 : index
    %57 = vector.load %arg4[%c2, %c0_48, %c0_49] : memref<9x128x128xbf16, #tpu.memory_space<vmem>>, vector<1x128x128xbf16>
    %58 = vector.shape_cast %57 : vector<1x128x128xbf16> to vector<128x128xbf16>
    %cst_50 = arith.constant dense<0.000000e+00> : vector<96x128xf32>
    %59 = tpu.matmul %56, %58, %cst_50 {dimension_numbers = #tpu.dot_dimension_numbers<[1], [0], [0], [1], [0, 0, 1, 1], [], []>} : vector<96x128xbf16>, vector<128x128xbf16>, vector<96x128xf32> -> vector<96x128xf32>
    %60 = arith.addf %55, %59 : vector<96x128xf32>
    %c31 = arith.constant 31 : index
    %c0_51 = arith.constant 0 : index
    %61 = vector.load %arg10[%c31, %c0_51] : memref<344x128xbf16, #tpu.memory_space<vmem>>, vector<96x128xbf16>
    %c3 = arith.constant 3 : index
    %c0_52 = arith.constant 0 : index
    %c0_53 = arith.constant 0 : index
    %62 = vector.load %arg4[%c3, %c0_52, %c0_53] : memref<9x128x128xbf16, #tpu.memory_space<vmem>>, vector<1x128x128xbf16>
    %63 = vector.shape_cast %62 : vector<1x128x128xbf16> to vector<128x128xbf16>
    %cst_54 = arith.constant dense<0.000000e+00> : vector<96x128xf32>
    %64 = tpu.matmul %61, %63, %cst_54 {dimension_numbers = #tpu.dot_dimension_numbers<[1], [0], [0], [1], [0, 0, 1, 1], [], []>} : vector<96x128xbf16>, vector<128x128xbf16>, vector<96x128xf32> -> vector<96x128xf32>
    %65 = arith.addf %60, %64 : vector<96x128xf32>
    %c32_55 = arith.constant 32 : index
    %c0_56 = arith.constant 0 : index
    %66 = vector.load %arg10[%c32_55, %c0_56] : memref<344x128xbf16, #tpu.memory_space<vmem>>, vector<96x128xbf16>
    %c4 = arith.constant 4 : index
    %c0_57 = arith.constant 0 : index
    %c0_58 = arith.constant 0 : index
    %67 = vector.load %arg4[%c4, %c0_57, %c0_58] : memref<9x128x128xbf16, #tpu.memory_space<vmem>>, vector<1x128x128xbf16>
    %68 = vector.shape_cast %67 : vector<1x128x128xbf16> to vector<128x128xbf16>
    %cst_59 = arith.constant dense<0.000000e+00> : vector<96x128xf32>
    %69 = tpu.matmul %66, %68, %cst_59 {dimension_numbers = #tpu.dot_dimension_numbers<[1], [0], [0], [1], [0, 0, 1, 1], [], []>} : vector<96x128xbf16>, vector<128x128xbf16>, vector<96x128xf32> -> vector<96x128xf32>
    %70 = arith.addf %65, %69 : vector<96x128xf32>
    %c33 = arith.constant 33 : index
    %c0_60 = arith.constant 0 : index
    %71 = vector.load %arg10[%c33, %c0_60] : memref<344x128xbf16, #tpu.memory_space<vmem>>, vector<96x128xbf16>
    %c5 = arith.constant 5 : index
    %c0_61 = arith.constant 0 : index
    %c0_62 = arith.constant 0 : index
    %72 = vector.load %arg4[%c5, %c0_61, %c0_62] : memref<9x128x128xbf16, #tpu.memory_space<vmem>>, vector<1x128x128xbf16>
    %73 = vector.shape_cast %72 : vector<1x128x128xbf16> to vector<128x128xbf16>
    %cst_63 = arith.constant dense<0.000000e+00> : vector<96x128xf32>
    %74 = tpu.matmul %71, %73, %cst_63 {dimension_numbers = #tpu.dot_dimension_numbers<[1], [0], [0], [1], [0, 0, 1, 1], [], []>} : vector<96x128xbf16>, vector<128x128xbf16>, vector<96x128xf32> -> vector<96x128xf32>
    %75 = arith.addf %70, %74 : vector<96x128xf32>
    %c49 = arith.constant 49 : index
    %c0_64 = arith.constant 0 : index
    %76 = vector.load %arg10[%c49, %c0_64] : memref<344x128xbf16, #tpu.memory_space<vmem>>, vector<96x128xbf16>
    %c6 = arith.constant 6 : index
    %c0_65 = arith.constant 0 : index
    %c0_66 = arith.constant 0 : index
    %77 = vector.load %arg4[%c6, %c0_65, %c0_66] : memref<9x128x128xbf16, #tpu.memory_space<vmem>>, vector<1x128x128xbf16>
    %78 = vector.shape_cast %77 : vector<1x128x128xbf16> to vector<128x128xbf16>
    %cst_67 = arith.constant dense<0.000000e+00> : vector<96x128xf32>
    %79 = tpu.matmul %76, %78, %cst_67 {dimension_numbers = #tpu.dot_dimension_numbers<[1], [0], [0], [1], [0, 0, 1, 1], [], []>} : vector<96x128xbf16>, vector<128x128xbf16>, vector<96x128xf32> -> vector<96x128xf32>
    %80 = arith.addf %75, %79 : vector<96x128xf32>
    %c50 = arith.constant 50 : index
    %c0_68 = arith.constant 0 : index
    %81 = vector.load %arg10[%c50, %c0_68] : memref<344x128xbf16, #tpu.memory_space<vmem>>, vector<96x128xbf16>
    %c7 = arith.constant 7 : index
    %c0_69 = arith.constant 0 : index
    %c0_70 = arith.constant 0 : index
    %82 = vector.load %arg4[%c7, %c0_69, %c0_70] : memref<9x128x128xbf16, #tpu.memory_space<vmem>>, vector<1x128x128xbf16>
    %83 = vector.shape_cast %82 : vector<1x128x128xbf16> to vector<128x128xbf16>
    %cst_71 = arith.constant dense<0.000000e+00> : vector<96x128xf32>
    %84 = tpu.matmul %81, %83, %cst_71 {dimension_numbers = #tpu.dot_dimension_numbers<[1], [0], [0], [1], [0, 0, 1, 1], [], []>} : vector<96x128xbf16>, vector<128x128xbf16>, vector<96x128xf32> -> vector<96x128xf32>
    %85 = arith.addf %80, %84 : vector<96x128xf32>
    %c51 = arith.constant 51 : index
    %c0_72 = arith.constant 0 : index
    %86 = vector.load %arg10[%c51, %c0_72] : memref<344x128xbf16, #tpu.memory_space<vmem>>, vector<96x128xbf16>
    %c8 = arith.constant 8 : index
    %c0_73 = arith.constant 0 : index
    %c0_74 = arith.constant 0 : index
    %87 = vector.load %arg4[%c8, %c0_73, %c0_74] : memref<9x128x128xbf16, #tpu.memory_space<vmem>>, vector<1x128x128xbf16>
    %88 = vector.shape_cast %87 : vector<1x128x128xbf16> to vector<128x128xbf16>
    %cst_75 = arith.constant dense<0.000000e+00> : vector<96x128xf32>
    %89 = tpu.matmul %86, %88, %cst_75 {dimension_numbers = #tpu.dot_dimension_numbers<[1], [0], [0], [1], [0, 0, 1, 1], [], []>} : vector<96x128xbf16>, vector<128x128xbf16>, vector<96x128xf32> -> vector<96x128xf32>
    %90 = arith.addf %85, %89 : vector<96x128xf32>
    %c0_76 = arith.constant 0 : index
    %c0_77 = arith.constant 0 : index
    %91 = vector.load %arg5[%c0_76, %c0_77] : memref<1x128xf32, #tpu.memory_space<vmem>>, vector<1x128xf32>
    %92 = vector.broadcast %91 : vector<1x128xf32> to vector<96x128xf32>
    %93 = arith.addf %90, %92 : vector<96x128xf32>
    %cst_78 = arith.constant 0.000000e+00 : f32
    %94 = vector.broadcast %cst_78 : f32 to vector<96x128xf32>
    %95 = arith.maximumf %93, %94 : vector<96x128xf32>
    %c0_79 = arith.constant 0 : index
    %c0_80 = arith.constant 0 : index
    %96 = vector.load %arg6[%c0_79, %c0_80] : memref<288x1xf32, #tpu.memory_space<vmem>>, vector<96x1xf32>
    %97 = vector.broadcast %96 : vector<96x1xf32> to vector<96x128xf32>
    %98 = arith.mulf %95, %97 : vector<96x128xf32>
    %cst_81 = arith.constant dense<0.000000e+00> : vector<128xf32>
    %99 = vector.multi_reduction <add>, %98, %cst_81 [0] : vector<96x128xf32> to vector<128xf32>
    %100 = vector.shape_cast %99 : vector<128xf32> to vector<1x128xf32>
    %101 = arith.addf %46, %100 : vector<1x128xf32>
    %c109 = arith.constant 109 : index
    %c0_82 = arith.constant 0 : index
    %102 = vector.load %arg10[%c109, %c0_82] : memref<344x128xbf16, #tpu.memory_space<vmem>>, vector<96x128xbf16>
    %c0_83 = arith.constant 0 : index
    %c0_84 = arith.constant 0 : index
    %c0_85 = arith.constant 0 : index
    %103 = vector.load %arg4[%c0_83, %c0_84, %c0_85] : memref<9x128x128xbf16, #tpu.memory_space<vmem>>, vector<1x128x128xbf16>
    %104 = vector.shape_cast %103 : vector<1x128x128xbf16> to vector<128x128xbf16>
    %cst_86 = arith.constant dense<0.000000e+00> : vector<96x128xf32>
    %105 = tpu.matmul %102, %104, %cst_86 {dimension_numbers = #tpu.dot_dimension_numbers<[1], [0], [0], [1], [0, 0, 1, 1], [], []>} : vector<96x128xbf16>, vector<128x128xbf16>, vector<96x128xf32> -> vector<96x128xf32>
    %c110 = arith.constant 110 : index
    %c0_87 = arith.constant 0 : index
    %106 = vector.load %arg10[%c110, %c0_87] : memref<344x128xbf16, #tpu.memory_space<vmem>>, vector<96x128xbf16>
    %c1_88 = arith.constant 1 : index
    %c0_89 = arith.constant 0 : index
    %c0_90 = arith.constant 0 : index
    %107 = vector.load %arg4[%c1_88, %c0_89, %c0_90] : memref<9x128x128xbf16, #tpu.memory_space<vmem>>, vector<1x128x128xbf16>
    %108 = vector.shape_cast %107 : vector<1x128x128xbf16> to vector<128x128xbf16>
    %cst_91 = arith.constant dense<0.000000e+00> : vector<96x128xf32>
    %109 = tpu.matmul %106, %108, %cst_91 {dimension_numbers = #tpu.dot_dimension_numbers<[1], [0], [0], [1], [0, 0, 1, 1], [], []>} : vector<96x128xbf16>, vector<128x128xbf16>, vector<96x128xf32> -> vector<96x128xf32>
    %110 = arith.addf %105, %109 : vector<96x128xf32>
    %c111 = arith.constant 111 : index
    %c0_92 = arith.constant 0 : index
    %111 = vector.load %arg10[%c111, %c0_92] : memref<344x128xbf16, #tpu.memory_space<vmem>>, vector<96x128xbf16>
    %c2_93 = arith.constant 2 : index
    %c0_94 = arith.constant 0 : index
    %c0_95 = arith.constant 0 : index
    %112 = vector.load %arg4[%c2_93, %c0_94, %c0_95] : memref<9x128x128xbf16, #tpu.memory_space<vmem>>, vector<1x128x128xbf16>
    %113 = vector.shape_cast %112 : vector<1x128x128xbf16> to vector<128x128xbf16>
    %cst_96 = arith.constant dense<0.000000e+00> : vector<96x128xf32>
    %114 = tpu.matmul %111, %113, %cst_96 {dimension_numbers = #tpu.dot_dimension_numbers<[1], [0], [0], [1], [0, 0, 1, 1], [], []>} : vector<96x128xbf16>, vector<128x128xbf16>, vector<96x128xf32> -> vector<96x128xf32>
    %115 = arith.addf %110, %114 : vector<96x128xf32>
    %c127 = arith.constant 127 : index
    %c0_97 = arith.constant 0 : index
    %116 = vector.load %arg10[%c127, %c0_97] : memref<344x128xbf16, #tpu.memory_space<vmem>>, vector<96x128xbf16>
    %c3_98 = arith.constant 3 : index
    %c0_99 = arith.constant 0 : index
    %c0_100 = arith.constant 0 : index
    %117 = vector.load %arg4[%c3_98, %c0_99, %c0_100] : memref<9x128x128xbf16, #tpu.memory_space<vmem>>, vector<1x128x128xbf16>
    %118 = vector.shape_cast %117 : vector<1x128x128xbf16> to vector<128x128xbf16>
    %cst_101 = arith.constant dense<0.000000e+00> : vector<96x128xf32>
    %119 = tpu.matmul %116, %118, %cst_101 {dimension_numbers = #tpu.dot_dimension_numbers<[1], [0], [0], [1], [0, 0, 1, 1], [], []>} : vector<96x128xbf16>, vector<128x128xbf16>, vector<96x128xf32> -> vector<96x128xf32>
    %120 = arith.addf %115, %119 : vector<96x128xf32>
    %c128_102 = arith.constant 128 : index
    %c0_103 = arith.constant 0 : index
    %121 = vector.load %arg10[%c128_102, %c0_103] : memref<344x128xbf16, #tpu.memory_space<vmem>>, vector<96x128xbf16>
    %c4_104 = arith.constant 4 : index
    %c0_105 = arith.constant 0 : index
    %c0_106 = arith.constant 0 : index
    %122 = vector.load %arg4[%c4_104, %c0_105, %c0_106] : memref<9x128x128xbf16, #tpu.memory_space<vmem>>, vector<1x128x128xbf16>
    %123 = vector.shape_cast %122 : vector<1x128x128xbf16> to vector<128x128xbf16>
    %cst_107 = arith.constant dense<0.000000e+00> : vector<96x128xf32>
    %124 = tpu.matmul %121, %123, %cst_107 {dimension_numbers = #tpu.dot_dimension_numbers<[1], [0], [0], [1], [0, 0, 1, 1], [], []>} : vector<96x128xbf16>, vector<128x128xbf16>, vector<96x128xf32> -> vector<96x128xf32>
    %125 = arith.addf %120, %124 : vector<96x128xf32>
    %c129 = arith.constant 129 : index
    %c0_108 = arith.constant 0 : index
    %126 = vector.load %arg10[%c129, %c0_108] : memref<344x128xbf16, #tpu.memory_space<vmem>>, vector<96x128xbf16>
    %c5_109 = arith.constant 5 : index
    %c0_110 = arith.constant 0 : index
    %c0_111 = arith.constant 0 : index
    %127 = vector.load %arg4[%c5_109, %c0_110, %c0_111] : memref<9x128x128xbf16, #tpu.memory_space<vmem>>, vector<1x128x128xbf16>
    %128 = vector.shape_cast %127 : vector<1x128x128xbf16> to vector<128x128xbf16>
    %cst_112 = arith.constant dense<0.000000e+00> : vector<96x128xf32>
    %129 = tpu.matmul %126, %128, %cst_112 {dimension_numbers = #tpu.dot_dimension_numbers<[1], [0], [0], [1], [0, 0, 1, 1], [], []>} : vector<96x128xbf16>, vector<128x128xbf16>, vector<96x128xf32> -> vector<96x128xf32>
    %130 = arith.addf %125, %129 : vector<96x128xf32>
    %c145 = arith.constant 145 : index
    %c0_113 = arith.constant 0 : index
    %131 = vector.load %arg10[%c145, %c0_113] : memref<344x128xbf16, #tpu.memory_space<vmem>>, vector<96x128xbf16>
    %c6_114 = arith.constant 6 : index
    %c0_115 = arith.constant 0 : index
    %c0_116 = arith.constant 0 : index
    %132 = vector.load %arg4[%c6_114, %c0_115, %c0_116] : memref<9x128x128xbf16, #tpu.memory_space<vmem>>, vector<1x128x128xbf16>
    %133 = vector.shape_cast %132 : vector<1x128x128xbf16> to vector<128x128xbf16>
    %cst_117 = arith.constant dense<0.000000e+00> : vector<96x128xf32>
    %134 = tpu.matmul %131, %133, %cst_117 {dimension_numbers = #tpu.dot_dimension_numbers<[1], [0], [0], [1], [0, 0, 1, 1], [], []>} : vector<96x128xbf16>, vector<128x128xbf16>, vector<96x128xf32> -> vector<96x128xf32>
    %135 = arith.addf %130, %134 : vector<96x128xf32>
    %c146 = arith.constant 146 : index
    %c0_118 = arith.constant 0 : index
    %136 = vector.load %arg10[%c146, %c0_118] : memref<344x128xbf16, #tpu.memory_space<vmem>>, vector<96x128xbf16>
    %c7_119 = arith.constant 7 : index
    %c0_120 = arith.constant 0 : index
    %c0_121 = arith.constant 0 : index
    %137 = vector.load %arg4[%c7_119, %c0_120, %c0_121] : memref<9x128x128xbf16, #tpu.memory_space<vmem>>, vector<1x128x128xbf16>
    %138 = vector.shape_cast %137 : vector<1x128x128xbf16> to vector<128x128xbf16>
    %cst_122 = arith.constant dense<0.000000e+00> : vector<96x128xf32>
    %139 = tpu.matmul %136, %138, %cst_122 {dimension_numbers = #tpu.dot_dimension_numbers<[1], [0], [0], [1], [0, 0, 1, 1], [], []>} : vector<96x128xbf16>, vector<128x128xbf16>, vector<96x128xf32> -> vector<96x128xf32>
    %140 = arith.addf %135, %139 : vector<96x128xf32>
    %c147 = arith.constant 147 : index
    %c0_123 = arith.constant 0 : index
    %141 = vector.load %arg10[%c147, %c0_123] : memref<344x128xbf16, #tpu.memory_space<vmem>>, vector<96x128xbf16>
    %c8_124 = arith.constant 8 : index
    %c0_125 = arith.constant 0 : index
    %c0_126 = arith.constant 0 : index
    %142 = vector.load %arg4[%c8_124, %c0_125, %c0_126] : memref<9x128x128xbf16, #tpu.memory_space<vmem>>, vector<1x128x128xbf16>
    %143 = vector.shape_cast %142 : vector<1x128x128xbf16> to vector<128x128xbf16>
    %cst_127 = arith.constant dense<0.000000e+00> : vector<96x128xf32>
    %144 = tpu.matmul %141, %143, %cst_127 {dimension_numbers = #tpu.dot_dimension_numbers<[1], [0], [0], [1], [0, 0, 1, 1], [], []>} : vector<96x128xbf16>, vector<128x128xbf16>, vector<96x128xf32> -> vector<96x128xf32>
    %145 = arith.addf %140, %144 : vector<96x128xf32>
    %c0_128 = arith.constant 0 : index
    %c0_129 = arith.constant 0 : index
    %146 = vector.load %arg5[%c0_128, %c0_129] : memref<1x128xf32, #tpu.memory_space<vmem>>, vector<1x128xf32>
    %147 = vector.broadcast %146 : vector<1x128xf32> to vector<96x128xf32>
    %148 = arith.addf %145, %147 : vector<96x128xf32>
    %cst_130 = arith.constant 0.000000e+00 : f32
    %149 = vector.broadcast %cst_130 : f32 to vector<96x128xf32>
    %150 = arith.maximumf %148, %149 : vector<96x128xf32>
    %c96_131 = arith.constant 96 : index
    %c0_132 = arith.constant 0 : index
    %151 = vector.load %arg6[%c96_131, %c0_132] : memref<288x1xf32, #tpu.memory_space<vmem>>, vector<96x1xf32>
    %152 = vector.broadcast %151 : vector<96x1xf32> to vector<96x128xf32>
    %153 = arith.mulf %150, %152 : vector<96x128xf32>
    %cst_133 = arith.constant dense<0.000000e+00> : vector<128xf32>
    %154 = vector.multi_reduction <add>, %153, %cst_133 [0] : vector<96x128xf32> to vector<128xf32>
    %155 = vector.shape_cast %154 : vector<128xf32> to vector<1x128xf32>
    %156 = arith.addf %101, %155 : vector<1x128xf32>
    %c205 = arith.constant 205 : index
    %c0_134 = arith.constant 0 : index
    %157 = vector.load %arg10[%c205, %c0_134] : memref<344x128xbf16, #tpu.memory_space<vmem>>, vector<96x128xbf16>
    %c0_135 = arith.constant 0 : index
    %c0_136 = arith.constant 0 : index
    %c0_137 = arith.constant 0 : index
    %158 = vector.load %arg4[%c0_135, %c0_136, %c0_137] : memref<9x128x128xbf16, #tpu.memory_space<vmem>>, vector<1x128x128xbf16>
    %159 = vector.shape_cast %158 : vector<1x128x128xbf16> to vector<128x128xbf16>
    %cst_138 = arith.constant dense<0.000000e+00> : vector<96x128xf32>
    %160 = tpu.matmul %157, %159, %cst_138 {dimension_numbers = #tpu.dot_dimension_numbers<[1], [0], [0], [1], [0, 0, 1, 1], [], []>} : vector<96x128xbf16>, vector<128x128xbf16>, vector<96x128xf32> -> vector<96x128xf32>
    %c206 = arith.constant 206 : index
    %c0_139 = arith.constant 0 : index
    %161 = vector.load %arg10[%c206, %c0_139] : memref<344x128xbf16, #tpu.memory_space<vmem>>, vector<96x128xbf16>
    %c1_140 = arith.constant 1 : index
    %c0_141 = arith.constant 0 : index
    %c0_142 = arith.constant 0 : index
    %162 = vector.load %arg4[%c1_140, %c0_141, %c0_142] : memref<9x128x128xbf16, #tpu.memory_space<vmem>>, vector<1x128x128xbf16>
    %163 = vector.shape_cast %162 : vector<1x128x128xbf16> to vector<128x128xbf16>
    %cst_143 = arith.constant dense<0.000000e+00> : vector<96x128xf32>
    %164 = tpu.matmul %161, %163, %cst_143 {dimension_numbers = #tpu.dot_dimension_numbers<[1], [0], [0], [1], [0, 0, 1, 1], [], []>} : vector<96x128xbf16>, vector<128x128xbf16>, vector<96x128xf32> -> vector<96x128xf32>
    %165 = arith.addf %160, %164 : vector<96x128xf32>
    %c207 = arith.constant 207 : index
    %c0_144 = arith.constant 0 : index
    %166 = vector.load %arg10[%c207, %c0_144] : memref<344x128xbf16, #tpu.memory_space<vmem>>, vector<96x128xbf16>
    %c2_145 = arith.constant 2 : index
    %c0_146 = arith.constant 0 : index
    %c0_147 = arith.constant 0 : index
    %167 = vector.load %arg4[%c2_145, %c0_146, %c0_147] : memref<9x128x128xbf16, #tpu.memory_space<vmem>>, vector<1x128x128xbf16>
    %168 = vector.shape_cast %167 : vector<1x128x128xbf16> to vector<128x128xbf16>
    %cst_148 = arith.constant dense<0.000000e+00> : vector<96x128xf32>
    %169 = tpu.matmul %166, %168, %cst_148 {dimension_numbers = #tpu.dot_dimension_numbers<[1], [0], [0], [1], [0, 0, 1, 1], [], []>} : vector<96x128xbf16>, vector<128x128xbf16>, vector<96x128xf32> -> vector<96x128xf32>
    %170 = arith.addf %165, %169 : vector<96x128xf32>
    %c223 = arith.constant 223 : index
    %c0_149 = arith.constant 0 : index
    %171 = vector.load %arg10[%c223, %c0_149] : memref<344x128xbf16, #tpu.memory_space<vmem>>, vector<96x128xbf16>
    %c3_150 = arith.constant 3 : index
    %c0_151 = arith.constant 0 : index
    %c0_152 = arith.constant 0 : index
    %172 = vector.load %arg4[%c3_150, %c0_151, %c0_152] : memref<9x128x128xbf16, #tpu.memory_space<vmem>>, vector<1x128x128xbf16>
    %173 = vector.shape_cast %172 : vector<1x128x128xbf16> to vector<128x128xbf16>
    %cst_153 = arith.constant dense<0.000000e+00> : vector<96x128xf32>
    %174 = tpu.matmul %171, %173, %cst_153 {dimension_numbers = #tpu.dot_dimension_numbers<[1], [0], [0], [1], [0, 0, 1, 1], [], []>} : vector<96x128xbf16>, vector<128x128xbf16>, vector<96x128xf32> -> vector<96x128xf32>
    %175 = arith.addf %170, %174 : vector<96x128xf32>
    %c224_154 = arith.constant 224 : index
    %c0_155 = arith.constant 0 : index
    %176 = vector.load %arg10[%c224_154, %c0_155] : memref<344x128xbf16, #tpu.memory_space<vmem>>, vector<96x128xbf16>
    %c4_156 = arith.constant 4 : index
    %c0_157 = arith.constant 0 : index
    %c0_158 = arith.constant 0 : index
    %177 = vector.load %arg4[%c4_156, %c0_157, %c0_158] : memref<9x128x128xbf16, #tpu.memory_space<vmem>>, vector<1x128x128xbf16>
    %178 = vector.shape_cast %177 : vector<1x128x128xbf16> to vector<128x128xbf16>
    %cst_159 = arith.constant dense<0.000000e+00> : vector<96x128xf32>
    %179 = tpu.matmul %176, %178, %cst_159 {dimension_numbers = #tpu.dot_dimension_numbers<[1], [0], [0], [1], [0, 0, 1, 1], [], []>} : vector<96x128xbf16>, vector<128x128xbf16>, vector<96x128xf32> -> vector<96x128xf32>
    %180 = arith.addf %175, %179 : vector<96x128xf32>
    %c225 = arith.constant 225 : index
    %c0_160 = arith.constant 0 : index
    %181 = vector.load %arg10[%c225, %c0_160] : memref<344x128xbf16, #tpu.memory_space<vmem>>, vector<96x128xbf16>
    %c5_161 = arith.constant 5 : index
    %c0_162 = arith.constant 0 : index
    %c0_163 = arith.constant 0 : index
    %182 = vector.load %arg4[%c5_161, %c0_162, %c0_163] : memref<9x128x128xbf16, #tpu.memory_space<vmem>>, vector<1x128x128xbf16>
    %183 = vector.shape_cast %182 : vector<1x128x128xbf16> to vector<128x128xbf16>
    %cst_164 = arith.constant dense<0.000000e+00> : vector<96x128xf32>
    %184 = tpu.matmul %181, %183, %cst_164 {dimension_numbers = #tpu.dot_dimension_numbers<[1], [0], [0], [1], [0, 0, 1, 1], [], []>} : vector<96x128xbf16>, vector<128x128xbf16>, vector<96x128xf32> -> vector<96x128xf32>
    %185 = arith.addf %180, %184 : vector<96x128xf32>
    %c241 = arith.constant 241 : index
    %c0_165 = arith.constant 0 : index
    %186 = vector.load %arg10[%c241, %c0_165] : memref<344x128xbf16, #tpu.memory_space<vmem>>, vector<96x128xbf16>
    %c6_166 = arith.constant 6 : index
    %c0_167 = arith.constant 0 : index
    %c0_168 = arith.constant 0 : index
    %187 = vector.load %arg4[%c6_166, %c0_167, %c0_168] : memref<9x128x128xbf16, #tpu.memory_space<vmem>>, vector<1x128x128xbf16>
    %188 = vector.shape_cast %187 : vector<1x128x128xbf16> to vector<128x128xbf16>
    %cst_169 = arith.constant dense<0.000000e+00> : vector<96x128xf32>
    %189 = tpu.matmul %186, %188, %cst_169 {dimension_numbers = #tpu.dot_dimension_numbers<[1], [0], [0], [1], [0, 0, 1, 1], [], []>} : vector<96x128xbf16>, vector<128x128xbf16>, vector<96x128xf32> -> vector<96x128xf32>
    %190 = arith.addf %185, %189 : vector<96x128xf32>
    %c242 = arith.constant 242 : index
    %c0_170 = arith.constant 0 : index
    %191 = vector.load %arg10[%c242, %c0_170] : memref<344x128xbf16, #tpu.memory_space<vmem>>, vector<96x128xbf16>
    %c7_171 = arith.constant 7 : index
    %c0_172 = arith.constant 0 : index
    %c0_173 = arith.constant 0 : index
    %192 = vector.load %arg4[%c7_171, %c0_172, %c0_173] : memref<9x128x128xbf16, #tpu.memory_space<vmem>>, vector<1x128x128xbf16>
    %193 = vector.shape_cast %192 : vector<1x128x128xbf16> to vector<128x128xbf16>
    %cst_174 = arith.constant dense<0.000000e+00> : vector<96x128xf32>
    %194 = tpu.matmul %191, %193, %cst_174 {dimension_numbers = #tpu.dot_dimension_numbers<[1], [0], [0], [1], [0, 0, 1, 1], [], []>} : vector<96x128xbf16>, vector<128x128xbf16>, vector<96x128xf32> -> vector<96x128xf32>
    %195 = arith.addf %190, %194 : vector<96x128xf32>
    %c243 = arith.constant 243 : index
    %c0_175 = arith.constant 0 : index
    %196 = vector.load %arg10[%c243, %c0_175] : memref<344x128xbf16, #tpu.memory_space<vmem>>, vector<96x128xbf16>
    %c8_176 = arith.constant 8 : index
    %c0_177 = arith.constant 0 : index
    %c0_178 = arith.constant 0 : index
    %197 = vector.load %arg4[%c8_176, %c0_177, %c0_178] : memref<9x128x128xbf16, #tpu.memory_space<vmem>>, vector<1x128x128xbf16>
    %198 = vector.shape_cast %197 : vector<1x128x128xbf16> to vector<128x128xbf16>
    %cst_179 = arith.constant dense<0.000000e+00> : vector<96x128xf32>
    %199 = tpu.matmul %196, %198, %cst_179 {dimension_numbers = #tpu.dot_dimension_numbers<[1], [0], [0], [1], [0, 0, 1, 1], [], []>} : vector<96x128xbf16>, vector<128x128xbf16>, vector<96x128xf32> -> vector<96x128xf32>
    %200 = arith.addf %195, %199 : vector<96x128xf32>
    %c0_180 = arith.constant 0 : index
    %c0_181 = arith.constant 0 : index
    %201 = vector.load %arg5[%c0_180, %c0_181] : memref<1x128xf32, #tpu.memory_space<vmem>>, vector<1x128xf32>
    %202 = vector.broadcast %201 : vector<1x128xf32> to vector<96x128xf32>
    %203 = arith.addf %200, %202 : vector<96x128xf32>
    %cst_182 = arith.constant 0.000000e+00 : f32
    %204 = vector.broadcast %cst_182 : f32 to vector<96x128xf32>
    %205 = arith.maximumf %203, %204 : vector<96x128xf32>
    %c192_183 = arith.constant 192 : index
    %c0_184 = arith.constant 0 : index
    %206 = vector.load %arg6[%c192_183, %c0_184] : memref<288x1xf32, #tpu.memory_space<vmem>>, vector<96x1xf32>
    %207 = vector.broadcast %206 : vector<96x1xf32> to vector<96x128xf32>
    %208 = arith.mulf %205, %207 : vector<96x128xf32>
    %cst_185 = arith.constant dense<0.000000e+00> : vector<128xf32>
    %209 = vector.multi_reduction <add>, %208, %cst_185 [0] : vector<96x128xf32> to vector<128xf32>
    %210 = vector.shape_cast %209 : vector<128xf32> to vector<1x128xf32>
    %211 = arith.addf %156, %210 : vector<1x128xf32>
    %cst_186 = arith.constant 3.906250e-03 : f32
    %212 = vector.broadcast %cst_186 : f32 to vector<1x128xf32>
    %213 = arith.mulf %211, %212 : vector<1x128xf32>
    %214 = arith.truncf %213 : vector<1x128xf32> to vector<1x128xbf16>
    %c0_187 = arith.constant 0 : index
    %c0_188 = arith.constant 0 : index
    %215 = vector.load %arg7[%c0_187, %c0_188] : memref<128x128xbf16, #tpu.memory_space<vmem>>, vector<128x128xbf16>
    %cst_189 = arith.constant dense<0.000000e+00> : vector<1x128xf32>
    %216 = tpu.matmul %214, %215, %cst_189 {dimension_numbers = #tpu.dot_dimension_numbers<[1], [0], [0], [1], [0, 0, 1, 1], [], []>} : vector<1x128xbf16>, vector<128x128xbf16>, vector<1x128xf32> -> vector<1x128xf32>
    %c0_190 = arith.constant 0 : index
    %c0_191 = arith.constant 0 : index
    %217 = vector.load %arg8[%c0_190, %c0_191] : memref<1x128xf32, #tpu.memory_space<vmem>>, vector<1x128xf32>
    %218 = arith.addf %216, %217 : vector<1x128xf32>
    %c0_192 = arith.constant 0 : index
    %c0_193 = arith.constant 0 : index
    %c0_194 = arith.constant 0 : index
    %219 = vector.load %arg9[%c0_192, %c0_193, %c0_194] : memref<1x1x128xf32, #tpu.memory_space<vmem>>, vector<1x1x128xf32>
    %220 = vector.shape_cast %219 : vector<1x1x128xf32> to vector<1x128xf32>
    %221 = vector.shape_cast %218 : vector<1x128xf32> to vector<1x1x128xf32>
    tpu.vector_store %arg9[%c0_192, %c0_193, %c0_194], %221 {strides = array<i32>} : memref<1x1x128xf32, #tpu.memory_space<vmem>>, vector<1x1x128xf32>,
    return
  }
  func.func @transform_0(%arg0: i32) -> (i32, i32, i32) {
    %c0_i32 = arith.constant 0 : i32
    %c0_i32_0 = arith.constant 0 : i32
    %c0_i32_1 = arith.constant 0 : i32
    return %arg0, %c0_i32, %c0_i32_0 : i32, i32, i32
  }
  func.func @transform_1(%arg0: i32) -> (i32, i32) {
    %c0_i32 = arith.constant 0 : i32
    %c0_i32_0 = arith.constant 0 : i32
    %c0_i32_1 = arith.constant 0 : i32
    return %c0_i32, %c0_i32_0 : i32, i32
  }
  func.func @transform_2(%arg0: i32) -> (i32, i32) {
    %c0_i32 = arith.constant 0 : i32
    %c0_i32_0 = arith.constant 0 : i32
    %c0_i32_1 = arith.constant 0 : i32
    return %c0_i32, %c0_i32_0 : i32, i32
  }
  func.func @transform_3(%arg0: i32) -> (i32, i32, i32) {
    %c0_i32 = arith.constant 0 : i32
    %c0_i32_0 = arith.constant 0 : i32
    %c0_i32_1 = arith.constant 0 : i32
    %c0_i32_2 = arith.constant 0 : i32
    return %c0_i32, %c0_i32_0, %c0_i32_1 : i32, i32, i32
  }
  func.func @transform_4(%arg0: i32) -> (i32, i32) {
    %c0_i32 = arith.constant 0 : i32
    %c0_i32_0 = arith.constant 0 : i32
    %c0_i32_1 = arith.constant 0 : i32
    return %c0_i32, %c0_i32_0 : i32, i32
  }
  func.func @transform_5(%arg0: i32) -> (i32, i32) {
    %c0_i32 = arith.constant 0 : i32
    %c0_i32_0 = arith.constant 0 : i32
    %c0_i32_1 = arith.constant 0 : i32
    return %c0_i32, %c0_i32_0 : i32, i32
  }
  func.func @transform_6(%arg0: i32) -> (i32, i32) {
    %c0_i32 = arith.constant 0 : i32
    %c0_i32_0 = arith.constant 0 : i32
    %c0_i32_1 = arith.constant 0 : i32
    return %c0_i32, %c0_i32_0 : i32, i32
  }
  func.func @transform_7(%arg0: i32) -> (i32, i32) {
    %c0_i32 = arith.constant 0 : i32
    %c0_i32_0 = arith.constant 0 : i32
    %c0_i32_1 = arith.constant 0 : i32
    return %c0_i32, %c0_i32_0 : i32, i32
  }
  func.func @transform_8(%arg0: i32) -> (i32, i32, i32) {
    %c0_i32 = arith.constant 0 : i32
    %c0_i32_0 = arith.constant 0 : i32
    %c0_i32_1 = arith.constant 0 : i32
    return %arg0, %c0_i32, %c0_i32_0 : i32, i32, i32
  }
}

</mosaic_0001>

<bundles_post_ra>
// kernel: custom_model_forward.1
= control target key start
LH: loop header
LB: loop body
LE: loop exit
PB: predicated region body
PF: predicated region fallthrough
CT: control target
= control target key end

     0   :  { %13 = vsyncpa [#allocation4], 0  ;;  %s11649_s0 = inlined_call_operand.vmem [shape: bf16[2,288,36], index: 0, kind: input, shape index: {}]   ;;  %s11650_s1 = inlined_call_operand.vmem [shape: bf16[36,128], index: 1, kind: input, shape index: {}]   ;;  %s11651_s2 = inlined_call_operand.vmem [shape: f32[1,128], index: 2, kind: input, shape index: {}]   ;;  %s11652_s3 = inlined_call_operand.vmem [shape: bf16[9,128,128], index: 3, kind: input, shape index: {}]   ;;  %s11653_s4 = inlined_call_operand.vmem [shape: f32[1,128], index: 4, kind: input, shape index: {}]   ;;  %s11654_s5 = inlined_call_operand.vmem [shape: f32[288,1], index: 5, kind: input, shape index: {}]   ;;  %s11655_s6 = inlined_call_operand.vmem [shape: bf16[128,128], index: 6, kind: input, shape index: {}]   ;;  %s11656_s7 = inlined_call_operand.vmem [shape: f32[1,128], index: 7, kind: input, shape index: {}]   ;;  %s11657_s8 = inlined_call_operand.hbm [shape: f32[2,1,128], index: 8, kind: output, shape index: {}]  }
   0x1   :  { %15 = vsyncpa [#allocation4 + $0x1], 0  ;;  %s9193_s27 = smov 0   ;;  %s9195_s28 = smov 0  }
   0x2   :  { %s9197_s29 = smov 0   ;;  %s9199_s30 = smov 0  }
   0x3 LB: > { %s9214_s9 = sadd.s32 4294967295, %s9142_s30   ;;  %s6648_s10 = sadd.s32 4294967294, %s9142_s30   ;;  %s9142_s30 = sphi %s9199_s30, %s11725_s30   ;;  %s9138_s29 = sphi %s9197_s29, %s11724_s29   ;;  %s9134_s28 = sphi %s9195_s28, %s11723_s28   ;;  %s9130_s27 = sphi %s9193_s27, %s11722_s27  }
   0x4   : > { %s9218_s11 = sadd.s32 1, %s9142_s30   ;;  %s201_s12 = sadd.s32 1, %s9138_s29 }
   0x5   : > { %s198_s13 = ssub.s32 %s9142_s30, %s9218_s11  ;;  %p211_p0 = scmp.ne.s32.totalorder %s9138_s29, %s9134_s28 }
   0x6   : > { %p199_p1 = scmp.eq.s32.totalorder %s198_s13, 0  ;;  %p212_p2 = scmp.eq.s32.totalorder %s9214_s9, 1 }
   0x7   : > { %p217_p3 = scmp.ne.s32.totalorder %s9134_s28, %s9130_s27  ;;  %p218_p4 = scmp.eq.s32.totalorder %s6648_s10, 1 }
   0x8   : > { %s9229_s14 = scalar_select %p199_p1, %s9138_s29, %s201_s12  }
   0x9   : > { %p9231_p5 = por %p212_p2, %p211_p0  ;;  %p9235_p6 = por %p218_p4, %p217_p3 }
   0xa   : > { %p6651_p7 = scmp.ge.s32.totalorder %s9142_s30, 1  ;;  %p265_p8 = scmp.lt.s32.totalorder %s9142_s30, 3 }
   0xc   : > { %p266_p9 = pnand %p6651_p7, %p265_p8 }
   0xe   : > { %269 = sbr.rel (%p266_p9) target bundleno = 1179 (0x49b), region = 52 }
  0x15   : > { %v9244_v0 = vld [vmem:[%s11654_s5 + $0x10] sm:$0xff]  ;;  %v9249_v1 = vld [vmem:[%s11654_s5] sm:$0xff]  ;;  %v9144_v2 = vmov 0   ;;  %p298_p10 = scmp.lt.s32.totalorder %s9214_s9, 1  ;;  %v9263_v5 = vld [vmem:[%s11654_s5 + $0x18] sm:$0xff]  ;;  %vm399_vm0 = vcmask 1041408  }
  0x16   : > { %8786 = vset.pattern.permute.xlu1 %v9144_v2  ;;  %305 = vst [vmem:[#allocation2 + $0x4] sm:$0xf] %v9144_v2  ;;  %306 = vst [vmem:[#allocation2 + $0x8] sm:$0xf] %v9144_v2  ;;  %8785 = vset.pattern.permute.xlu0 %v9144_v2  ;;  %v8787_v3 = vld [vmem:[%s11650_s1] sm:$0xff]   ;;  %v9268_v6 = vld [vmem:[%s11654_s5 + $0x8] sm:$0xff] }
  0x17   : > { %309 = vst [vmem:[#allocation2 + $0xa4] sm:$0xf] %v9144_v2  ;;  %310 = vst [vmem:[#allocation2 + $0xa8] sm:$0xf] %v9144_v2  ;;  %520 = vperm.xlu1 %8786, %v9244_v0   ;;  %510 = vperm.xlu0 %8785, %v9249_v1   ;;  %v8788_v4 = vld [vmem:[%s11650_s1] sm:$0xff]   ;;  %s299_s13 = scalar_select %p298_p10, %s9214_s9, 1 }
  0x18   : > { %307 = vst [vmem:[#allocation2 + $0xc] sm:$0xf] %v9144_v2  ;;  %308 = vst [vmem:[#allocation2 + $0xa0] sm:$0xf] %v9144_v2  ;;  %7621 = vmatprep.subr.bf16.mxu0 %v8787_v3  ;;  %7639 = vmatprep.subr.bf16.mxu1 %v8788_v4  ;;  %v8789_v7 = vld [vmem:[%s11650_s1 + $0x8] sm:$0xff]   ;;  %v9290_v11 = vld [vmem:[%s11654_s5 + $0x20] sm:$0xff] }
  0x19   : > { %7622 = vmatpush3.bf16.msra.mxu0 %v8787_v3  ;;  %7640 = vmatpush3.bf16.msra.mxu1 %v8788_v4  ;;  %v8790_v8 = vld [vmem:[%s11650_s1 + $0x8] sm:$0xff]   ;;  %s8742_s21 = smul.u32 144, %s299_s13  ;;  %v8791_v10 = vld [vmem:[%s11650_s1 + $0x10] ss:$0 sps:$4 sm:$0x33]   ;;  %vm380_vm1 = vcmask 293888  }
  0x1a   : > { %v9282_v9 = vld [vmem:[%s11654_s5 + $0x28] sm:$0xff]  ;;  %7623 = vmatprep.subr.bf16.mxu0 %v8789_v7  ;;  %7641 = vmatprep.subr.bf16.mxu1 %v8790_v8  ;;  %v8792_v12 = vld [vmem:[%s11650_s1 + $0x10] ss:$0 sps:$4 sm:$0x33]   ;;  %v401_v14 = vsel %vm399_vm0, %v8791_v10, 0  ;;  %v9306_v15 = vld [vmem:[%s11654_s5 + $0x38] sm:$0xff] }
  0x1b   : > { %525 = vperm.xlu1 %8786, %v9263_v5   ;;  %515 = vperm.xlu0 %8785, %v9268_v6   ;;  %s9298_s19 = scalar_lea.vmem %s11649_s0, %s8742_s21  ;;  %v728_v17 = vsel %vm399_vm0, %v8792_v12, 0  ;;  %v9315_v18 = vld [vmem:[%s11654_s5 + $0x30] sm:$0xff]  ;;  %v9325_v21 = vld [vmem:[%s11654_s5 + $0x48] sm:$0xff]  ;;  %v9330_v22 = vld [vmem:[%s11654_s5 + $0x40] sm:$0xff]  ;;  %vm1374_vm2 = vcmask 1044480   ;;  %vm2918_vm6 = vcmask 1046528  }
  0x1c   : > { %v8793_v13 = vld [vmem:[%s9298_s19] sm:$0xff]   ;;  %v8794_v16 = vld [vmem:[%s9298_s19 + $0x30] sm:$0xff]   ;;  %v8795_v19 = vld [vmem:[%s9298_s19 + $0x8] sm:$0xff]   ;;  %vm2435_vm3 = vsmask.f32 7424  ;;  %vm9146_vm8 = vmmov 0  }
  0x1d   : > { %7624 = vmatpush3.bf16.msra.mxu0 %v8789_v7  ;;  %7642 = vmatpush3.bf16.msra.mxu1 %v8790_v8  ;;  %v8796_v20 = vld [vmem:[%s9298_s19 + $0x38] sm:$0xff]   ;;  %v8797_v23 = vld [vmem:[%s9298_s19 + $0x10] sm:$0xff]   ;;  %v8798_v24 = vld [vmem:[%s9298_s19 + $0x40] sm:$0xff]   ;;  %vm1526_vm4 = vsmask.f32 5376  ;;  %s296_s22 = sand.u32 1, %s9134_s28  }
  0x1e   : > { %8739 = vmatprep.subr.msk.bf16.mxu0 %vm399_vm0, %v8791_v10  ;;  %8740 = vmatprep.subr.msk.bf16.mxu1 %vm399_vm0, %v8792_v12  ;;  %v9342_v25 = vld [vmem:[%s11654_s5 + $0x58] sm:$0xff]  ;;  %v9347_v26 = vld [vmem:[%s11654_s5 + $0x50] sm:$0xff]  ;;  %v8801_v27 = vld [vmem:[%s11650_s1] sm:$0xff]   ;;  %vm1745_vm5 = vsmask.f32 4352  ;;  %s7060_s24 = sshll.u32 %s9214_s9, 4 }
  0x1f   : > { %535 = vperm.xlu1 %8786, %v9282_v9   ;;  %530 = vperm.xlu0 %8785, %v9290_v11   ;;  %v8799_v28 = vld [vmem:[%s9298_s19 + $0x18] sm:$0xff]   ;;  %v8800_v29 = vld [vmem:[%s9298_s19 + $0x48] sm:$0xff]   ;;  %v8802_v30 = vld [vmem:[%s9298_s19 + $0x20] sm:$0xff]   ;;  %vm3100_vm7 = vsmask.f32 6400  ;;  %s297_s25 = scalar_lea.vmem [#allocation3], %s296_s22  ;;  %s11607_s12 = scalar_lea.hbm %s11657_s8, %s7060_s24 }
  0x20   : > { %7627 = vmatprep.mubr.msk.bf16.mxu0 %vm380_vm1, %v8793_v13  ;;  %7645 = vmatprep.mubr.msk.bf16.mxu1 %vm380_vm1, %v8794_v16  ;;  %v8803_v31 = vld [vmem:[%s9298_s19 + $0x50] sm:$0xff]   ;;  %v9364_v32 = vld [vmem:[%s11654_s5 + $0x68] sm:$0xff]  ;;  %v9370_v33 = vld [vmem:[%s11654_s5 + $0x60] sm:$0xff]  ;;  %s6593_s26 = sshll.u32 %s297_s25, 4  ;;  %s6581_s13 = scalar_lea.sflag [#allocation4], %s296_s22  ;;  %s11609_s26 = int_to_ptr.vmem [resolvable:$true] %s6593_s26 }
  0x21   : > { %7626 = vmatpush3.bf16.msra.mxu0 %v401_v14  ;;  %7644 = vmatpush3.bf16.msra.mxu1 %v728_v17  ;;  %v8806_v34 = vld [vmem:[%s11650_s1 + $0x8] sm:$0xff]   ;;  %v8807_v35 = vld [vmem:[%s11650_s1 + $0x10] ss:$0 sps:$4 sm:$0x33]   ;;  %v9386_v36 = vld [vmem:[%s11654_s5 + $0x78] sm:$0xff]  ;;  %s9080_s9 = scalar_lea.vmem %s11609_s26, 16 }
  0x22   : > { %7657 = vmatprep.subr.bf16.mxu0 %v8801_v27  ;;  %v9391_v37 = vld [vmem:[%s11654_s5 + $0x70] sm:$0xff]  ;;  %v8804_v38 = vld [vmem:[%s9298_s19 + $0x28] sm:$0xff]   ;;  %v8805_v39 = vld [vmem:[%s9298_s19 + $0x58] sm:$0xff]   ;;  %v1055_v40 = vsel %vm399_vm0, %v8807_v35, 0  ;;  %p9081_p11 = scmp.ne.s32.totalorder %s11609_s26, %s9080_s9  ;;  %s9147_s17 = smov [#allocation3]  }
  0x23   : > { %545 = vperm.xlu1 %8786, %v9306_v15   ;;  %540 = vperm.xlu0 %8785, %v9315_v18   ;;  %v8808_v41 = vld [vmem:[%s9298_s19 + $0x60] sm:$0xff]   ;;  %v9403_v42 = vld [vmem:[%s11654_s5 + $0xa8] sm:$0xff]  ;;  %v9418_v44 = vld [vmem:[%s11654_s5 + $0xb8] sm:$0xff]  ;;  %s9084_s18 = sshll.u32 %s9147_s17, 4  ;;  %s9085_s18 = int_to_ptr.vmem [resolvable:$false] %s9084_s18 }
  0x24   : > { %7628 = vmatmul.mubr.msk.bf16.vlgmr.msra.gmra.mrb[0].mxu0 %vm380_vm1, %v8795_v19  ;;  %7646 = vmatmul.mubr.msk.bf16.vlgmr.msra.gmra.mrb[0].mxu1 %vm380_vm1, %v8796_v20  ;;  %v9409_v43 = vld [vmem:[%s11654_s5 + $0xa0] sm:$0xff]  ;;  %v9423_v45 = vld [vmem:[%s11654_s5 + $0xb0] sm:$0xff]  ;;  %v8809_v46 = vld [vmem:[%s9298_s19 + $0x68] sm:$0xff]   ;;  %p9082_p12 = pnand %p9081_p11, %p9231_p5  ;;  %s9086_s20 = scalar_lea.vmem %s9085_s18, 32 }
  0x25   : > { %7631 = vmatprep.mubr.msk.bf16.mxu0 %vm380_vm1, %v8797_v23  ;;  %7649 = vmatprep.mubr.msk.bf16.mxu1 %vm380_vm1, %v8798_v24  ;;  %v8810_v47 = vld [vmem:[%s9298_s19 + $0x70] sm:$0xff]   ;;  %v1151_v48 = vld [vmem:[%s11654_s5 + $0xc8] sm:$0xff]  ;;  %v1150_v49 = vld [vmem:[%s11654_s5 + $0xc0] sm:$0xff]  ;;  %p9087_p0 = scmp.lt.s32.totalorder %s11609_s26, %s9085_s18  ;;  %p9088_p1 = scmp.lt.s32.totalorder %s9086_s20, %s9080_s9 }
  0x26   : > { %7658 = vmatpush3.bf16.msra.mxu0 %v8801_v27  ;;  %v9440_v50 = vld [vmem:[%s11654_s5 + $0xd8] sm:$0xff]  ;;  %v1152_v51 = vld [vmem:[%s11654_s5 + $0xd0] sm:$0xff]  ;;  %v8812_v53 = vld [vmem:[%s9298_s19 + $0x80] sm:$0xff]   ;;  %p9083_p13 = pneg %p9082_p12 }
  0x27   : > { %555 = vperm.xlu1 %8786, %v9325_v21   ;;  %550 = vperm.xlu0 %8785, %v9330_v22   ;;  %v8811_v52 = vld [vmem:[%s9298_s19 + $0x78] sm:$0xff]   ;;  %v9450_v54 = vld [vmem:[%s11654_s5 + $0x88] sm:$0xff]  ;;  %v827_v55 = vld [vmem:[%s11654_s5 + $0x80] sm:$0xff]  ;;  %p9089_p2 = por %p9088_p1, %p9087_p0 }
  0x28   : > { %7659 = vmatprep.subr.bf16.mxu0 %v8806_v34  ;;  %v9461_v56 = vld [vmem:[%s11654_s5 + $0x98] sm:$0xff]  ;;  %v9466_v57 = vld [vmem:[%s11654_s5 + $0x90] sm:$0xff]  ;;  %v8813_v58 = vld [vmem:[%s9298_s19 + $0x88] sm:$0xff]  }
  0x29   : > { %v9473_v59 = vld [vmem:[%s11654_s5 + $0xe8] sm:$0xff]  ;;  %v1154_v60 = vld [vmem:[%s11654_s5 + $0xe0] sm:$0xff]  ;;  %v9484_v61 = vld [vmem:[%s11654_s5 + $0xf8] sm:$0xff]  ;;  %p9090_p3 = pnand %p9089_p2, %p9083_p13 }
  0x2a   : > { %7660 = vmatpush3.bf16.msra.mxu0 %v8806_v34  ;;  %v9489_v62 = vld [vmem:[%s11654_s5 + $0xf0] sm:$0xff]  ;;  %v9495_v63 = vld [vmem:[%s11654_s5 + $0x108] sm:$0xff]  ;;  %v9500_v2 = vld [vmem:[%s11654_s5 + $0x100] sm:$0xff] }
  0x2b   : > { %565 = vperm.xlu1 %8786, %v9342_v25   ;;  %560 = vperm.xlu0 %8785, %v9347_v26   ;;  %v9507_v3 = vld [vmem:[%s11654_s5 + $0x118] sm:$0xff]  ;;  %v9512_v4 = vld [vmem:[%s11654_s5 + $0x110] sm:$0xff]  ;;  %v8814_v7 = vld [vmem:[%s11652_s3 + $0x100] sm:$0xff]  }
  0x2c   : > { %7632 = vmatmul.mubr.msk.bf16.gmra.mrb[4].mxu0 %vm380_vm1, %v8799_v28  ;;  %7650 = vmatmul.mubr.msk.bf16.gmra.mrb[4].mxu1 %vm380_vm1, %v8800_v29  ;;  %v8818_v8 = vld [vmem:[%s11652_s3 + $0x110] sm:$0xff]   ;;  %v8820_v10 = vld [vmem:[%s11652_s3 + $0x118] sm:$0xff]   ;;  %v8822_v12 = vld [vmem:[%s11652_s3 + $0x120] sm:$0xff]  }
  0x2d   : > { %7635 = vmatprep.mubr.msk.bf16.mxu0 %vm380_vm1, %v8802_v30  ;;  %7653 = vmatprep.mubr.msk.bf16.mxu1 %vm380_vm1, %v8803_v31  ;;  %v8823_v13 = vld [vmem:[%s11652_s3 + $0x60] sm:$0xff]   ;;  %v8825_v14 = vld [vmem:[%s11652_s3 + $0x68] sm:$0xff]   ;;  %v8826_v16 = vld [vmem:[%s11652_s3 + $0x130] sm:$0xff]  }
  0x2e   : > { %8741 = vmatprep.subr.msk.bf16.mxu0 %vm399_vm0, %v8807_v35  ;;  %7787 = vmatprep.subr.bf16.mxu1 %v8814_v7  ;;  %v8827_v17 = vld [vmem:[%s11652_s3 + $0x70] sm:$0xff]   ;;  %v9592_v19 = vld [vmem:[%s11652_s3 + $0x140] sm:$0xff]  }
  0x2f   : > { %842 = vperm.xlu1 %8786, %v9364_v32   ;;  %837 = vperm.xlu0 %8785, %v9370_v33   ;;  %v9598_v20 = vld [vmem:[%s11652_s3] sm:$0xff]  }
  0x30   : > { %7662 = vmatpush3.bf16.msra.mxu0 %v1055_v40  ;;  %7788 = vmatpush3.bf16.msra.mxu1 %v8814_v7 }
  0x33   : > { %852 = vperm.xlu1 %8786, %v9386_v36   ;;  %847 = vperm.xlu0 %8785, %v9391_v37  }
  0x34   : > { %7636 = vmatmul.mubr.msk.bf16.gmra.mrb[8].mxu0 %vm380_vm1, %v8804_v38  ;;  %7654 = vmatmul.mubr.msk.bf16.gmra.mrb[8].mxu1 %vm380_vm1, %v8805_v39 }
  0x35   : > { %7663 = vmatprep.mubr.msk.bf16.mxu0 %vm380_vm1, %v8808_v41 }
  0x37   : > { %882 = vperm.xlu1 %8786, %v9403_v42   ;;  %877 = vperm.xlu0 %8785, %v9409_v43  }
  0x3b   : > { %892 = vperm.xlu1 %8786, %v9418_v44   ;;  %887 = vperm.xlu0 %8785, %v9423_v45  }
  0x3c   : > { %7664 = vmatmul.mubr.msk.bf16.vlgmr.msra.gmra.mrb[12].mxu0 %vm380_vm1, %v8809_v46 }
  0x3d   : > { %7667 = vmatprep.mubr.msk.bf16.mxu0 %vm380_vm1, %v8810_v47 }
  0x3f   : > { %1169 = vperm.xlu1 %8786, %v1151_v48   ;;  %1164 = vperm.xlu0 %8785, %v1150_v49  }
  0x43   : > { %1179 = vperm.xlu1 %8786, %v9440_v50   ;;  %1174 = vperm.xlu0 %8785, %v1152_v51  }
  0x44   : > { %7668 = vmatmul.mubr.msk.bf16.gmra.mrb[16].mxu0 %vm380_vm1, %v8811_v52 }
  0x45   : > { %7671 = vmatprep.mubr.msk.bf16.mxu0 %vm380_vm1, %v8812_v53 }
  0x47   : > { %862 = vperm.xlu1 %8786, %v9450_v54   ;;  %857 = vperm.xlu0 %8785, %v827_v55  }
  0x4b   : > { %872 = vperm.xlu1 %8786, %v9461_v56   ;;  %867 = vperm.xlu0 %8785, %v9466_v57  }
  0x4c   : > { %7672 = vmatmul.mubr.msk.bf16.gmra.mrb[20].mxu0 %vm380_vm1, %v8813_v58  ;;  %v9651_v58 = vld [vmem:[#allocation2 + $0x8] sm:$0xf] }
  0x4f   : > { %1189 = vperm.xlu1 %8786, %v9473_v59   ;;  %1184 = vperm.xlu0 %8785, %v1154_v60  }
  0x53   : > { %1199 = vperm.xlu1 %8786, %v9484_v61   ;;  %1194 = vperm.xlu0 %8785, %v9489_v62  }
  0x57   : > { %1209 = vperm.xlu1 %8786, %v9495_v63   ;;  %1204 = vperm.xlu0 %8785, %v9500_v2  }
  0x5b   : > { %1219 = vperm.xlu1 %8786, %v9507_v3   ;;  %1214 = vperm.xlu0 %8785, %v9512_v4  }
  0x5f   : > { %3335 = vperm.xlu1 %8786, %v9268_v6   ;;  %3330 = vperm.xlu0 %8785, %v9249_v1   ;;  %v8815_v1 = vld [vmem:[%s11652_s3 + $0x40] sm:$0xff]   ;;  %v8816_v6 = vld [vmem:[%s11652_s3 + $0x108] sm:$0xff]  }
  0x60   : > { %7675 = vmatprep.subr.bf16.mxu0 %v8815_v1  ;;  %7789 = vmatprep.subr.bf16.mxu1 %v8816_v6 }
  0x61   : > { %7676 = vmatpush3.bf16.msra.mxu0 %v8815_v1  ;;  %7790 = vmatpush3.bf16.msra.mxu1 %v8816_v6 }
  0x62   : > { %7791 = vmatprep.subr.bf16.mxu1 %v8818_v8 }
  0x63   : > { %4862 = vperm.xlu1 %8786, %v9364_v32   ;;  %4857 = vperm.xlu0 %8785, %v9370_v33  }
  0x65   : > { %7792 = vmatpush3.bf16.msra.mxu1 %v8818_v8 }
  0x66   : > { %7793 = vmatprep.subr.bf16.mxu1 %v8820_v10 }
  0x67   : > { %4867 = vperm.xlu1 %8786, %v9391_v37   ;;  %3340 = vperm.xlu0 %8785, %v9244_v0   ;;  %v8817_v0 = vld [vmem:[%s11652_s3 + $0x48] sm:$0xff]  }
  0x68   : > { %7677 = vmatprep.subr.bf16.mxu0 %v8817_v0 }
  0x69   : > { %7678 = vmatpush3.bf16.msra.mxu0 %v8817_v0  ;;  %7794 = vmatpush3.bf16.msra.mxu1 %v8820_v10 }
  0x6a   : > { %7795 = vmatprep.subr.bf16.mxu1 %v8822_v12 }
  0x6b   : > { %6389 = vperm.xlu1 %8786, %v1151_v48   ;;  %6384 = vperm.xlu0 %8785, %v1150_v49  }
  0x6d   : > { %7796 = vmatpush3.bf16.msra.mxu1 %v8822_v12 }
  0x6f   : > { %4872 = vperm.xlu1 %8786, %v9386_v36   ;;  %3345 = vperm.xlu0 %8785, %v9263_v5   ;;  %v8819_v5 = vld [vmem:[%s11652_s3 + $0x50] sm:$0xff]  }
  0x70   : > { %7679 = vmatprep.subr.bf16.mxu0 %v8819_v5 }
  0x71   : > { %7680 = vmatpush3.bf16.msra.mxu0 %v8819_v5 }
  0x73   : > { %3350 = vperm.xlu1 %8786, %v9290_v11   ;;  %6394 = vperm.xlu0 %8785, %v1152_v51   ;;  %v8821_v11 = vld [vmem:[%s11652_s3 + $0x58] sm:$0xff]  }
  0x74   : > { %7681 = vmatprep.subr.bf16.mxu0 %v8821_v11 }
  0x75   : > { %7682 = vmatpush3.bf16.msra.mxu0 %v8821_v11 }
  0x76   : > { %7683 = vmatprep.subr.bf16.mxu0 %v8823_v13 }
  0x77   : > { %6399 = vperm.xlu1 %8786, %v9440_v50   ;;  %4877 = vperm.xlu0 %8785, %v827_v55  }
  0x79   : > { %7684 = vmatpush3.bf16.msra.mxu0 %v8823_v13 }
  0x7a   : > { %7685 = vmatprep.subr.bf16.mxu0 %v8825_v14 }
  0x7b   : > { %4882 = vperm.xlu1 %8786, %v9450_v54   ;;  %3355 = vperm.xlu0 %8785, %v9282_v9   ;;  %v8824_v9 = vld [vmem:[%s11652_s3 + $0x128] sm:$0xff]  }
  0x7c   : > { %7797 = vmatprep.subr.bf16.mxu1 %v8824_v9 }
  0x7d   : > { %7798 = vmatpush3.bf16.msra.mxu1 %v8824_v9  ;;  %7686 = vmatpush3.bf16.msra.mxu0 %v8825_v14 }
  0x7e   : > { %7799 = vmatprep.subr.bf16.mxu1 %v8826_v16  ;;  %7687 = vmatprep.subr.bf16.mxu0 %v8827_v17 }
  0x7f   : > { %3360 = vperm.xlu1 %8786, %v9315_v18   ;;  %6404 = vperm.xlu0 %8785, %v1154_v60   ;;  %v8828_v18 = vld [vmem:[%s11652_s3 + $0x138] sm:$0xff]  }
  0x81   : > { %7800 = vmatpush3.bf16.msra.mxu1 %v8826_v16  ;;  %7688 = vmatpush3.bf16.msra.mxu0 %v8827_v17 }
  0x82   : > { %7801 = vmatprep.subr.bf16.mxu1 %v8828_v18 }
  0x83   : > { %6409 = vperm.xlu1 %8786, %v9473_v59   ;;  %4887 = vperm.xlu0 %8785, %v9466_v57  }
  0x85   : > { %7802 = vmatpush3.bf16.msra.mxu1 %v8828_v18 }
  0x86   : > { %7815 = vmatprep.subr.bf16.mxu1 %v9592_v19 }
  0x87   : > { %4892 = vperm.xlu1 %8786, %v9461_v56   ;;  %3365 = vperm.xlu0 %8785, %v9306_v15   ;;  %v8829_v15 = vld [vmem:[%s11652_s3 + $0x78] sm:$0xff]  }
  0x88   : > { %7689 = vmatprep.subr.bf16.mxu0 %v8829_v15 }
  0x89   : > { %7690 = vmatpush3.bf16.msra.mxu0 %v8829_v15 }
  0x8a   : > { %7703 = vmatprep.subr.bf16.mxu0 %v9598_v20 }
  0x8b   : > { %3370 = vperm.xlu1 %8786, %v9330_v22   ;;  %6414 = vperm.xlu0 %8785, %v9489_v62  }
  0x8f   : > { %6419 = vperm.xlu1 %8786, %v9484_v61   ;;  %4897 = vperm.xlu0 %8785, %v9409_v43   ;;  %v9640_v43 = vld [vmem:[%s11651_s2] ss:$0 sm:$0xff] }
  0x93   : > { %4902 = vperm.xlu1 %8786, %v9403_v42   ;;  %3375 = vperm.xlu0 %8785, %v9325_v21  }
  0x96   : > { %v521_v21 = vpop.permute.xlu1 %520  ;;  %v511_v22 = vpop.permute.xlu0 %510 }
  0x97   : > { %3380 = vperm.xlu1 %8786, %v9347_v26   ;;  %6424 = vperm.xlu0 %8785, %v9500_v2  }
  0x9a   : > { %v526_v23 = vpop.permute.xlu1 %525  ;;  %v516_v24 = vpop.permute.xlu0 %515 }
  0x9b   : > { %6429 = vperm.xlu1 %8786, %v9495_v63   ;;  %4907 = vperm.xlu0 %8785, %v9423_v45   ;;  %v1323_v63 = vld [vmem:[#allocation2 + $0x4] sm:$0x8] }
  0x9c   : > { %v9657_v11 = vcombine.low %v1323_v63, %v9651_v58 }
  0x9e   : > { %v9609_v26 = vpop.permute.xlu1 %535  ;;  %v9611_v27 = vpop.permute.xlu0 %530 }
  0x9f   : > { %4912 = vperm.xlu1 %8786, %v9418_v44   ;;  %3385 = vperm.xlu0 %8785, %v9342_v25  }
  0xa2   : > { %v9613_v28 = vpop.permute.xlu1 %545  ;;  %v9615_v29 = vpop.permute.xlu0 %540 }
  0xa3   : > { %6439 = vperm.xlu1 %8786, %v9507_v3   ;;  %6434 = vperm.xlu0 %8785, %v9512_v4  }
  0xa6   : > { %v9617_v30 = vpop.permute.xlu1 %555  ;;  %v9619_v31 = vpop.permute.xlu0 %550 }
  0xaa   : > { %v9621_v25 = vpop.permute.xlu1 %565  ;;  %v9623_v32 = vpop.permute.xlu0 %560 }
  0xae   : > { %v843_v33 = vpop.permute.xlu1 %842  ;;  %v838_v34 = vpop.permute.xlu0 %837 }
  0xb2   : > { %v853_v35 = vpop.permute.xlu1 %852  ;;  %v848_v36 = vpop.permute.xlu0 %847 }
  0xb6   : > { %v9625_v37 = vpop.permute.xlu1 %882  ;;  %v9627_v38 = vpop.permute.xlu0 %877 }
  0xba   : > { %v9629_v39 = vpop.permute.xlu1 %892  ;;  %v9631_v40 = vpop.permute.xlu0 %887 }
  0xbe   : > { %v9633_v41 = vpop.permute.xlu1 %1169  ;;  %v9635_v42 = vpop.permute.xlu0 %1164 }
  0xc2   : > { %v9642_v44 = vpop.permute.xlu1 %1179  ;;  %v9644_v45 = vpop.permute.xlu0 %1174 }
  0xc6   : > { %v863_v0 = vpop.permute.xlu1 %862  ;;  %v858_v12 = vpop.permute.xlu0 %857 }
  0xf7   : > { %v7629_v46 = vpop.f32.mrb[0].mxu0  ;;  %v7647_v48 = vpop.f32.mrb[0].mxu1 }
  0xf8   : > { %v446_v47 = vadd.f32 %v7629_v46, %v9640_v43  ;;  %v437_v49 = vpop.f32.mrb[1].mxu0  ;;  %v773_v50 = vadd.f32 %v7647_v48, %v9640_v43  ;;  %v764_v52 = vpop.f32.mrb[1].mxu1 }
  0xf9   : > { %v438_v51 = vadd.f32 %v9640_v43, %v437_v49  ;;  %v7630_v53 = vpop.f32.mrb[2].mxu0  ;;  %v765_v55 = vadd.f32 %v9640_v43, %v764_v52  ;;  %v7648_v57 = vpop.f32.mrb[2].mxu1 }
  0xfa   : > { %v486_v54 = vmax.f32 %v446_v47, 0.0  ;;  %v449_v56 = vadd.f32 %v7630_v53, %v9640_v43  ;;  %v813_v59 = vmax.f32 %v773_v50, 0.0  ;;  %v776_v61 = vadd.f32 %v7648_v57, %v9640_v43  ;;  %v440_v62 = vpop.f32.mrb[3].mxu0  ;;  %v767_v7 = vpop.f32.mrb[3].mxu1 }
  0xfb   : > { %v484_v60 = vmax.f32 %v438_v51, 0.0  ;;  %v811_v2 = vmax.f32 %v765_v55, 0.0  ;;  %v441_v4 = vadd.f32 %v9640_v43, %v440_v62  ;;  %v768_v6 = vadd.f32 %v9640_v43, %v767_v7 }
  0xfc   : > { %v487_v3 = vmax.f32 %v449_v56, 0.0  ;;  %v814_v1 = vmax.f32 %v776_v61, 0.0  ;;  %v570_v8 = vmul.f32 %v521_v21, %v486_v54  ;;  %v897_v13 = vmul.f32 %v848_v36, %v813_v59 }
  0xfd   : > { %v485_v10 = vmax.f32 %v441_v4, 0.0  ;;  %v568_v9 = vmul.f32 %v511_v22, %v484_v60  ;;  %v812_v16 = vmax.f32 %v768_v6, 0.0  ;;  %v895_v18 = vmul.f32 %v838_v34, %v811_v2  ;;  %v868_v4 = vpop.permute.xlu0 %867 }
  0xfe   : > { %v571_v5 = vmul.f32 %v526_v23, %v487_v3  ;;  %v898_v14 = vmul.f32 %v853_v35, %v814_v1  ;;  %v873_v3 = vpop.permute.xlu1 %872 }
  0xff   : > { %v7633_v17 = vpop.f32.mrb[4].mxu0  ;;  %v569_v46 = vmul.f32 %v516_v24, %v485_v10  ;;  %v7651_v48 = vpop.f32.mrb[4].mxu1  ;;  %v896_v21 = vmul.f32 %v843_v33, %v812_v16 }
 0x100   : > { %v7107_v15 = vpack.c.bf16 %v571_v5, %v570_v8  ;;  %v462_v47 = vadd.f32 %v7633_v17, %v9640_v43  ;;  %v453_v49 = vpop.f32.mrb[5].mxu0  ;;  %v7137_v50 = vpack.c.bf16 %v898_v14, %v897_v13  ;;  %v789_v23 = vadd.f32 %v7651_v48, %v9640_v43  ;;  %v780_v52 = vpop.f32.mrb[5].mxu1 }
 0x101   : > { %v454_v51 = vadd.f32 %v9640_v43, %v453_v49  ;;  %v7634_v53 = vpop.f32.mrb[6].mxu0  ;;  %v7102_v22 = vpack.c.bf16 %v569_v46, %v568_v9  ;;  %v781_v36 = vadd.f32 %v9640_v43, %v780_v52  ;;  %v7652_v24 = vpop.f32.mrb[6].mxu1  ;;  %v7132_v54 = vpack.c.bf16 %v896_v21, %v895_v18 }
 0x102   : > { %7190 = vst [vmem:[#allocation2 + $0x18] sm:$0xff] %v7107_v15   ;;  %v490_v35 = vmax.f32 %v462_v47, 0.0  ;;  %v465_v34 = vadd.f32 %v7634_v53, %v9640_v43  ;;  %7196 = vst [vmem:[#allocation2 + $0x48] sm:$0xff] %v7137_v50   ;;  %v817_v55 = vmax.f32 %v789_v23, 0.0  ;;  %v792_v33 = vadd.f32 %v7652_v24, %v9640_v43  ;;  %v456_v57 = vpop.f32.mrb[7].mxu0  ;;  %v783_v62 = vpop.f32.mrb[7].mxu1 }
 0x103   : > { %v488_v56 = vmax.f32 %v454_v51, 0.0  ;;  %7189 = vst [vmem:[#allocation2 + $0x10] sm:$0xff] %v7102_v22   ;;  %v815_v59 = vmax.f32 %v781_v36, 0.0  ;;  %v457_v61 = vadd.f32 %v9640_v43, %v456_v57  ;;  %7195 = vst [vmem:[#allocation2 + $0x40] sm:$0xff] %v7132_v54   ;;  %v784_v2 = vadd.f32 %v9640_v43, %v783_v62 }
 0x104   : > { %v491_v60 = vmax.f32 %v465_v34, 0.0  ;;  %v818_v63 = vmax.f32 %v792_v33, 0.0  ;;  %v574_v7 = vmul.f32 %v9615_v29, %v490_v35  ;;  %v1375_v8 = vrot.slane %v9657_v11, 3  ;;  %v1294_v33 = vld [vmem:[#allocation2 + $0x4] sm:$0xc] }
 0x105   : > { %v489_v6 = vmax.f32 %v457_v61, 0.0  ;;  %v901_v5 = vmul.f32 %v868_v4, %v817_v55  ;;  %v572_v10 = vmul.f32 %v9611_v27, %v488_v56  ;;  %v816_v9 = vmax.f32 %v784_v2, 0.0 }
 0x106   : > { %v575_v1 = vmul.f32 %v9613_v28, %v491_v60  ;;  %v902_v13 = vmul.f32 %v873_v3, %v818_v63  ;;  %v899_v16 = vmul.f32 %v858_v12, %v815_v59 }
 0x107   : > { %v7637_v14 = vpop.f32.mrb[8].mxu0  ;;  %v573_v18 = vmul.f32 %v9609_v26, %v489_v6  ;;  %v7655_v46 = vpop.f32.mrb[8].mxu1  ;;  %v900_v48 = vmul.f32 %v863_v0, %v816_v9 }
 0x108   : > { %v7117_v17 = vpack.c.bf16 %v575_v1, %v574_v7  ;;  %v478_v15 = vadd.f32 %v7637_v14, %v9640_v43  ;;  %v469_v47 = vpop.f32.mrb[9].mxu0  ;;  %v7147_v29 = vpack.c.bf16 %v902_v13, %v901_v5  ;;  %v805_v28 = vadd.f32 %v7655_v46, %v9640_v43  ;;  %v796_v50 = vpop.f32.mrb[9].mxu1 }
 0x109   : > { %v470_v49 = vadd.f32 %v9640_v43, %v469_v47  ;;  %v7638_v21 = vpop.f32.mrb[10].mxu0  ;;  %v7112_v27 = vpack.c.bf16 %v573_v18, %v572_v10  ;;  %v797_v12 = vadd.f32 %v9640_v43, %v796_v50  ;;  %v7656_v26 = vpop.f32.mrb[10].mxu1  ;;  %v7142_v52 = vpack.c.bf16 %v900_v48, %v899_v16  ;;  %v1933_v36 = vld [vmem:[#allocation2 + $0x18] sm:$0xf]  ;;  %v1934_v61 = vld [vmem:[#allocation2 + $0x1c] sm:$0xf] }
 0x10a   : > { %7192 = vst [vmem:[#allocation2 + $0x28] sm:$0xff] %v7117_v17   ;;  %v494_v23 = vmax.f32 %v478_v15, 0.0  ;;  %v481_v51 = vadd.f32 %v7638_v21, %v9640_v43  ;;  %7198 = vst [vmem:[#allocation2 + $0x58] sm:$0xff] %v7147_v29   ;;  %v821_v53 = vmax.f32 %v805_v28, 0.0  ;;  %v808_v0 = vadd.f32 %v7656_v26, %v9640_v43  ;;  %v472_v35 = vpop.f32.mrb[11].mxu0  ;;  %v799_v54 = vpop.f32.mrb[11].mxu1 }
 0x10b   : > { %v492_v22 = vmax.f32 %v470_v49, 0.0  ;;  %7191 = vst [vmem:[#allocation2 + $0x20] sm:$0xff] %v7112_v27   ;;  %v473_v24 = vadd.f32 %v9640_v43, %v472_v35  ;;  %v9679_v55 = vld [vmem:[#allocation2 + $0x10] sm:$0xf]  ;;  %v1932_v56 = vld [vmem:[#allocation2 + $0x14] sm:$0xf]  ;;  %v800_v60 = vadd.f32 %v9640_v43, %v799_v54  ;;  %v9698_v18 = vcombine.low %v1294_v33, %v9651_v58  ;;  %v9712_v27 = vpop.permute.xlu0 %1184 }
 0x10c   : > { %v495_v34 = vmax.f32 %v481_v51, 0.0  ;;  %7197 = vst [vmem:[#allocation2 + $0x50] sm:$0xff] %v7142_v52   ;;  %v819_v57 = vmax.f32 %v797_v12, 0.0  ;;  %v822_v59 = vmax.f32 %v808_v0, 0.0  ;;  %v9682_v62 = vld [vmem:[#allocation2 + $0xc] sm:$0xff]   ;;  %v578_v63 = vmul.f32 %v9623_v32, %v494_v23  ;;  %v9687_v7 = vld [vmem:[#allocation2 + $0x14] sm:$0xff]  }
 0x10d   : > { %v905_v2 = vmul.f32 %v9631_v40, %v821_v53  ;;  %v493_v4 = vmax.f32 %v473_v24, 0.0  ;;  %v820_v6 = vmax.f32 %v800_v60, 0.0  ;;  %v9690_v5 = vcombine.low %v1932_v56, %v1933_v36  ;;  %v8840_v35 = vld [vmem:[%s11652_s3 + $0x8] sm:$0xff]  }
 0x10e   : > { %v579_v3 = vmul.f32 %v9621_v25, %v495_v34  ;;  %v906_v1 = vmul.f32 %v9629_v39, %v822_v59  ;;  %v6849_v10 = vcombine.low %v9679_v55, %v1932_v56  ;;  %v576_v9 = vmul.f32 %v9619_v31, %v492_v22 }
 0x10f   : > { %v7665_v13 = vpop.f32.mrb[12].mxu0  ;;  %v577_v32 = vmul.f32 %v9617_v30, %v493_v4  ;;  %v903_v25 = vmul.f32 %v9627_v38, %v819_v57  ;;  %v904_v17 = vmul.f32 %v9625_v37, %v820_v6  ;;  %v6850_v46 = vcombine.low %v1933_v36, %v1934_v61  ;;  %v8839_v30 = vld [vmem:[%s11652_s3 + $0x148] sm:$0xff]   ;;  %v9707_v37 = vpop.permute.xlu1 %1189 }
 0x110   : > { %v7127_v14 = vpack.c.bf16 %v579_v3, %v578_v63  ;;  %v1091_v16 = vpop.f32.mrb[13].mxu0  ;;  %v7157_v40 = vpack.c.bf16 %v906_v1, %v905_v2  ;;  %7803 = vmatprep.mubr.bf16.mxu1 %v6849_v10  ;;  %v1100_v31 = vadd.f32 %v7665_v13, %v9640_v43  ;;  %v1376_v58 = vrot.slane %v9682_v62, 3  ;;  %v8847_v3 = vld [vmem:[%s11652_s3 + $0x10] sm:$0xff]   ;;  %v1195_v1 = vpop.permute.xlu0 %1194  ;;  %v8849_v13 = vld [vmem:[%s11652_s3 + $0x158] sm:$0xff]  }
 0x111   : > { %v7666_v39 = vpop.f32.mrb[14].mxu0  ;;  %v7122_v15 = vpack.c.bf16 %v577_v32, %v576_v9  ;;  %v1092_v47 = vadd.f32 %v9640_v43, %v1091_v16  ;;  %v9705_v29 = vld [vmem:[#allocation2 + $0x28] sm:$0xf]  ;;  %v7152_v48 = vpack.c.bf16 %v904_v17, %v903_v25  ;;  %v1378_v49 = vrot.slane %v9687_v7, 3  ;;  %7804 = vmatmul.mubr.bf16.vlgmr.msra.gmra.mrb[12].mxu1 %v6850_v46  ;;  %v1938_v34 = vld [vmem:[#allocation2 + $0x2c] sm:$0xf] }
 0x112   : > { %7194 = vst [vmem:[#allocation2 + $0x38] sm:$0xff] %v7127_v14   ;;  %v1094_v38 = vpop.f32.mrb[15].mxu0  ;;  %7200 = vst [vmem:[#allocation2 + $0x68] sm:$0xff] %v7157_v40   ;;  %v1103_v28 = vadd.f32 %v7666_v39, %v9640_v43  ;;  %v1935_v50 = vld [vmem:[#allocation2 + $0x20] sm:$0xf]  ;;  %v1140_v23 = vmax.f32 %v1100_v31, 0.0  ;;  %7816 = vmatpush3.bf16.msra.mxu1 %v9592_v19  ;;  %v1377_v53 = vsel %vm1374_vm2, %v1375_v8, %v1376_v58 }
 0x113   : > { %v1936_v21 = vld [vmem:[#allocation2 + $0x24] sm:$0xf]  ;;  %7193 = vst [vmem:[#allocation2 + $0x30] sm:$0xff] %v7122_v15   ;;  %v1138_v12 = vmax.f32 %v1092_v47, 0.0  ;;  %v1095_v51 = vadd.f32 %v9640_v43, %v1094_v38  ;;  %v9715_v26 = vcombine.low %v1934_v61, %v1935_v50  ;;  %v9717_v52 = vld [vmem:[#allocation2 + $0x1c] sm:$0xff]   ;;  %7199 = vst [vmem:[#allocation2 + $0x60] sm:$0xff] %v7152_v48   ;;  %v1379_v0 = vsel %vm1374_vm2, %v1376_v58, %v1378_v49 }
 0x114   : > { %v1141_v22 = vmax.f32 %v1103_v28, 0.0  ;;  %v6851_v36 = vcombine.low %v1935_v50, %v1936_v21  ;;  %7691 = vmatprep.mubr.bf16.mxu0 %v1377_v53  ;;  %7817 = vmatprep.subr.bf16.mxu1 %v8839_v30  ;;  %v8843_v19 = vld [vmem:[%s11652_s3 + $0x150] sm:$0xff]   ;;  %v1224_v54 = vmul.f32 %v9644_v45, %v1140_v23  ;;  %v9733_v56 = vcombine.low %v1936_v21, %v9705_v29  ;;  %v9735_v57 = vld [vmem:[#allocation2 + $0x24] sm:$0xff]   ;;  %v8850_v17 = vld [vmem:[%s11652_s3 + $0x18] sm:$0xff]  }
 0x115   : > { %v1139_v24 = vmax.f32 %v1095_v51, 0.0  ;;  %7692 = vmatmul.mubr.bf16.vlgmr.msra.gmra.mrb[24].mxu0 %v1379_v0  ;;  %v1222_v59 = vmul.f32 %v9635_v42, %v1138_v12  ;;  %v1380_v45 = vrot.slane %v9717_v52, 3  ;;  %v1528_v42 = vshrl.u32 %v9698_v18, 16  ;;  %v8853_v58 = vld [vmem:[%s11652_s3 + $0x160] sm:$0xff]   ;;  %v9772_v50 = vld [vmem:[#allocation2 + $0x18] sm:$0xff]  }
 0x116   : > { %v1225_v8 = vmul.f32 %v9642_v44, %v1141_v22  ;;  %7807 = vmatprep.mubr.bf16.mxu1 %v6851_v36  ;;  %7704 = vmatpush3.bf16.msra.mxu0 %v9598_v20  ;;  %v1200_v44 = vpop.permute.xlu1 %1199  ;;  %v1382_v25 = vrot.slane %v9735_v57, 3  ;;  %v1205_v36 = vpop.permute.xlu0 %1204 }
 0x117   : > { %v7669_v33 = vpop.f32.mrb[16].mxu0  ;;  %v1223_v60 = vmul.f32 %v9633_v41, %v1139_v24  ;;  %7818 = vmatpush3.bf16.msra.mxu1 %v8839_v30  ;;  %7705 = vmatprep.subr.bf16.mxu0 %v8840_v35  ;;  %v6852_v41 = vcombine.low %v9705_v29, %v1938_v34  ;;  %v1381_v10 = vsel %vm1374_vm2, %v1378_v49, %v1380_v45  ;;  %v1531_v30 = vshll.u32 %v9698_v18, 16  ;;  %v8857_v49 = vld [vmem:[#allocation2 + $0x10] sm:$0xff]  }
 0x118   : > { %v1116_v61 = vadd.f32 %v7669_v33, %v9640_v43  ;;  %v1107_v63 = vpop.f32.mrb[17].mxu0  ;;  %v7167_v2 = vpack.c.bf16 %v1225_v8, %v1224_v54  ;;  %7819 = vmatprep.subr.bf16.mxu1 %v8843_v19  ;;  %7695 = vmatprep.mubr.bf16.mxu0 %v1381_v10  ;;  %v1383_v29 = vsel %vm1374_vm2, %v1380_v45, %v1382_v25 }
 0x119   : > { %v7670_v4 = vpop.f32.mrb[18].mxu0  ;;  %v7162_v20 = vpack.c.bf16 %v1223_v60, %v1222_v59  ;;  %v1108_v6 = vadd.f32 %v9640_v43, %v1107_v63  ;;  %v9752_v14 = vld [vmem:[#allocation2 + $0x38] sm:$0xf]  ;;  %7808 = vmatmul.mubr.bf16.gmra.mrb[16].mxu1 %v6852_v41  ;;  %v9774_v18 = vld [vmem:[#allocation2 + $0x3c] sm:$0xf]  ;;  %v9787_v54 = vrot.slane %v1531_v30, 3 }
 0x11a   : > { %v1110_v9 = vpop.f32.mrb[19].mxu0  ;;  %7202 = vst [vmem:[#allocation2 + $0x78] sm:$0xff] %v7167_v2   ;;  %v1144_v32 = vmax.f32 %v1116_v61, 0.0  ;;  %v1119_v16 = vadd.f32 %v7670_v4, %v9640_v43  ;;  %v1939_v39 = vld [vmem:[#allocation2 + $0x30] sm:$0xf]  ;;  %7706 = vmatpush3.bf16.msra.mxu0 %v8840_v35  ;;  %v9778_v23 = vpop.permute.xlu1 %1209  ;;  %v2444_v59 = vshll.u32 %v9772_v50, 16  ;;  %v6854_v60 = vcombine.low %v9752_v14, %v9774_v18 }
 0x11b   : > { %v1111_v40 = vadd.f32 %v9640_v43, %v1110_v9  ;;  %v1940_v15 = vld [vmem:[#allocation2 + $0x34] sm:$0xf]  ;;  %7201 = vst [vmem:[#allocation2 + $0x70] sm:$0xff] %v7162_v20   ;;  %v1142_v46 = vmax.f32 %v1108_v6, 0.0  ;;  %v9760_v31 = vcombine.low %v1938_v34, %v1939_v39  ;;  %7820 = vmatpush3.bf16.msra.mxu1 %v8843_v19  ;;  %7707 = vmatprep.subr.bf16.mxu0 %v8847_v3  ;;  %v9776_v21 = vld [vmem:[#allocation2 + $0x2c] sm:$0xff]   ;;  %v9785_v19 = vrot.slane %v1528_v42, 2 }
 0x11c   : > { %v6853_v47 = vcombine.low %v1939_v39, %v1940_v15  ;;  %v1145_v38 = vmax.f32 %v1119_v16, 0.0  ;;  %v9770_v28 = vcombine.low %v1940_v15, %v9752_v14  ;;  %7821 = vmatprep.subr.bf16.mxu1 %v8849_v13  ;;  %v1228_v12 = vmul.f32 %v1195_v1, %v1144_v32  ;;  %v9782_v35 = vld [vmem:[#allocation2 + $0x34] ss:$0 sps:$4 sm:$0x77]   ;;  %v8862_v2 = vld [vmem:[%s11652_s3 + $0x168] sm:$0xff]   ;;  %v8869_v9 = vld [vmem:[#allocation2 + $0x20] sm:$0xff]   ;;  %v1215_v15 = vpop.permute.xlu0 %1214 }
 0x11d   : > { %v1143_v48 = vmax.f32 %v1111_v40, 0.0  ;;  %v1226_v51 = vmul.f32 %v9712_v27, %v1142_v46  ;;  %7696 = vmatmul.mubr.bf16.gmra.mrb[28].mxu0 %v1383_v29  ;;  %v2439_v27 = vshll.u32 %v8857_v49, 16  ;;  %v2437_v61 = vshrl.u32 %v8857_v49, 16  ;;  %v8864_v41 = vld [vmem:[%s11652_s3 + $0x28] sm:$0xff]  }
 0x11e   : > { %7811 = vmatprep.mubr.bf16.mxu1 %v6853_v47  ;;  %v1229_v53 = vmul.f32 %v1200_v44, %v1145_v38  ;;  %7708 = vmatpush3.bf16.msra.mxu0 %v8847_v3  ;;  %v1384_v45 = vrot.slane %v9776_v21, 3  ;;  %v8860_v44 = vld [vmem:[%s11652_s3 + $0x20] sm:$0xff]   ;;  %v1386_v20 = vrot.slane %v9782_v35, 3  ;;  %v9809_v32 = vrot.slane %v2444_v59, 1  ;;  %v1220_v39 = vpop.permute.xlu1 %1219  ;;  %v8865_v47 = vld [vmem:[%s11652_s3 + $0x170] sm:$0xff]  }
 0x11f   : > { %v1227_v22 = vmul.f32 %v9707_v37, %v1143_v48  ;;  %v7673_v0 = vpop.f32.mrb[20].mxu0  ;;  %7822 = vmatpush3.bf16.msra.mxu1 %v8849_v13  ;;  %7709 = vmatprep.subr.bf16.mxu0 %v8850_v17  ;;  %v2441_v42 = vrot.slane %v2439_v27, 1  ;;  %v1534_v46 = vor.u32 %v9787_v54, %v9785_v19  ;;  %v1548_v19 = vshll.u32 %v9687_v7, 16  ;;  %v8875_v59 = vld [vmem:[#allocation2 + $0x30] sm:$0xff]  }
 0x120   : > { %v1132_v34 = vadd.f32 %v7673_v0, %v9640_v43  ;;  %v1123_v24 = vpop.f32.mrb[21].mxu0  ;;  %v7177_v8 = vpack.c.bf16 %v1229_v53, %v1228_v12  ;;  %7823 = vmatprep.subr.bf16.mxu1 %v8853_v58  ;;  %v1385_v10 = vsel %vm1374_vm2, %v1382_v25, %v1384_v45  ;;  %v1387_v40 = vsel %vm1374_vm2, %v1384_v45, %v1386_v20  ;;  %v8873_v20 = vld [vmem:[%s11652_s3 + $0x188] sm:$0xff]  }
 0x121   : > { %v7172_v33 = vpack.c.bf16 %v1227_v22, %v1226_v51  ;;  %v7674_v37 = vpop.f32.mrb[22].mxu0  ;;  %v1124_v63 = vadd.f32 %v9640_v43, %v1123_v24  ;;  %7812 = vmatmul.mubr.bf16.gmra.mrb[20].mxu1 %v6854_v60  ;;  %v2442_v14 = vor.u32 %v2441_v42, %v2437_v61  ;;  %7699 = vmatprep.mubr.bf16.mxu0 %v1385_v10  ;;  %v1536_v25 = vshrl.u32 %v9682_v62, 16  ;;  %v8866_v22 = vld [vmem:[%s11652_s3 + $0x30] sm:$0xff]   ;;  %v8870_v60 = vld [vmem:[%s11652_s3 + $0x180] sm:$0xff]   ;;  %v9862_v10 = vld [vmem:[#allocation2 + $0x1c] sm:$0xf] }
 0x122   : > { %v1126_v3 = vpop.f32.mrb[23].mxu0  ;;  %7204 = vst [vmem:[#allocation2 + $0x88] sm:$0xff] %v7177_v8   ;;  %v1148_v4 = vmax.f32 %v1132_v34, 0.0  ;;  %v1135_v1 = vadd.f32 %v7674_v37, %v9640_v43  ;;  %7710 = vmatpush3.bf16.msra.mxu0 %v8850_v17  ;;  %v2452_v51 = vshll.u32 %v8869_v9, 16  ;;  %v9832_v34 = vld [vmem:[#allocation2 + $0x28] sm:$0xff]   ;;  %v1545_v24 = vshrl.u32 %v9687_v7, 16 }
 0x123   : > { %7203 = vst [vmem:[#allocation2 + $0x80] sm:$0xff] %v7172_v33   ;;  %v1146_v6 = vmax.f32 %v1124_v63, 0.0  ;;  %v1127_v13 = vadd.f32 %v9640_v43, %v1126_v3  ;;  %7824 = vmatpush3.bf16.msra.mxu1 %v8853_v58  ;;  %7711 = vmatprep.subr.bf16.mxu0 %v8860_v44  ;;  %v1539_v43 = vshll.u32 %v9682_v62, 16  ;;  %v2447_v38 = vsel %vm2435_vm3, %v2442_v14, %v9809_v32  ;;  %v8868_v37 = vld [vmem:[%s11652_s3 + $0x38] sm:$0xff]  }
 0x124   : > { %v1149_v16 = vmax.f32 %v1135_v1, 0.0  ;;  %7825 = vmatprep.subr.bf16.mxu1 %v8862_v2  ;;  %v1232_v30 = vmul.f32 %v1215_v15, %v1148_v4  ;;  %7831 = vmatprep.mubr.bf16.mxu1 %v2447_v38  ;;  %v1538_v49 = vrot.slane %v1536_v25, 2  ;;  %v1554_v54 = vshrl.u32 %v9717_v52, 16  ;;  %v8872_v1 = vld [vmem:[%s11652_s3 + $0x80] sm:$0xff]   ;;  %v9864_v14 = vld [vmem:[#allocation2 + $0x38] sm:$0xff]  }
 0x125   : > { %v1147_v17 = vmax.f32 %v1127_v13, 0.0  ;;  %v1230_v29 = vmul.f32 %v1205_v36, %v1146_v6  ;;  %7700 = vmatmul.mubr.bf16.gmra.mrb[32].mxu0 %v1387_v40  ;;  %v1541_v12 = vrot.slane %v1539_v43, 3  ;;  %v2454_v33 = vrot.slane %v2452_v51, 1  ;;  %v2635_v6 = vld [vmem:[#allocation2 + $0x18] sm:$0xf] }
 0x126   : > { %v1233_v48 = vmul.f32 %v1220_v39, %v1149_v16  ;;  %7712 = vmatpush3.bf16.msra.mxu0 %v8860_v44  ;;  %v1557_v27 = vshll.u32 %v9717_v52, 16  ;;  %v2456_v61 = vshrl.u32 %v8869_v9, 16  ;;  %v2460_v63 = vshll.u32 %v9832_v34, 16  ;;  %v10042_v52 = vld [vmem:[#allocation2 + $0x40] sm:$0xff]  }
 0x127   : > { %v1231_v58 = vmul.f32 %v9778_v23, %v1147_v17  ;;  %7826 = vmatpush3.bf16.msra.mxu1 %v8862_v2  ;;  %7713 = vmatprep.subr.bf16.mxu0 %v8864_v41  ;;  %v1542_v36 = vor.u32 %v1541_v12, %v1538_v49  ;;  %v8867_v23 = vld [vmem:[%s11652_s3 + $0x178] sm:$0xff]   ;;  %v1547_v45 = vrot.slane %v1545_v24, 2  ;;  %v1550_v44 = vrot.slane %v1548_v19, 3  ;;  %v8876_v12 = vld [vmem:[%s11652_s3 + $0x190] sm:$0xff]  }
 0x128   : > { %v7187_v53 = vpack.c.bf16 %v1233_v48, %v1232_v30  ;;  %7827 = vmatprep.subr.bf16.mxu1 %v8865_v47  ;;  %v2448_v2 = vshrl.u32 %v9772_v50, 16  ;;  %v1556_v3 = vrot.slane %v1554_v54, 2  ;;  %v1559_v4 = vrot.slane %v1557_v27, 3  ;;  %v8874_v30 = vld [vmem:[%s11652_s3 + $0x88] sm:$0xff]  }
 0x129   : > { %v7182_v0 = vpack.c.bf16 %v1231_v58, %v1230_v29  ;;  %v1543_v8 = vsel %vm1526_vm4, %v1534_v46, %v1542_v36  ;;  %v2458_v42 = vor.u32 %v2456_v61, %v2454_v33  ;;  %v2462_v13 = vrot.slane %v2460_v63, 1  ;;  %v8881_v61 = vld [vmem:[#allocation2 + $0x40] ss:$0 sps:$4 sm:$0x11]  }
 0x12a   : > { %7206 = vst [vmem:[#allocation2 + $0x98] sm:$0xff] %v7187_v53   ;;  %7714 = vmatpush3.bf16.msra.mxu0 %v8864_v41  ;;  %7719 = vmatprep.mubr.bf16.mxu0 %v1543_v8  ;;  %v2468_v41 = vshll.u32 %v8875_v59, 16  ;;  %v2450_v50 = vor.u32 %v2448_v2, %v9809_v32  ;;  %v1551_v9 = vor.u32 %v1550_v44, %v1547_v45  ;;  %v1563_v16 = vshrl.u32 %v9735_v57, 16  ;;  %v8879_v44 = vld [vmem:[%s11652_s3 + $0x198] sm:$0xff]  }
 0x12b   : > { %7205 = vst [vmem:[#allocation2 + $0x90] sm:$0xff] %v7182_v0   ;;  %7828 = vmatpush3.bf16.msra.mxu1 %v8865_v47  ;;  %7715 = vmatprep.subr.bf16.mxu0 %v8866_v22  ;;  %v1566_v40 = vshll.u32 %v9735_v57, 16  ;;  %v1560_v15 = vor.u32 %v1559_v4, %v1556_v3  ;;  %v1572_v17 = vshrl.u32 %v9776_v21, 16  ;;  %v1575_v32 = vshll.u32 %v9776_v21, 16  ;;  %v1930_v0 = vld [vmem:[#allocation2 + $0xc] sm:$0x8] }
 0x12c   : > { %7829 = vmatprep.subr.bf16.mxu1 %v8867_v23  ;;  %v2455_v39 = vsel %vm2435_vm3, %v2450_v50, %v2454_v33  ;;  %v2463_v46 = vsel %vm2435_vm3, %v2458_v42, %v2462_v13  ;;  %v2470_v47 = vrot.slane %v2468_v41, 1  ;;  %v2472_v38 = vshrl.u32 %v8875_v59, 16  ;;  %v8878_v59 = vld [vmem:[%s11652_s3 + $0x90] sm:$0xff]  }
 0x12d   : > { %v9876_v29 = vcombine.low %v2635_v6, %v9862_v10  ;;  %v1747_v48 = vshrl.u32 %v9657_v11, 16  ;;  %v1750_v58 = vshll.u32 %v9657_v11, 16  ;;  %v1552_v49 = vsel %vm1526_vm4, %v1542_v36, %v1551_v9  ;;  %v10094_v57 = vld [vmem:[%s11652_s3 + $0xd0] sm:$0xff]  }
 0x12e   : > { %7716 = vmatpush3.bf16.msra.mxu0 %v8866_v22  ;;  %v2476_v51 = vshll.u32 %v9864_v14, 16  ;;  %v1565_v53 = vrot.slane %v1563_v16, 2  ;;  %v1568_v22 = vrot.slane %v1566_v40, 3  ;;  %v1561_v11 = vsel %vm1526_vm4, %v1551_v9, %v1560_v15 }
 0x12f   : > { %7830 = vmatpush3.bf16.msra.mxu1 %v8867_v23  ;;  %7717 = vmatprep.subr.bf16.mxu0 %v8868_v37  ;;  %v2464_v36 = vshrl.u32 %v9832_v34, 16  ;;  %v1574_v23 = vrot.slane %v1572_v17, 2  ;;  %v1577_v8 = vrot.slane %v1575_v32, 3  ;;  %v2474_v33 = vor.u32 %v2472_v38, %v2470_v47 }
 0x130   : > { %7843 = vmatprep.subr.bf16.mxu1 %v8870_v60  ;;  %v2701_v34 = vshll.u32 %v9876_v29, 16  ;;  %v2478_v63 = vrot.slane %v2476_v51, 1  ;;  %v1569_v45 = vor.u32 %v1568_v22, %v1565_v53  ;;  %v1581_v2 = vshrl.u32 %v9782_v35, 16 }
 0x131   : > { %v1584_v3 = vshll.u32 %v9782_v35, 16  ;;  %v9907_v42 = vor.u32 %v1577_v8, %v1574_v23  ;;  %v6818_v41 = vcombine.low %v1930_v0, %v9679_v55  ;;  %v2011_v6 = vshrl.u32 %v9715_v26, 16  ;;  %v8880_v35 = vld [vmem:[%s11652_s3 + $0x98] sm:$0xff]  }
 0x132   : > { %7718 = vmatpush3.bf16.msra.mxu0 %v8868_v37  ;;  %7832 = vmatmul.mubr.bf16.vlgmr.msra.gmra.mrb[12].mxu1 %v2455_v39  ;;  %v9898_v37 = vld [vmem:[#allocation2 + $0x20] sm:$0xff]   ;;  %v2479_v50 = vsel %vm2435_vm3, %v2474_v33, %v2478_v63  ;;  %v2014_v39 = vshll.u32 %v9715_v26, 16  ;;  %v2480_v55 = vshrl.u32 %v9864_v14, 16  ;;  %v1583_v38 = vrot.slane %v1581_v2, 2 }
 0x133   : > { %7835 = vmatprep.mubr.bf16.mxu1 %v2463_v46  ;;  %7844 = vmatpush3.bf16.msra.mxu1 %v8870_v60  ;;  %v2466_v60 = vor.u32 %v2464_v36, %v2462_v13  ;;  %v8882_v13 = vld [vmem:[%s11652_s3 + $0x1a0] sm:$0xff]   ;;  %v2706_v9 = vshll.u32 %v9898_v37, 16  ;;  %v2484_v46 = vshll.u32 %v8881_v61, 16  ;;  %v1754_v26 = vrot.slane %v1536_v25, 3  ;;  %v8886_v36 = vld [vmem:[%s11652_s3 + $0x1a8] sm:$0xff]  }
 0x134   : > { %7731 = vmatprep.subr.bf16.mxu0 %v8872_v1  ;;  %7845 = vmatprep.subr.bf16.mxu1 %v8873_v20  ;;  %v1994_v14 = vshrl.u32 %v6818_v41, 16  ;;  %v1997_v51 = vshll.u32 %v6818_v41, 16  ;;  %v2002_v22 = vshrl.u32 %v9690_v5, 16  ;;  %v2005_v25 = vshll.u32 %v9690_v5, 16 }
 0x135   : > { %7720 = vmatmul.mubr.bf16.vlgmr.msra.gmra.mrb[24].mxu0 %v1552_v49  ;;  %v2471_v4 = vsel %vm2435_vm3, %v2466_v60, %v2470_v47  ;;  %v2703_v47 = vrot.slane %v2701_v34, 1  ;;  %v2482_v49 = vor.u32 %v2480_v55, %v2478_v63  ;;  %v9935_v53 = vrot.slane %v2706_v9, 1  ;;  %v9963_v63 = vld [vmem:[%s11652_s3 + $0xa8] sm:$0xff]  }
 0x136   : > { %7723 = vmatprep.mubr.bf16.mxu0 %v1561_v11  ;;  %7732 = vmatpush3.bf16.msra.mxu0 %v8872_v1  ;;  %v9909_v1 = vrot.slane %v1747_v48, 3  ;;  %v1586_v48 = vrot.slane %v1584_v3, 3  ;;  %v2486_v0 = vrot.slane %v2484_v46, 1  ;;  %v9942_v11 = vld [vmem:[%s11652_s3 + $0xa0] sm:$0xff]   ;;  %v2013_v23 = vrot.slane %v2011_v6, 3 }
 0x137   : > { %7846 = vmatpush3.bf16.msra.mxu1 %v8873_v20  ;;  %7733 = vmatprep.subr.bf16.mxu0 %v8874_v30  ;;  %v9911_v20 = vrot.slane %v1750_v58, 4  ;;  %v1579_v58 = vsel %vm1526_vm4, %v1569_v45, %v9907_v42  ;;  %v2016_v8 = vrot.slane %v2014_v39, 4  ;;  %v2023_v60 = vshll.u32 %v9733_v56, 16 }
 0x138   : > { %7847 = vmatprep.subr.bf16.mxu1 %v8876_v12  ;;  %v2487_v33 = vsel %vm2435_vm3, %v2482_v49, %v2486_v0  ;;  %v9958_v34 = vcombine.low %v9774_v18, %v9774_v18  ;;  %v2029_v2 = vshrl.u32 %v9760_v31, 16  ;;  %v2032_v3 = vshll.u32 %v9760_v31, 16  ;;  %v8888_v18 = vld [vmem:[%s11652_s3 + $0x1b0] sm:$0xff]  }
 0x139   : > { %v2038_v41 = vshrl.u32 %v9770_v28, 16  ;;  %v2025_v55 = vrot.slane %v2023_v60, 4  ;;  %v1762_v60 = vrot.slane %v1554_v54, 3 }
 0x13a   : > { %7734 = vmatpush3.bf16.msra.mxu0 %v8874_v30  ;;  %7836 = vmatmul.mubr.bf16.gmra.mrb[16].mxu1 %v2471_v4  ;;  %v1570_v30 = vsel %vm1526_vm4, %v1560_v15, %v1569_v45  ;;  %v2699_v15 = vshrl.u32 %v9876_v29, 16  ;;  %v1753_v29 = vor.u32 %v9911_v20, %v9909_v1  ;;  %v1996_v45 = vrot.slane %v1994_v14, 3  ;;  %v9973_v1 = vld [vmem:[#allocation2 + $0x28] sm:$0xff]  }
 0x13b   : > { %7839 = vmatprep.mubr.bf16.mxu1 %v2479_v50  ;;  %7848 = vmatpush3.bf16.msra.mxu1 %v8876_v12  ;;  %v1755_v12 = vrot.slane %v1539_v43, 4  ;;  %v1587_v43 = vor.u32 %v1586_v48, %v1583_v38  ;;  %v2007_v20 = vrot.slane %v2005_v25, 4  ;;  %v2017_v50 = vor.u32 %v2016_v8, %v2013_v23 }
 0x13c   : > { %7735 = vmatprep.subr.bf16.mxu0 %v8878_v59  ;;  %7849 = vmatprep.subr.bf16.mxu1 %v8879_v44  ;;  %v2704_v62 = vor.u32 %v2703_v47, %v2699_v15  ;;  %v2047_v46 = vshrl.u32 %v9958_v34, 16  ;;  %v9987_v47 = vld [vmem:[%s11652_s3 + $0xb0] sm:$0xff]   ;;  %v2050_v49 = vshll.u32 %v9958_v34, 16  ;;  %v2034_v14 = vrot.slane %v2032_v3, 4  ;;  %v10003_v15 = vld [vmem:[#allocation2 + $0x38] sm:$0xff]   ;;  %v8896_v3 = vld [vmem:[%s11652_s3 + $0x1c8] sm:$0xff]  }
 0x13d   : > { %7724 = vmatmul.mubr.bf16.gmra.mrb[28].mxu0 %v1570_v30  ;;  %v9950_v5 = vor.u32 %v1755_v12, %v1754_v26  ;;  %v1588_v4 = vsel %vm1526_vm4, %v9907_v42, %v1587_v43  ;;  %v2041_v42 = vshll.u32 %v9770_v28, 16  ;;  %v8890_v28 = vld [vmem:[%s11652_s3 + $0x1b8] sm:$0xff]   ;;  %v2714_v30 = vshll.u32 %v9973_v1, 16 }
 0x13e   : > { %7727 = vmatprep.mubr.bf16.mxu0 %v1579_v58  ;;  %7736 = vmatpush3.bf16.msra.mxu0 %v8878_v59  ;;  %v2020_v59 = vshrl.u32 %v9733_v56, 16  ;;  %v2709_v61 = vsel %vm2435_vm3, %v2704_v62, %v9935_v53  ;;  %v2004_v56 = vrot.slane %v2002_v22, 3  ;;  %v2710_v26 = vshrl.u32 %v9898_v37, 16  ;;  %v10015_v43 = vld [vmem:[%s11652_s3 + $0xb8] sm:$0xff]  }
 0x13f   : > { %7850 = vmatpush3.bf16.msra.mxu1 %v8879_v44  ;;  %7737 = vmatprep.subr.bf16.mxu0 %v8880_v35  ;;  %v1999_v44 = vrot.slane %v1997_v51, 4  ;;  %v1757_v6 = vsel %vm1745_vm5, %v1753_v29, %v9950_v5  ;;  %v2031_v12 = vrot.slane %v2029_v2, 3  ;;  %v2040_v0 = vrot.slane %v2038_v41, 3  ;;  %v10049_v2 = vld [vmem:[%s11652_s3 + $0xc0] sm:$0xff]  }
 0x140   : > { %7851 = vmatprep.subr.bf16.mxu1 %v8882_v13  ;;  %v2022_v39 = vrot.slane %v2020_v59, 3  ;;  %v2043_v25 = vrot.slane %v2041_v42, 4  ;;  %v2712_v62 = vor.u32 %v2710_v26, %v9935_v53  ;;  %v1758_v29 = vrot.slane %v1545_v24, 3  ;;  %v8893_v53 = vld [vmem:[%s11652_s3 + $0x1c0] sm:$0xff]   ;;  %v8899_v42 = vld [vmem:[%s11652_s3 + $0x1d0] sm:$0xff]  }
 0x141   : > { %v2000_v31 = vor.u32 %v1999_v44, %v1996_v45  ;;  %v2716_v23 = vrot.slane %v2714_v30, 1  ;;  %v1759_v8 = vrot.slane %v1548_v19, 4  ;;  %v2049_v59 = vrot.slane %v2047_v46, 3 }
 0x142   : > { %7738 = vmatpush3.bf16.msra.mxu0 %v8880_v35  ;;  %7840 = vmatmul.mubr.bf16.gmra.mrb[20].mxu1 %v2487_v33  ;;  %v9980_v35 = vld [vmem:[#allocation2 + $0x30] sm:$0xff]   ;;  %v2026_v58 = vor.u32 %v2025_v55, %v2022_v39  ;;  %v2044_v33 = vor.u32 %v2043_v25, %v2040_v0  ;;  %v1763_v24 = vrot.slane %v1557_v27, 4  ;;  %v2052_v34 = vrot.slane %v2050_v49, 4 }
 0x143   : > { %7852 = vmatpush3.bf16.msra.mxu1 %v8882_v13  ;;  %7859 = vmatprep.mubr.bf16.mxu1 %v2709_v61  ;;  %v2008_v13 = vor.u32 %v2007_v20, %v2004_v56  ;;  %v2722_v51 = vshll.u32 %v9980_v35, 16  ;;  %v2718_v45 = vshrl.u32 %v9973_v1, 16  ;;  %v2730_v19 = vshll.u32 %v10003_v15, 16 }
 0x144   : > { %7739 = vmatprep.subr.bf16.mxu0 %v9942_v11  ;;  %7853 = vmatprep.subr.bf16.mxu1 %v8886_v36  ;;  %v10006_v22 = vsel %vm1745_vm5, %v2017_v50, %v2026_v58  ;;  %v2053_v54 = vor.u32 %v2052_v34, %v2049_v59  ;;  %v1760_v56 = vor.u32 %v1759_v8, %v1758_v29  ;;  %v2734_v39 = vshrl.u32 %v10003_v15, 16 }
 0x145   : > { %7728 = vmatmul.mubr.bf16.gmra.mrb[32].mxu0 %v1588_v4  ;;  %v9994_v38 = vsel %vm1745_vm5, %v2000_v31, %v2008_v13  ;;  %v9997_v48 = vsel %vm1745_vm5, %v2008_v13, %v2017_v50  ;;  %v2724_v7 = vrot.slane %v2722_v51, 1  ;;  %v2720_v27 = vor.u32 %v2718_v45, %v2716_v23  ;;  %v8907_v13 = vld [vmem:[#allocation2 + $0x34] ss:$0 sps:$4 sm:$0xff]  }
 0x146   : > { %7740 = vmatpush3.bf16.msra.mxu0 %v9942_v11  ;;  %7747 = vmatprep.mubr.bf16.mxu0 %v1757_v6  ;;  %v2717_v4 = vsel %vm2435_vm3, %v2712_v62, %v2716_v23  ;;  %v10056_v20 = vsel %vm1745_vm5, %v2044_v33, %v2053_v54  ;;  %v10063_v6 = vld [vmem:[%s11652_s3 + $0xc8] sm:$0xff]   ;;  %v2726_v31 = vshrl.u32 %v9980_v35, 16  ;;  %v2732_v50 = vrot.slane %v2730_v19, 1 }
 0x147   : > { %7854 = vmatpush3.bf16.msra.mxu1 %v8886_v36  ;;  %7741 = vmatprep.subr.bf16.mxu0 %v9963_v63  ;;  %v2035_v36 = vor.u32 %v2034_v14, %v2031_v12  ;;  %v2725_v41 = vsel %vm2435_vm3, %v2720_v27, %v2724_v7  ;;  %v2738_v55 = vshll.u32 %v10042_v52, 16  ;;  %v1761_v46 = vsel %vm1745_vm5, %v9950_v5, %v1760_v56 }
 0x148   : > { %7855 = vmatprep.subr.bf16.mxu1 %v8888_v18  ;;  %v2728_v12 = vor.u32 %v2726_v31, %v2724_v7  ;;  %v1770_v14 = vrot.slane %v1572_v17, 3  ;;  %v1771_v5 = vrot.slane %v1575_v32, 4  ;;  %v8902_v32 = vld [vmem:[%s11652_s3 + $0x1d8] sm:$0xff]   ;;  %v1775_v0 = vshrl.u32 %v8907_v13, 16 }
 0x149   : > { %v10031_v61 = vsel %vm1745_vm5, %v2026_v58, %v2035_v36  ;;  %v10039_v44 = vsel %vm1745_vm5, %v2035_v36, %v2044_v33  ;;  %v1767_v58 = vrot.slane %v1566_v40, 4  ;;  %v10096_v40 = vld [vmem:[#allocation2 + $0x48] ss:$0 sps:$4 sm:$0x11]   ;;  %v2740_v21 = vrot.slane %v2738_v55, 1 }
 0x14a   : > { %7742 = vmatpush3.bf16.msra.mxu0 %v9963_v63  ;;  %v1778_v25 = vshll.u32 %v8907_v13, 16  ;;  %v2733_v62 = vsel %vm2435_vm3, %v2728_v12, %v2732_v50  ;;  %v1772_v29 = vor.u32 %v1771_v5, %v1770_v14  ;;  %v2897_v36 = vld [vmem:[#allocation2 + $0x18] sm:$0xe]  ;;  %v2742_v8 = vshrl.u32 %v10042_v52, 16  ;;  %v10142_v13 = vld [vmem:[%s11652_s3 + $0xe8] sm:$0xff]   ;;  %v8915_v12 = vld [vmem:[%s11652_s3 + $0x200] sm:$0xff]  }
 0x14b   : > { %7856 = vmatpush3.bf16.msra.mxu1 %v8888_v18  ;;  %7743 = vmatprep.subr.bf16.mxu0 %v9987_v47  ;;  %v1764_v18 = vor.u32 %v1763_v24, %v1762_v60  ;;  %v2746_v33 = vshll.u32 %v10096_v40, 16  ;;  %v8905_v60 = vld [vmem:[%s11652_s3 + $0x1e0] sm:$0xff]   ;;  %v10119_v24 = vcombine.low %v2897_v36, %v9862_v10  ;;  %v1777_v34 = vrot.slane %v1775_v0, 3  ;;  %v8917_v0 = vld [vmem:[%s11652_s3 + $0x210] sm:$0xff]  }
 0x14c   : > { %7857 = vmatprep.subr.bf16.mxu1 %v8890_v28  ;;  %v1780_v7 = vrot.slane %v1778_v25, 4  ;;  %v2744_v27 = vor.u32 %v2742_v8, %v2740_v21  ;;  %v2922_v14 = vrot.slane %v9973_v1, 1  ;;  %v2924_v5 = vrot.slane %v9980_v35, 1  ;;  %v10282_v1 = vld [vmem:[#allocation2 + $0x4c] sm:$0xff]   ;;  %v10290_v35 = vld [vmem:[%s11652_s3 + $0x78] sm:$0xff]  }
 0x14d   : > { %v1765_v49 = vsel %vm1745_vm5, %v1760_v56, %v1764_v18  ;;  %v2920_v56 = vrot.slane %v9898_v37, 1  ;;  %v2919_v10 = vrot.slane %v10119_v24, 1  ;;  %v2926_v25 = vrot.slane %v10003_v15, 1  ;;  %v10308_v15 = vld [vmem:[%s11652_s3] sm:$0xff]  }
 0x14e   : > { %7744 = vmatpush3.bf16.msra.mxu0 %v9987_v47  ;;  %v3102_v36 = vshrl.u32 %v10119_v24, 16 }
 0x14f   : > { %7858 = vmatpush3.bf16.msra.mxu1 %v8890_v28  ;;  %7745 = vmatprep.subr.bf16.mxu0 %v10015_v43  ;;  %v1766_v28 = vrot.slane %v1563_v16, 3  ;;  %v2736_v16 = vor.u32 %v2734_v39, %v2732_v50 }
 0x150   : > { %7871 = vmatprep.subr.bf16.mxu1 %v8893_v53 }
 0x151   : > { %v1768_v17 = vor.u32 %v1767_v58, %v1766_v28  ;;  %v2741_v23 = vsel %vm2435_vm3, %v2736_v16, %v2740_v21  ;;  %v8911_v28 = vld [vmem:[%s11652_s3 + $0x1f0] sm:$0xff]   ;;  %v8916_v16 = vld [vmem:[%s11652_s3 + $0x208] sm:$0xff]   ;;  %v2923_v21 = vsel %vm2918_vm6, %v2920_v56, %v2922_v14 }
 0x152   : > { %7746 = vmatpush3.bf16.msra.mxu0 %v10015_v43  ;;  %7860 = vmatmul.mubr.bf16.vlgmr.msra.gmra.mrb[12].mxu1 %v2717_v4  ;;  %v1781_v4 = vor.u32 %v1780_v7, %v1777_v34  ;;  %v10155_v58 = vld [vmem:[%s11652_s3 + $0xf0] sm:$0xff]   ;;  %v10212_v34 = vld [vmem:[#allocation2 + $0x38] sm:$0xf] }
 0x153   : > { %7863 = vmatprep.mubr.bf16.mxu1 %v2725_v41  ;;  %7872 = vmatpush3.bf16.msra.mxu1 %v8893_v53  ;;  %v10109_v53 = vld [vmem:[%s11652_s3 + $0xd8] sm:$0xff]   ;;  %v1769_v59 = vsel %vm1745_vm5, %v1764_v18, %v1768_v17  ;;  %v1773_v54 = vsel %vm1745_vm5, %v1768_v17, %v1772_v29  ;;  %v10131_v18 = vld [vmem:[%s11652_s3 + $0xe0] sm:$0xff]   ;;  %v8909_v41 = vld [vmem:[%s11652_s3 + $0x1e8] sm:$0xff]   ;;  %v2925_v17 = vsel %vm2918_vm6, %v2922_v14, %v2924_v5  ;;  %v3114_v14 = vrot.slane %v2714_v30, 2 }
 0x154   : > { %7759 = vmatprep.subr.bf16.mxu0 %v10049_v2  ;;  %7873 = vmatprep.subr.bf16.mxu1 %v8896_v3  ;;  %v3431_v7 = vld [vmem:[#allocation2 + $0x34] sm:$0x8] }
 0x155   : > { %7748 = vmatmul.mubr.bf16.vlgmr.msra.gmra.mrb[24].mxu0 %v1761_v46  ;;  %v1782_v46 = vsel %vm1745_vm5, %v1772_v29, %v1781_v4  ;;  %v2928_v29 = vrot.slane %v10042_v52, 1  ;;  %v10327_v52 = vld [vmem:[%s11652_s3 + $0x8] sm:$0xff]  }
 0x156   : > { %7751 = vmatprep.mubr.bf16.mxu0 %v1765_v49  ;;  %7760 = vmatpush3.bf16.msra.mxu0 %v10049_v2  ;;  %v8913_v49 = vld [vmem:[%s11652_s3 + $0x1f8] sm:$0xff]  }
 0x157   : > { %7874 = vmatpush3.bf16.msra.mxu1 %v8896_v3  ;;  %7761 = vmatprep.subr.bf16.mxu0 %v10063_v6  ;;  %v2748_v3 = vrot.slane %v2746_v33, 1  ;;  %v2929_v33 = vsel %vm2918_vm6, %v2926_v25, %v2928_v29 }
 0x158   : > { %7875 = vmatprep.subr.bf16.mxu1 %v8899_v42 }
 0x159   : > { %v2749_v50 = vsel %vm2435_vm3, %v2744_v27, %v2748_v3  ;;  %v10226_v27 = vcombine.low %v3431_v7, %v10212_v34  ;;  %v10233_v3 = vld [vmem:[%s11652_s3 + $0x58] sm:$0xff]  }
 0x15a   : > { %7762 = vmatpush3.bf16.msra.mxu0 %v10063_v6  ;;  %7864 = vmatmul.mubr.bf16.gmra.mrb[16].mxu1 %v2733_v62  ;;  %v10196_v62 = vld [vmem:[%s11652_s3 + $0x48] sm:$0xff]  }
 0x15b   : > { %7867 = vmatprep.mubr.bf16.mxu1 %v2741_v23  ;;  %7876 = vmatpush3.bf16.msra.mxu1 %v8899_v42  ;;  %v2921_v42 = vsel %vm2918_vm6, %v2919_v10, %v2920_v56  ;;  %v2927_v23 = vsel %vm2918_vm6, %v2924_v5, %v2926_v25  ;;  %v10236_v10 = vld [vmem:[#allocation2 + $0x3c] sm:$0xff]   ;;  %v3465_v4 = vrot.slane %v10226_v27, 3  ;;  %v3117_v5 = vrot.slane %v2726_v31, 1 }
 0x15c   : > { %7763 = vmatprep.subr.bf16.mxu0 %v10094_v57  ;;  %7877 = vmatprep.subr.bf16.mxu1 %v8902_v32  ;;  %v3122_v31 = vrot.slane %v2730_v19, 2  ;;  %v3470_v25 = vrot.slane %v10282_v1, 3 }
 0x15d   : > { %7752 = vmatmul.mubr.bf16.gmra.mrb[28].mxu0 %v1769_v59  ;;  %v3109_v59 = vrot.slane %v2710_v26, 1  ;;  %v8919_v26 = vld [vmem:[%s11652_s3 + $0x220] sm:$0xff]  }
 0x15e   : > { %7755 = vmatprep.mubr.bf16.mxu0 %v1773_v54  ;;  %7764 = vmatpush3.bf16.msra.mxu0 %v10094_v57  ;;  %v3104_v54 = vrot.slane %v3102_v36, 1 }
 0x15f   : > { %7878 = vmatpush3.bf16.msra.mxu1 %v8902_v32  ;;  %7765 = vmatprep.subr.bf16.mxu0 %v10109_v53  ;;  %v10183_v32 = vld [vmem:[%s11652_s3 + $0x40] sm:$0xff]  }
 0x160   : > { %7879 = vmatprep.subr.bf16.mxu1 %v8905_v60 }
 0x162   : > { %7766 = vmatpush3.bf16.msra.mxu0 %v10109_v53  ;;  %7868 = vmatmul.mubr.bf16.gmra.mrb[20].mxu1 %v2749_v50  ;;  %v3466_v50 = vrot.slane %v10236_v10, 3 }
 0x163   : > { %7880 = vmatpush3.bf16.msra.mxu1 %v8905_v60  ;;  %7887 = vmatprep.mubr.bf16.mxu1 %v2921_v42  ;;  %v3110_v60 = vrot.slane %v2706_v9, 2  ;;  %v2930_v9 = vrot.slane %v10096_v40, 1  ;;  %v8920_v40 = vld [vmem:[%s11652_s3 + $0x228] sm:$0xff]   ;;  %v10249_v42 = vld [vmem:[%s11652_s3 + $0x60] sm:$0xff]  }
 0x164   : > { %7767 = vmatprep.subr.bf16.mxu0 %v10131_v18  ;;  %7881 = vmatprep.subr.bf16.mxu1 %v8909_v41 }
 0x165   : > { %7756 = vmatmul.mubr.bf16.gmra.mrb[32].mxu0 %v1782_v46  ;;  %v3111_v56 = vor.u32 %v3110_v60, %v3109_v59  ;;  %v8923_v46 = vld [vmem:[%s11652_s3 + $0x230] sm:$0xff]  }
 0x166   : > { %7768 = vmatpush3.bf16.msra.mxu0 %v10131_v18  ;;  %7775 = vmatprep.mubr.bf16.mxu0 %v9994_v38  ;;  %v10165_v38 = vld [vmem:[%s11652_s3 + $0xf8] sm:$0xff]  }
 0x167   : > { %7882 = vmatpush3.bf16.msra.mxu1 %v8909_v41  ;;  %7769 = vmatprep.subr.bf16.mxu0 %v10142_v13  ;;  %v10316_v59 = vld [vmem:[#allocation2 + $0x54] sm:$0xff]  }
 0x168   : > { %7883 = vmatprep.subr.bf16.mxu1 %v8911_v28 }
 0x16a   : > { %7770 = vmatpush3.bf16.msra.mxu0 %v10142_v13 }
 0x16b   : > { %7884 = vmatpush3.bf16.msra.mxu1 %v8911_v28  ;;  %7771 = vmatprep.subr.bf16.mxu0 %v10155_v58  ;;  %v3467_v28 = vsel %vm1374_vm2, %v3465_v4, %v3466_v50 }
 0x16c   : > { %7885 = vmatprep.subr.bf16.mxu1 %v8913_v49 }
 0x16e   : > { %7772 = vmatpush3.bf16.msra.mxu0 %v10155_v58 }
 0x16f   : > { %7886 = vmatpush3.bf16.msra.mxu1 %v8913_v49  ;;  %7773 = vmatprep.subr.bf16.mxu0 %v10165_v38  ;;  %v10261_v49 = vld [vmem:[%s11652_s3 + $0x68] sm:$0xff]  }
 0x170   : > { %7899 = vmatprep.subr.bf16.mxu1 %v8915_v12 }
 0x172   : > { %7774 = vmatpush3.bf16.msra.mxu0 %v10165_v38  ;;  %7888 = vmatmul.mubr.bf16.vlgmr.msra.gmra.mrb[12].mxu1 %v2923_v21  ;;  %v10279_v21 = vld [vmem:[%s11652_s3 + $0x70] sm:$0xff]  }
 0x173   : > { %7891 = vmatprep.mubr.bf16.mxu1 %v2925_v17  ;;  %7900 = vmatpush3.bf16.msra.mxu1 %v8915_v12  ;;  %v8924_v12 = vld [vmem:[%s11652_s3 + $0x238] sm:$0xff]   ;;  %v10285_v17 = vld [vmem:[#allocation2 + $0x44] sm:$0xff]  }
 0x174   : > { %7927 = vmatprep.subr.bf16.mxu0 %v10183_v32  ;;  %7901 = vmatprep.subr.bf16.mxu1 %v8916_v16  ;;  %v3468_v36 = vrot.slane %v10285_v17, 3 }
 0x175   : > { %7776 = vmatmul.mubr.bf16.vlgmr.msra.gmra.mrb[24].mxu0 %v9997_v48  ;;  %v8918_v48 = vld [vmem:[%s11652_s3 + $0x218] sm:$0xff]  }
 0x176   : > { %7779 = vmatprep.mubr.bf16.mxu0 %v10006_v22  ;;  %7928 = vmatpush3.bf16.msra.mxu0 %v10183_v32  ;;  %v3105_v22 = vshll.u32 %v10119_v24, 16  ;;  %v10217_v24 = vld [vmem:[%s11652_s3 + $0x50] sm:$0xff]   ;;  %v3471_v60 = vsel %vm1374_vm2, %v3468_v36, %v3470_v25 }
 0x177   : > { %7902 = vmatpush3.bf16.msra.mxu1 %v8916_v16  ;;  %7929 = vmatprep.subr.bf16.mxu0 %v10196_v62  ;;  %v3118_v16 = vrot.slane %v2722_v51, 2  ;;  %v3121_v51 = vrot.slane %v2734_v39, 1  ;;  %v3469_v39 = vsel %vm1374_vm2, %v3466_v50, %v3468_v36  ;;  %v3577_v50 = vshrl.u32 %v10236_v10, 16 }
 0x178   : > { %7903 = vmatprep.subr.bf16.mxu1 %v8917_v0  ;;  %v3107_v37 = vrot.slane %v3105_v22, 2  ;;  %v3418_v22 = vld [vmem:[#allocation2 + $0x34] sm:$0xc] }
 0x179   : > { %v3119_v30 = vor.u32 %v3118_v16, %v3117_v5  ;;  %v3123_v19 = vor.u32 %v3122_v31, %v3121_v51  ;;  %v10363_v51 = vld [vmem:[%s11652_s3 + $0x18] sm:$0xff]   ;;  %v3579_v31 = vrot.slane %v3577_v50, 2 }
 0x17a   : > { %7892 = vmatmul.mubr.bf16.gmra.mrb[16].mxu1 %v2927_v23  ;;  %7930 = vmatpush3.bf16.msra.mxu0 %v10196_v62  ;;  %v3125_v23 = vrot.slane %v2742_v8, 1 }
 0x17b   : > { %7895 = vmatprep.mubr.bf16.mxu1 %v2929_v33  ;;  %7904 = vmatpush3.bf16.msra.mxu1 %v8917_v0  ;;  %v3126_v33 = vrot.slane %v2738_v55, 2  ;;  %v3124_v55 = vsel %vm3100_vm7, %v3119_v30, %v3123_v19 }
 0x17c   : > { %7931 = vmatprep.subr.bf16.mxu0 %v10217_v24  ;;  %7905 = vmatprep.subr.bf16.mxu1 %v8918_v48 }
 0x17d   : > { %7780 = vmatmul.mubr.bf16.gmra.mrb[28].mxu0 %v10031_v61  ;;  %v3108_v61 = vor.u32 %v3107_v37, %v3104_v54  ;;  %v6983_v54 = vcombine.low %v3418_v22, %v10212_v34  ;;  %v3127_v8 = vor.u32 %v3126_v33, %v3125_v23  ;;  %v3472_v37 = vrot.slane %v10316_v59, 3  ;;  %v10395_v33 = vld [vmem:[#allocation2 + $0x74] sm:$0xff]  }
 0x17e   : > { %7783 = vmatprep.mubr.bf16.mxu0 %v10039_v44  ;;  %7932 = vmatpush3.bf16.msra.mxu0 %v10217_v24  ;;  %v2931_v44 = vsel %vm2918_vm6, %v2928_v29, %v2930_v9  ;;  %v8929_v29 = vld [vmem:[#allocation2 + $0x48] ss:$0 sps:$4 sm:$0x33]  }
 0x17f   : > { %7906 = vmatpush3.bf16.msra.mxu1 %v8918_v48  ;;  %7933 = vmatprep.subr.bf16.mxu0 %v10233_v3  ;;  %v3112_v41 = vsel %vm3100_vm7, %v3108_v61, %v3111_v56  ;;  %v3130_v7 = vshrl.u32 %v8929_v29, 16  ;;  %v10334_v9 = vld [vmem:[#allocation2 + $0x68] sm:$0xf]  ;;  %v4958_v61 = vld [vmem:[#allocation2 + $0x64] sm:$0x8]  ;;  %v3128_v4 = vsel %vm3100_vm7, %v3123_v19, %v3127_v8 }
 0x180   : > { %7907 = vmatprep.subr.bf16.mxu1 %v8919_v26  ;;  %v10381_v19 = vld [vmem:[%s11652_s3 + $0x20] sm:$0xff]  }
 0x182   : > { %7896 = vmatmul.mubr.bf16.gmra.mrb[20].mxu1 %v2931_v44  ;;  %7934 = vmatpush3.bf16.msra.mxu0 %v10233_v3  ;;  %v3572_v44 = vshll.u32 %v6983_v54, 16 }
 0x183   : > { %7908 = vmatpush3.bf16.msra.mxu1 %v8919_v26  ;;  %7915 = vmatprep.mubr.bf16.mxu1 %v3112_v41  ;;  %v3133_v26 = vshll.u32 %v8929_v29, 16  ;;  %v10338_v41 = vld [vmem:[#allocation2 + $0x6c] sm:$0xff]  }
 0x184   : > { %7935 = vmatprep.subr.bf16.mxu0 %v10249_v42  ;;  %7909 = vmatprep.subr.bf16.mxu1 %v8920_v40 }
 0x185   : > { %7784 = vmatmul.mubr.bf16.gmra.mrb[32].mxu0 %v10056_v20  ;;  %v3113_v20 = vrot.slane %v2718_v45, 1 }
 0x186   : > { %7936 = vmatpush3.bf16.msra.mxu0 %v10249_v42  ;;  %7943 = vmatprep.mubr.bf16.mxu0 %v3467_v28  ;;  %v3473_v28 = vsel %vm1374_vm2, %v3470_v25, %v3472_v37 }
 0x187   : > { %7910 = vmatpush3.bf16.msra.mxu1 %v8920_v40  ;;  %7937 = vmatprep.subr.bf16.mxu0 %v10261_v49  ;;  %v3115_v45 = vor.u32 %v3114_v14, %v3113_v20  ;;  %v3569_v40 = vshrl.u32 %v6983_v54, 16  ;;  %v10352_v20 = vcombine.low %v4958_v61, %v10334_v9  ;;  %v10354_v14 = vld [vmem:[#allocation2 + $0x64] ss:$0 sps:$4 sm:$0x77]   ;;  %v3589_v54 = vshll.u32 %v10285_v17, 16  ;;  %v10427_v61 = vld [vmem:[%s11652_s3 + $0x38] sm:$0xff]  }
 0x188   : > { %7911 = vmatprep.subr.bf16.mxu1 %v8923_v46  ;;  %v3476_v29 = vrot.slane %v10354_v14, 3 }
 0x189   : > { %v3116_v0 = vsel %vm3100_vm7, %v3111_v56, %v3115_v45  ;;  %v3120_v48 = vsel %vm3100_vm7, %v3115_v45, %v3119_v30  ;;  %v3132_v56 = vrot.slane %v3130_v7, 1  ;;  %v3571_v16 = vrot.slane %v3569_v40, 2 }
 0x18a   : > { %7938 = vmatpush3.bf16.msra.mxu0 %v10261_v49  ;;  %v3574_v45 = vrot.slane %v3572_v44, 3  ;;  %v4993_v30 = vrot.slane %v10338_v41, 3  ;;  %v4992_v25 = vrot.slane %v10352_v20, 3  ;;  %v3598_v7 = vshll.u32 %v10282_v1, 16 }
 0x18b   : > { %7912 = vmatpush3.bf16.msra.mxu1 %v8923_v46  ;;  %7939 = vmatprep.subr.bf16.mxu0 %v10279_v21  ;;  %v3580_v46 = vshll.u32 %v10236_v10, 16  ;;  %v3604_v40 = vshrl.u32 %v10316_v59, 16  ;;  %v3607_v44 = vshll.u32 %v10316_v59, 16 }
 0x18c   : > { %7913 = vmatprep.subr.bf16.mxu1 %v8924_v12  ;;  %v4994_v36 = vsel %vm1374_vm2, %v4992_v25, %v4993_v30 }
 0x18d   : > { %v3609_v25 = vrot.slane %v3607_v44, 3 }
 0x18e   : > { %7940 = vmatpush3.bf16.msra.mxu0 %v10279_v21 }
 0x18f   : > { %7914 = vmatpush3.bf16.msra.mxu1 %v8924_v12  ;;  %7941 = vmatprep.subr.bf16.mxu0 %v10290_v35  ;;  %v10347_v12 = vld [vmem:[%s11652_s3 + $0x10] sm:$0xff]  }
 0x190   : > { %8179 = vmatprep.subr.bf16.mxu1 %v10183_v32 }
 0x192   : > { %7916 = vmatmul.mubr.bf16.vlgmr.msra.gmra.mrb[12].mxu1 %v3116_v0  ;;  %7942 = vmatpush3.bf16.msra.mxu0 %v10290_v35  ;;  %v3582_v0 = vrot.slane %v3580_v46, 3 }
 0x193   : > { %7919 = vmatprep.mubr.bf16.mxu1 %v3120_v48  ;;  %8180 = vmatpush3.bf16.msra.mxu1 %v10183_v32  ;;  %v10318_v32 = vld [vmem:[#allocation2 + $0x5c] sm:$0xff]   ;;  %v3575_v48 = vor.u32 %v3574_v45, %v3571_v16  ;;  %v4945_v16 = vld [vmem:[#allocation2 + $0x64] sm:$0xc] }
 0x194   : > { %7955 = vmatprep.subr.bf16.mxu0 %v10308_v15  ;;  %8181 = vmatprep.subr.bf16.mxu1 %v10196_v62  ;;  %v3474_v34 = vrot.slane %v10318_v32, 3  ;;  %v3583_v22 = vor.u32 %v3582_v0, %v3579_v31  ;;  %v10440_v0 = vld [vmem:[#allocation2 + $0x8c] sm:$0xff]  }
 0x195   : > { %7944 = vmatmul.mubr.bf16.vlgmr.msra.gmra.mrb[36].mxu0 %v3469_v39 }
 0x196   : > { %7947 = vmatprep.mubr.bf16.mxu0 %v3471_v60  ;;  %7956 = vmatpush3.bf16.msra.mxu0 %v10308_v15  ;;  %v3477_v39 = vsel %vm1374_vm2, %v3474_v34, %v3476_v29  ;;  %v3584_v23 = vsel %vm1526_vm4, %v3575_v48, %v3583_v22  ;;  %v3595_v60 = vshrl.u32 %v10282_v1, 16  ;;  %v7021_v48 = vcombine.low %v4945_v16, %v10334_v9 }
 0x197   : > { %8182 = vmatpush3.bf16.msra.mxu1 %v10196_v62  ;;  %7957 = vmatprep.subr.bf16.mxu0 %v10327_v52  ;;  %v3135_v62 = vrot.slane %v3133_v26, 2  ;;  %v10400_v26 = vld [vmem:[#allocation2 + $0x7c] sm:$0xff]   ;;  %v11658_v9 = vshll.u32 %v10338_v41, 16  ;;  %v3625_v16 = vshll.u32 %v10354_v14, 16 }
 0x198   : > { %8183 = vmatprep.subr.bf16.mxu1 %v10217_v24 }
 0x199   : > { %v3136_v5 = vor.u32 %v3135_v62, %v3132_v56  ;;  %v3591_v62 = vrot.slane %v3589_v54, 3 }
 0x19a   : > { %7920 = vmatmul.mubr.bf16.gmra.mrb[16].mxu1 %v3124_v55  ;;  %7958 = vmatpush3.bf16.msra.mxu0 %v10327_v52  ;;  %v10408_v55 = vld [vmem:[%s11652_s3 + $0x30] sm:$0xff]  }
 0x19b   : > { %7923 = vmatprep.mubr.bf16.mxu1 %v3128_v4  ;;  %8184 = vmatpush3.bf16.msra.mxu1 %v10217_v24  ;;  %v3475_v24 = vsel %vm1374_vm2, %v3472_v37, %v3474_v34  ;;  %v3597_v37 = vrot.slane %v3595_v60, 2  ;;  %v3600_v34 = vrot.slane %v3598_v7, 3 }
 0x19c   : > { %7959 = vmatprep.subr.bf16.mxu0 %v10347_v12  ;;  %8185 = vmatprep.subr.bf16.mxu1 %v10233_v3 }
 0x19d   : > { %7948 = vmatmul.mubr.bf16.gmra.mrb[40].mxu0 %v3473_v28  ;;  %v3601_v28 = vor.u32 %v3600_v34, %v3597_v37  ;;  %v10470_v37 = vld [vmem:[%s11652_s3 + $0x88] sm:$0xff]  }
 0x19e   : > { %7951 = vmatprep.mubr.bf16.mxu0 %v3475_v24  ;;  %7960 = vmatpush3.bf16.msra.mxu0 %v10347_v12  ;;  %v10434_v24 = vld [vmem:[#allocation2 + $0x84] sm:$0xff]  }
 0x19f   : > { %8186 = vmatpush3.bf16.msra.mxu1 %v10233_v3  ;;  %7961 = vmatprep.subr.bf16.mxu0 %v10363_v51  ;;  %v3137_v3 = vsel %vm3100_vm7, %v3127_v8, %v3136_v5  ;;  %v4995_v8 = vrot.slane %v10395_v33, 3  ;;  %v3616_v5 = vshll.u32 %v10318_v32, 16 }
 0x1a0   : > { %8187 = vmatprep.subr.bf16.mxu1 %v10249_v42 }
 0x1a1   : > { %v4996_v4 = vsel %vm1374_vm2, %v4993_v30, %v4995_v8  ;;  %v3606_v30 = vrot.slane %v3604_v40, 2 }
 0x1a2   : > { %7924 = vmatmul.mubr.bf16.gmra.mrb[20].mxu1 %v3137_v3  ;;  %7962 = vmatpush3.bf16.msra.mxu0 %v10363_v51  ;;  %v10451_v3 = vld [vmem:[%s11652_s3 + $0x80] sm:$0xff]  }
 0x1a3   : > { %8188 = vmatpush3.bf16.msra.mxu1 %v10249_v42  ;;  %8195 = vmatprep.mubr.bf16.mxu1 %v4994_v36  ;;  %v10391_v42 = vld [vmem:[%s11652_s3 + $0x28] sm:$0xff]   ;;  %v4999_v36 = vrot.slane %v10434_v24, 3  ;;  %v3610_v34 = vor.u32 %v3609_v25, %v3606_v30 }
 0x1a4   : > { %7963 = vmatprep.subr.bf16.mxu0 %v10381_v19  ;;  %8189 = vmatprep.subr.bf16.mxu1 %v10261_v49 }
 0x1a5   : > { %7952 = vmatmul.mubr.bf16.gmra.mrb[44].mxu0 %v3477_v39 }
 0x1a6   : > { %7964 = vmatpush3.bf16.msra.mxu0 %v10381_v19  ;;  %7971 = vmatprep.mubr.bf16.mxu0 %v3584_v23  ;;  %v5001_v23 = vrot.slane %v10440_v0, 3 }
 0x1a7   : > { %8190 = vmatpush3.bf16.msra.mxu1 %v10261_v49  ;;  %7965 = vmatprep.subr.bf16.mxu0 %v10391_v42  ;;  %v3586_v49 = vshrl.u32 %v10285_v17, 16 }
 0x1a8   : > { %8191 = vmatprep.subr.bf16.mxu1 %v10279_v21  ;;  %v5002_v30 = vsel %vm1374_vm2, %v4999_v36, %v5001_v23 }
 0x1a9   : > { %v3588_v56 = vrot.slane %v3586_v49, 2 }
 0x1aa   : > { %7966 = vmatpush3.bf16.msra.mxu0 %v10391_v42 }
 0x1ab   : > { %8192 = vmatpush3.bf16.msra.mxu1 %v10279_v21  ;;  %7967 = vmatprep.subr.bf16.mxu0 %v10408_v55  ;;  %v4997_v21 = vrot.slane %v10400_v26, 3  ;;  %v3592_v31 = vor.u32 %v3591_v62, %v3588_v56  ;;  %v5096_v56 = vshrl.u32 %v7021_v48, 16  ;;  %v5099_v62 = vshll.u32 %v7021_v48, 16 }
 0x1ac   : > { %8193 = vmatprep.subr.bf16.mxu1 %v10290_v35 }
 0x1ad   : > { %v4998_v45 = vsel %vm1374_vm2, %v4995_v8, %v4997_v21  ;;  %v3593_v29 = vsel %vm1526_vm4, %v3583_v22, %v3592_v31  ;;  %v3618_v22 = vrot.slane %v3616_v5, 3  ;;  %v5104_v8 = vshrl.u32 %v10338_v41, 16 }
 0x1ae   : > { %7968 = vmatpush3.bf16.msra.mxu0 %v10408_v55  ;;  %v5098_v48 = vrot.slane %v5096_v56, 2  ;;  %v10503_v56 = vld [vmem:[%s11652_s3 + $0x98] sm:$0xff]  }
 0x1af   : > { %8194 = vmatpush3.bf16.msra.mxu1 %v10290_v35  ;;  %7969 = vmatprep.subr.bf16.mxu0 %v10427_v61  ;;  %v3613_v35 = vshrl.u32 %v10318_v32, 16  ;;  %v5106_v25 = vrot.slane %v5104_v8, 2 }
 0x1b0   : > { %8207 = vmatprep.subr.bf16.mxu1 %v10308_v15 }
 0x1b1   : > { %v3615_v39 = vrot.slane %v3613_v35, 2 }
 0x1b2   : > { %7970 = vmatpush3.bf16.msra.mxu0 %v10427_v61  ;;  %8196 = vmatmul.mubr.bf16.vlgmr.msra.gmra.mrb[24].mxu1 %v4996_v4  ;;  %v3622_v4 = vshrl.u32 %v10354_v14, 16  ;;  %v5109_v14 = vrot.slane %v11658_v9, 3 }
 0x1b3   : > { %8199 = vmatprep.mubr.bf16.mxu1 %v4998_v45  ;;  %8208 = vmatpush3.bf16.msra.mxu1 %v10308_v15  ;;  %v3602_v15 = vsel %vm1526_vm4, %v3592_v31, %v3601_v28  ;;  %v5000_v45 = vsel %vm1374_vm2, %v4997_v21, %v4999_v36  ;;  %v3619_v31 = vor.u32 %v3618_v22, %v3615_v39  ;;  %v5101_v36 = vrot.slane %v5099_v62, 3 }
 0x1b4   : > { %7983 = vmatprep.subr.bf16.mxu0 %v10451_v3  ;;  %8209 = vmatprep.subr.bf16.mxu1 %v10327_v52  ;;  %v3611_v21 = vsel %vm1526_vm4, %v3601_v28, %v3610_v34  ;;  %v3624_v39 = vrot.slane %v3622_v4, 2  ;;  %v3627_v22 = vrot.slane %v3625_v16, 3  ;;  %v5110_v9 = vor.u32 %v5109_v14, %v5106_v25  ;;  %v10524_v14 = vld [vmem:[%s11652_s3 + $0xa0] sm:$0xff]  }
 0x1b5   : > { %7972 = vmatmul.mubr.bf16.vlgmr.msra.gmra.mrb[36].mxu0 %v3593_v29  ;;  %v3722_v29 = vshrl.u32 %v10226_v27, 16  ;;  %v3730_v62 = vrot.slane %v3580_v46, 4  ;;  %v5102_v4 = vor.u32 %v5101_v36, %v5098_v48  ;;  %v5113_v46 = vshrl.u32 %v10395_v33, 16 }
 0x1b6   : > { %7975 = vmatprep.mubr.bf16.mxu0 %v3602_v15  ;;  %7984 = vmatpush3.bf16.msra.mxu0 %v10451_v3  ;;  %v3725_v15 = vshll.u32 %v10226_v27, 16  ;;  %v10492_v27 = vld [vmem:[%s11652_s3 + $0x90] sm:$0xff]   ;;  %v3628_v16 = vor.u32 %v3627_v22, %v3624_v39  ;;  %v5134_v39 = vshll.u32 %v10434_v24, 16 }
 0x1b7   : > { %8210 = vmatpush3.bf16.msra.mxu1 %v10327_v52  ;;  %7985 = vmatprep.subr.bf16.mxu0 %v10470_v37  ;;  %v10477_v52 = vld [vmem:[#allocation2 + $0x94] ss:$0 sps:$4 sm:$0x77]  }
 0x1b8   : > { %8211 = vmatprep.subr.bf16.mxu1 %v10347_v12  ;;  %v3727_v28 = vrot.slane %v3725_v15, 4  ;;  %v5111_v15 = vsel %vm1526_vm4, %v5102_v4, %v5110_v9  ;;  %v5136_v1 = vrot.slane %v5134_v39, 3 }
 0x1ba   : > { %7986 = vmatpush3.bf16.msra.mxu0 %v10470_v37  ;;  %8200 = vmatmul.mubr.bf16.gmra.mrb[28].mxu1 %v5000_v45  ;;  %v3620_v45 = vsel %vm1526_vm4, %v3610_v34, %v3619_v31  ;;  %v3729_v34 = vrot.slane %v3577_v50, 3  ;;  %v3629_v50 = vsel %vm1526_vm4, %v3619_v31, %v3628_v16  ;;  %v5115_v31 = vrot.slane %v5113_v46, 2  ;;  %v8940_v16 = vld [vmem:[#allocation2 + $0x64] ss:$0 sps:$4 sm:$0xff]  }
 0x1bb   : > { %8203 = vmatprep.mubr.bf16.mxu1 %v5002_v30  ;;  %8212 = vmatpush3.bf16.msra.mxu1 %v10347_v12  ;;  %v5003_v12 = vrot.slane %v10477_v52, 3  ;;  %v3724_v30 = vrot.slane %v3722_v29, 3 }
 0x1bc   : > { %7987 = vmatprep.subr.bf16.mxu0 %v10492_v27  ;;  %8213 = vmatprep.subr.bf16.mxu1 %v10363_v51  ;;  %v3731_v25 = vor.u32 %v3730_v62, %v3729_v34  ;;  %v5143_v34 = vshll.u32 %v10440_v0, 16  ;;  %v3857_v62 = vld [vmem:[#allocation2 + $0x3c] sm:$0x8] }
 0x1bd   : > { %7976 = vmatmul.mubr.bf16.gmra.mrb[40].mxu0 %v3611_v21  ;;  %v5004_v29 = vsel %vm1374_vm2, %v5001_v23, %v5003_v12  ;;  %v5116_v23 = vshll.u32 %v10395_v33, 16  ;;  %v3738_v12 = vrot.slane %v3598_v7, 4  ;;  %v10666_v33 = vld [vmem:[#allocation2 + $0x5c] sm:$0xf] }
 0x1be   : > { %7979 = vmatprep.mubr.bf16.mxu0 %v3620_v45  ;;  %7988 = vmatpush3.bf16.msra.mxu0 %v10492_v27  ;;  %v3737_v45 = vrot.slane %v3595_v60, 3 }
 0x1bf   : > { %8214 = vmatpush3.bf16.msra.mxu1 %v10363_v51  ;;  %7989 = vmatprep.subr.bf16.mxu0 %v10503_v56  ;;  %v3728_v51 = vor.u32 %v3727_v28, %v3724_v30  ;;  %v5118_v21 = vrot.slane %v5116_v23, 3  ;;  %v3734_v30 = vrot.slane %v3589_v54, 4  ;;  %v5140_v28 = vshrl.u32 %v10440_v0, 16 }
 0x1c0   : > { %8215 = vmatprep.subr.bf16.mxu1 %v10381_v19  ;;  %v3739_v17 = vor.u32 %v3738_v12, %v3737_v45 }
 0x1c1   : > { %v3732_v10 = vsel %vm1745_vm5, %v3728_v51, %v3731_v25  ;;  %v5119_v22 = vor.u32 %v5118_v21, %v5115_v31  ;;  %v5142_v54 = vrot.slane %v5140_v28, 2  ;;  %v5249_v31 = vshrl.u32 %v10352_v20, 16 }
 0x1c2   : > { %7990 = vmatpush3.bf16.msra.mxu0 %v10503_v56  ;;  %8204 = vmatmul.mubr.bf16.gmra.mrb[32].mxu1 %v5004_v29  ;;  %v10576_v29 = vld [vmem:[#allocation2 + $0x40] sm:$0xf] }
 0x1c3   : > { %8216 = vmatpush3.bf16.msra.mxu1 %v10381_v19  ;;  %8223 = vmatprep.mubr.bf16.mxu1 %v5111_v15  ;;  %v5122_v19 = vshrl.u32 %v10400_v26, 16  ;;  %v3745_v15 = vrot.slane %v3613_v35, 3 }
 0x1c4   : > { %7991 = vmatprep.subr.bf16.mxu0 %v9942_v11  ;;  %8217 = vmatprep.subr.bf16.mxu1 %v10391_v42  ;;  %v5125_v11 = vshll.u32 %v10400_v26, 16 }
 0x1c5   : > { %7980 = vmatmul.mubr.bf16.gmra.mrb[44].mxu0 %v3629_v50  ;;  %v5124_v48 = vrot.slane %v5122_v19, 2  ;;  %v10585_v50 = vld [vmem:[#allocation2 + $0x44] sm:$0xf] }
 0x1c6   : > { %7992 = vmatpush3.bf16.msra.mxu0 %v10524_v14  ;;  %7999 = vmatprep.mubr.bf16.mxu0 %v3732_v10  ;;  %v5127_v36 = vrot.slane %v5125_v11, 3  ;;  %v6985_v10 = vcombine.low %v3857_v62, %v10576_v29 }
 0x1c7   : > { %8218 = vmatpush3.bf16.msra.mxu1 %v10391_v42  ;;  %7993 = vmatprep.subr.bf16.mxu0 %v9963_v63  ;;  %v5131_v42 = vshrl.u32 %v10434_v24, 16 }
 0x1c8   : > { %8219 = vmatprep.subr.bf16.mxu1 %v10408_v55  ;;  %v3907_v45 = vshll.u32 %v6985_v10, 16 }
 0x1c9   : > { %v5133_v60 = vrot.slane %v5131_v42, 2 }
 0x1ca   : > { %7994 = vmatpush3.bf16.msra.mxu0 %v9963_v63  ;;  %v3733_v63 = vrot.slane %v3586_v49, 3  ;;  %v3909_v62 = vrot.slane %v3907_v45, 4 }
 0x1cb   : > { %8220 = vmatpush3.bf16.msra.mxu1 %v10408_v55  ;;  %7995 = vmatprep.subr.bf16.mxu0 %v9987_v47  ;;  %v5128_v55 = vor.u32 %v5127_v36, %v5124_v48  ;;  %v5137_v4 = vor.u32 %v5136_v1, %v5133_v60  ;;  %v5252_v48 = vshll.u32 %v10352_v20, 16  ;;  %v3750_v36 = vshrl.u32 %v8940_v16, 16 }
 0x1cc   : > { %8221 = vmatprep.subr.bf16.mxu1 %v10427_v61  ;;  %v3735_v49 = vor.u32 %v3734_v30, %v3733_v63  ;;  %v11674_v30 = vshll.u32 %v10338_v41, 16 }
 0x1cd   : > { %v5129_v7 = vsel %vm1526_vm4, %v5119_v22, %v5128_v55  ;;  %v5138_v32 = vsel %vm1526_vm4, %v5128_v55, %v5137_v4  ;;  %v5256_v55 = vrot.slane %v5104_v8, 3 }
 0x1ce   : > { %7996 = vmatpush3.bf16.msra.mxu0 %v9987_v47  ;;  %v5120_v47 = vsel %vm1526_vm4, %v5110_v9, %v5119_v22  ;;  %v3741_v9 = vrot.slane %v3604_v40, 3  ;;  %v3736_v51 = vsel %vm1745_vm5, %v3731_v25, %v3735_v49  ;;  %v10587_v40 = vld [vmem:[#allocation2 + $0x48] sm:$0xf]  ;;  %v3740_v59 = vsel %vm1745_vm5, %v3735_v49, %v3739_v17 }
 0x1cf   : > { %8222 = vmatpush3.bf16.msra.mxu1 %v10427_v61  ;;  %7997 = vmatprep.subr.bf16.mxu0 %v10015_v43  ;;  %v5145_v61 = vrot.slane %v5143_v34, 3  ;;  %v5152_v25 = vshll.u32 %v10477_v52, 16  ;;  %v6986_v21 = vcombine.low %v10585_v50, %v10587_v40  ;;  %v5257_v60 = vrot.slane %v11674_v30, 4  ;;  %v8947_v30 = vld [vmem:[#allocation2 + $0x94] ss:$0 sps:$4 sm:$0xff]  }
 0x1d0   : > { %8235 = vmatprep.subr.bf16.mxu1 %v10451_v3  ;;  %v3752_v49 = vrot.slane %v3750_v36, 3 }
 0x1d1   : > { %v5146_v35 = vor.u32 %v5145_v61, %v5142_v54  ;;  %v5154_v63 = vrot.slane %v5152_v25, 3  ;;  %v3912_v1 = vshrl.u32 %v6986_v21, 16 }
 0x1d2   : > { %7998 = vmatpush3.bf16.msra.mxu0 %v10015_v43  ;;  %8224 = vmatmul.mubr.bf16.vlgmr.msra.gmra.mrb[24].mxu1 %v5120_v47  ;;  %v3742_v43 = vrot.slane %v3607_v44, 4  ;;  %v5149_v44 = vshrl.u32 %v10477_v52, 16  ;;  %v3915_v47 = vshll.u32 %v6986_v21, 16  ;;  %v5260_v21 = vrot.slane %v5113_v46, 3  ;;  %v9031_v46 = vld [vmem:[%s11652_s3 + $0xb8] sm:$0xff]  }
 0x1d3   : > { %8227 = vmatprep.mubr.bf16.mxu1 %v5129_v7  ;;  %8236 = vmatpush3.bf16.msra.mxu1 %v10451_v3  ;;  %v3746_v3 = vrot.slane %v3616_v5, 4  ;;  %v5147_v12 = vsel %vm1526_vm4, %v5137_v4, %v5146_v35  ;;  %v5254_v7 = vrot.slane %v5252_v48, 4 }
 0x1d4   : > { %8011 = vmatprep.subr.bf16.mxu0 %v10049_v2  ;;  %8237 = vmatprep.subr.bf16.mxu1 %v10470_v37  ;;  %v3743_v5 = vor.u32 %v3742_v43, %v3741_v9  ;;  %v5151_v22 = vrot.slane %v5149_v44, 2  ;;  %v3917_v4 = vrot.slane %v3915_v47, 4  ;;  %v10632_v44 = vld [vmem:[#allocation2 + $0x4c] sm:$0xf]  ;;  %v5269_v47 = vrot.slane %v5134_v39, 4 }
 0x1d5   : > { %8000 = vmatmul.mubr.bf16.vlgmr.msra.gmra.mrb[36].mxu0 %v3736_v51  ;;  %v3747_v52 = vor.u32 %v3746_v3, %v3745_v15  ;;  %v10620_v15 = vld [vmem:[#allocation2 + $0x50] sm:$0xf]  ;;  %v10627_v3 = vld [vmem:[#allocation2 + $0x58] sm:$0xf] }
 0x1d6   : > { %8003 = vmatprep.mubr.bf16.mxu0 %v3740_v59  ;;  %8012 = vmatpush3.bf16.msra.mxu0 %v10049_v2  ;;  %v3753_v2 = vshll.u32 %v8940_v16, 16  ;;  %v3744_v20 = vsel %vm1745_vm5, %v3739_v17, %v3743_v5  ;;  %v5155_v41 = vor.u32 %v5154_v63, %v5151_v22  ;;  %v3914_v17 = vrot.slane %v3912_v1, 3  ;;  %v10661_v63 = vld [vmem:[#allocation2 + $0x64] sm:$0xf] }
 0x1d7   : > { %8238 = vmatpush3.bf16.msra.mxu1 %v10470_v37  ;;  %8013 = vmatprep.subr.bf16.mxu0 %v10063_v6  ;;  %v3904_v37 = vshrl.u32 %v6985_v10, 16  ;;  %v3748_v8 = vsel %vm1745_vm5, %v3743_v5, %v3747_v52  ;;  %v6987_v10 = vcombine.low %v10632_v44, %v10620_v15  ;;  %v5265_v22 = vrot.slane %v5125_v11, 4 }
 0x1d8   : > { %8239 = vmatprep.subr.bf16.mxu1 %v10492_v27  ;;  %v3755_v54 = vrot.slane %v3753_v2, 4  ;;  %v5156_v16 = vsel %vm1526_vm4, %v5146_v35, %v5155_v41  ;;  %v10630_v59 = vor.u32 %v3917_v4, %v3914_v17  ;;  %v5264_v2 = vrot.slane %v5122_v19, 3 }
 0x1d9   : > { %v3906_v61 = vrot.slane %v3904_v37, 3  ;;  %v3921_v5 = vshrl.u32 %v6987_v10, 16  ;;  %v10663_v37 = vld [vmem:[#allocation2 + $0x68] sm:$0xf]  ;;  %v5268_v1 = vrot.slane %v5131_v42, 3 }
 0x1da   : > { %8014 = vmatpush3.bf16.msra.mxu0 %v10063_v6  ;;  %8228 = vmatmul.mubr.bf16.gmra.mrb[28].mxu1 %v5138_v32  ;;  %v5251_v6 = vrot.slane %v5249_v31, 3  ;;  %v3756_v43 = vor.u32 %v3755_v54, %v3752_v49  ;;  %v9030_v32 = vld [vmem:[%s11652_s3 + $0xb0] sm:$0xff]   ;;  %v3924_v31 = vshll.u32 %v6987_v10, 16  ;;  %v9032_v49 = vld [vmem:[%s11652_s3 + $0xc0] sm:$0xff]  }
 0x1db   : > { %8231 = vmatprep.mubr.bf16.mxu1 %v5147_v12  ;;  %8240 = vmatpush3.bf16.msra.mxu1 %v10492_v27  ;;  %v10614_v27 = vor.u32 %v5257_v60, %v5256_v55  ;;  %v3910_v51 = vor.u32 %v3909_v62, %v3906_v61  ;;  %v6990_v12 = vcombine.low %v10661_v63, %v10663_v37  ;;  %v10676_v60 = vld [vmem:[#allocation2 + $0x70] sm:$0xf]  ;;  %v10696_v62 = vld [vmem:[#allocation2 + $0x6c] sm:$0xf] }
 0x1dc   : > { %8015 = vmatprep.subr.bf16.mxu0 %v10094_v57  ;;  %8241 = vmatprep.subr.bf16.mxu1 %v10503_v56  ;;  %v5255_v9 = vor.u32 %v5254_v7, %v5251_v6  ;;  %v3757_v25 = vsel %vm1745_vm5, %v3747_v52, %v3756_v43  ;;  %v5261_v52 = vrot.slane %v5116_v23, 4  ;;  %v3926_v23 = vrot.slane %v3924_v31, 4  ;;  %v10689_v7 = vld [vmem:[#allocation2 + $0x78] sm:$0xf] }
 0x1dd   : > { %8004 = vmatmul.mubr.bf16.gmra.mrb[40].mxu0 %v3744_v20  ;;  %v5266_v55 = vor.u32 %v5265_v22, %v5264_v2  ;;  %v10678_v20 = vld [vmem:[#allocation2 + $0x74] sm:$0xf]  ;;  %v5272_v6 = vrot.slane %v5140_v28, 3  ;;  %v3948_v39 = vshrl.u32 %v6990_v12, 16  ;;  %v3951_v61 = vshll.u32 %v6990_v12, 16 }
 0x1de   : > { %8007 = vmatprep.mubr.bf16.mxu0 %v3748_v8  ;;  %8016 = vmatpush3.bf16.msra.mxu0 %v10094_v57  ;;  %v5259_v57 = vsel %vm1745_vm5, %v5255_v9, %v10614_v27  ;;  %v5262_v19 = vor.u32 %v5261_v52, %v5260_v21  ;;  %v5384_v28 = vld [vmem:[#allocation2 + $0x6c] sm:$0x8]  ;;  %v7024_v17 = vcombine.low %v10678_v20, %v10689_v7  ;;  %v5277_v9 = vshrl.u32 %v8947_v30, 16 }
 0x1df   : > { %8242 = vmatpush3.bf16.msra.mxu1 %v10503_v56  ;;  %8017 = vmatprep.subr.bf16.mxu0 %v10109_v53  ;;  %v10625_v56 = vld [vmem:[#allocation2 + $0x54] sm:$0xf]  ;;  %v5270_v4 = vor.u32 %v5269_v47, %v5268_v1  ;;  %v3953_v10 = vrot.slane %v3951_v61, 4  ;;  %v10723_v21 = vld [vmem:[%s11652_s3 + $0x108] sm:$0xff]   ;;  %v9038_v1 = vld [vmem:[%s11652_s3 + $0xd8] sm:$0xff]  }
 0x1e0   : > { %8243 = vmatprep.subr.bf16.mxu1 %v10524_v14  ;;  %v6988_v35 = vcombine.low %v10625_v56, %v10627_v3  ;;  %v5263_v24 = vsel %vm1745_vm5, %v10614_v27, %v5262_v19  ;;  %v5267_v0 = vsel %vm1745_vm5, %v5262_v19, %v5266_v55  ;;  %v5442_v31 = vshll.u32 %v7024_v17, 16  ;;  %v9040_v61 = vld [vmem:[%s11652_s3 + $0xe0] sm:$0xff]  }
 0x1e1   : > { %v5271_v52 = vsel %vm1745_vm5, %v5266_v55, %v5270_v4 }
 0x1e2   : > { %8018 = vmatpush3.bf16.msra.mxu0 %v10109_v53  ;;  %8232 = vmatmul.mubr.bf16.gmra.mrb[32].mxu1 %v5156_v16  ;;  %v9029_v53 = vld [vmem:[%s11652_s3 + $0xa8] sm:$0xff]   ;;  %v3930_v48 = vshrl.u32 %v6988_v35, 16  ;;  %v3933_v36 = vshll.u32 %v6988_v35, 16  ;;  %v5444_v12 = vrot.slane %v5442_v31, 4 }
 0x1e3   : > { %8244 = vmatpush3.bf16.msra.mxu1 %v10524_v14  ;;  %8251 = vmatprep.mubr.bf16.mxu1 %v5259_v57  ;;  %v3919_v14 = vsel %vm1745_vm5, %v3910_v51, %v10630_v59  ;;  %v9034_v16 = vld [vmem:[%s11652_s3 + $0xc8] sm:$0xff]  }
 0x1e4   : > { %8019 = vmatprep.subr.bf16.mxu0 %v10131_v18  ;;  %8245 = vmatprep.subr.bf16.mxu1 %v9029_v53  ;;  %v3932_v11 = vrot.slane %v3930_v48, 3  ;;  %v3935_v45 = vrot.slane %v3933_v36, 4  ;;  %v9036_v48 = vld [vmem:[%s11652_s3 + $0xd0] sm:$0xff]  }
 0x1e5   : > { %8008 = vmatmul.mubr.bf16.gmra.mrb[44].mxu0 %v3757_v25  ;;  %v6991_v25 = vcombine.low %v10696_v62, %v10696_v62 }
 0x1e6   : > { %8020 = vmatpush3.bf16.msra.mxu0 %v10131_v18  ;;  %8027 = vmatprep.mubr.bf16.mxu0 %v3919_v14  ;;  %v10654_v18 = vld [vmem:[#allocation2 + $0x60] sm:$0xf]  ;;  %v3936_v42 = vor.u32 %v3935_v45, %v3932_v11  ;;  %v5280_v14 = vshll.u32 %v8947_v30, 16  ;;  %v10737_v30 = vld [vmem:[%s11652_s3 + $0x110] sm:$0xff]  }
 0x1e7   : > { %8246 = vmatpush3.bf16.msra.mxu1 %v9029_v53  ;;  %8021 = vmatprep.subr.bf16.mxu0 %v10142_v13  ;;  %v6989_v26 = vcombine.low %v10666_v33, %v10654_v18  ;;  %v3950_v53 = vrot.slane %v3948_v39, 3  ;;  %v3957_v2 = vshrl.u32 %v6991_v25, 16  ;;  %v3960_v22 = vshll.u32 %v6991_v25, 16  ;;  %v10757_v39 = vld [vmem:[#allocation2 + $0x88] sm:$0xf] }
 0x1e8   : > { %8247 = vmatprep.subr.bf16.mxu1 %v9030_v32 }
 0x1e9   : > { %v3939_v8 = vshrl.u32 %v6989_v26, 16  ;;  %v3942_v41 = vshll.u32 %v6989_v26, 16  ;;  %v5282_v26 = vrot.slane %v5280_v14, 4  ;;  %v3959_v47 = vrot.slane %v3957_v2, 3  ;;  %v10796_v14 = vld [vmem:[#allocation2 + $0x98] sm:$0xf] }
 0x1ea   : > { %8022 = vmatpush3.bf16.msra.mxu0 %v10142_v13  ;;  %v3923_v13 = vrot.slane %v3921_v5, 3  ;;  %v5439_v5 = vshrl.u32 %v7024_v17, 16 }
 0x1eb   : > { %8248 = vmatpush3.bf16.msra.mxu1 %v9030_v32  ;;  %8023 = vmatprep.subr.bf16.mxu0 %v10155_v58  ;;  %v3941_v51 = vrot.slane %v3939_v8, 3  ;;  %v3944_v57 = vrot.slane %v3942_v41, 4  ;;  %v10747_v41 = vld [vmem:[#allocation2 + $0x80] sm:$0xf] }
 0x1ec   : > { %8249 = vmatprep.subr.bf16.mxu1 %v9031_v46  ;;  %v3927_v54 = vor.u32 %v3926_v23, %v3923_v13  ;;  %v3954_v13 = vor.u32 %v3953_v10, %v3950_v53  ;;  %v5279_v23 = vrot.slane %v5277_v9, 3  ;;  %v5441_v45 = vrot.slane %v5439_v5, 3  ;;  %v10786_v10 = vld [vmem:[#allocation2 + $0x90] sm:$0xf] }
 0x1ed   : > { %v3945_v36 = vor.u32 %v3944_v57, %v3941_v51  ;;  %v9042_v51 = vld [vmem:[%s11652_s3 + $0xe8] sm:$0xff]  }
 0x1ee   : > { %8024 = vmatpush3.bf16.msra.mxu0 %v10155_v58  ;;  %v5273_v58 = vrot.slane %v5143_v34, 4  ;;  %v7023_v34 = vcombine.low %v5384_v28, %v10676_v60  ;;  %v3928_v43 = vsel %vm1745_vm5, %v10630_v59, %v3927_v54  ;;  %v3937_v59 = vsel %vm1745_vm5, %v3927_v54, %v3936_v42 }
 0x1ef   : > { %8250 = vmatpush3.bf16.msra.mxu1 %v9031_v46  ;;  %8025 = vmatprep.subr.bf16.mxu0 %v10165_v38  ;;  %v3946_v55 = vsel %vm1745_vm5, %v3936_v42, %v3945_v36  ;;  %v10745_v8 = vor.u32 %v5444_v12, %v5441_v45  ;;  %v10755_v42 = vld [vmem:[#allocation2 + $0x84] sm:$0xf]  ;;  %v10818_v12 = vld [vmem:[#allocation2 + $0x9c] sm:$0xf] }
 0x1f0   : > { %8263 = vmatprep.subr.bf16.mxu1 %v9032_v49  ;;  %v10703_v27 = vor.u32 %v5273_v58, %v5272_v6  ;;  %v5431_v35 = vshrl.u32 %v7023_v34, 16  ;;  %v5434_v32 = vshll.u32 %v7023_v34, 16  ;;  %v3962_v6 = vrot.slane %v3960_v22, 4  ;;  %v10811_v22 = vld [vmem:[%s11652_s3 + $0x130] sm:$0xff]  }
 0x1f1   : > { %v3955_v58 = vsel %vm1745_vm5, %v3945_v36, %v3954_v13  ;;  %v7026_v9 = vcombine.low %v10755_v42, %v10757_v39 }
 0x1f2   : > { %8026 = vmatpush3.bf16.msra.mxu0 %v10165_v38  ;;  %8252 = vmatmul.mubr.bf16.vlgmr.msra.gmra.mrb[24].mxu1 %v5263_v24  ;;  %v10710_v38 = vld [vmem:[%s11652_s3 + $0x100] sm:$0xff]   ;;  %v5275_v46 = vsel %vm1745_vm5, %v5270_v4, %v10703_v27  ;;  %v5433_v19 = vrot.slane %v5431_v35, 3  ;;  %v5436_v11 = vrot.slane %v5434_v32, 4  ;;  %v10752_v24 = vld [vmem:[%s11652_s3 + $0x118] sm:$0xff]   ;;  %v3963_v28 = vor.u32 %v3962_v6, %v3959_v47  ;;  %v9044_v35 = vld [vmem:[%s11652_s3 + $0xf0] sm:$0xff]  }
 0x1f3   : > { %8255 = vmatprep.mubr.bf16.mxu1 %v5267_v0  ;;  %8264 = vmatpush3.bf16.msra.mxu1 %v9032_v49  ;;  %v5283_v49 = vor.u32 %v5282_v26, %v5279_v23  ;;  %v10762_v0 = vld [vmem:[#allocation2 + $0x7c] sm:$0xf]  ;;  %v5460_v53 = vshll.u32 %v7026_v9, 16  ;;  %v10801_v32 = vld [vmem:[#allocation2 + $0x8c] sm:$0xf] }
 0x1f4   : > { %8039 = vmatprep.subr.bf16.mxu0 %v10710_v38  ;;  %8265 = vmatprep.subr.bf16.mxu1 %v9034_v16  ;;  %v5437_v54 = vor.u32 %v5436_v11, %v5433_v19  ;;  %v7025_v17 = vcombine.low %v10762_v0, %v10747_v41 }
 0x1f5   : > { %8028 = vmatmul.mubr.bf16.vlgmr.msra.gmra.mrb[36].mxu0 %v3928_v43  ;;  %v5284_v34 = vsel %vm1745_vm5, %v10703_v27, %v5283_v49  ;;  %v3964_v43 = vsel %vm1745_vm5, %v3954_v13, %v3963_v28  ;;  %v10777_v27 = vld [vmem:[%s11652_s3 + $0x120] sm:$0xff]   ;;  %v5462_v36 = vrot.slane %v5460_v53, 4  ;;  %v6993_v28 = vcombine.low %v10587_v40, %v10632_v44  ;;  %v10850_v44 = vld [vmem:[%s11652_s3 + $0x148] sm:$0xff]  }
 0x1f6   : > { %8031 = vmatprep.mubr.bf16.mxu0 %v3937_v59  ;;  %8040 = vmatpush3.bf16.msra.mxu0 %v10710_v38  ;;  %v5446_v4 = vsel %vm1745_vm5, %v5437_v54, %v10745_v8  ;;  %v5448_v57 = vshrl.u32 %v7025_v17, 16  ;;  %v5451_v25 = vshll.u32 %v7025_v17, 16  ;;  %v5457_v59 = vshrl.u32 %v7026_v9, 16 }
 0x1f7   : > { %8266 = vmatpush3.bf16.msra.mxu1 %v9034_v16  ;;  %8041 = vmatprep.subr.bf16.mxu0 %v10723_v21  ;;  %v6992_v16 = vcombine.low %v10576_v29, %v10585_v50  ;;  %v10791_v29 = vld [vmem:[%s11652_s3 + $0x128] sm:$0xff]   ;;  %v10794_v50 = vld [vmem:[#allocation2 + $0x94] sm:$0xf] }
 0x1f8   : > { %8267 = vmatprep.subr.bf16.mxu1 %v9036_v48  ;;  %v5450_v5 = vrot.slane %v5448_v57, 3  ;;  %v5453_v31 = vrot.slane %v5451_v25, 4  ;;  %v7028_v2 = vcombine.low %v10794_v50, %v10796_v14  ;;  %v10860_v57 = vld [vmem:[#allocation2 + $0x48] sm:$0xff]   ;;  %v10865_v25 = vld [vmem:[%s11652_s3 + $0x150] sm:$0xff]  }
 0x1fa   : > { %8042 = vmatpush3.bf16.msra.mxu0 %v10723_v21  ;;  %8256 = vmatmul.mubr.bf16.gmra.mrb[28].mxu1 %v5271_v52  ;;  %v7027_v52 = vcombine.low %v10801_v32, %v10786_v10  ;;  %v5454_v13 = vor.u32 %v5453_v31, %v5450_v5  ;;  %v5475_v11 = vshrl.u32 %v7028_v2, 16  ;;  %v5478_v45 = vshll.u32 %v7028_v2, 16  ;;  %v10884_v31 = vpop.permute.xlu0 %3330  ;;  %v10917_v2 = vpop.permute.xlu1 %3335 }
 0x1fb   : > { %8259 = vmatprep.mubr.bf16.mxu1 %v5275_v46  ;;  %8268 = vmatpush3.bf16.msra.mxu1 %v9036_v48  ;;  %v5459_v48 = vrot.slane %v5457_v59, 3  ;;  %v9046_v46 = vld [vmem:[%s11652_s3 + $0xf8] sm:$0xff]   ;;  %v6996_v59 = vcombine.low %v10654_v18, %v10661_v63  ;;  %v4223_v18 = vshll.u32 %v10860_v57, 16 }
 0x1fc   : > { %8043 = vmatprep.subr.bf16.mxu0 %v10737_v30  ;;  %8269 = vmatprep.subr.bf16.mxu1 %v9038_v1  ;;  %v5466_v23 = vshrl.u32 %v7027_v52, 16  ;;  %v5469_v26 = vshll.u32 %v7027_v52, 16  ;;  %v5477_v54 = vrot.slane %v5475_v11, 3  ;;  %v4227_v11 = vshrl.u32 %v10860_v57, 16  ;;  %v10974_v57 = vld [vmem:[#allocation2 + $0x50] sm:$0xff]  }
 0x1fd   : > { %8032 = vmatmul.mubr.bf16.gmra.mrb[40].mxu0 %v3946_v55  ;;  %v5463_v19 = vor.u32 %v5462_v36, %v5459_v48  ;;  %v10823_v55 = vld [vmem:[%s11652_s3 + $0x138] sm:$0xff]   ;;  %v4225_v52 = vrot.slane %v4223_v18, 1  ;;  %v10893_v48 = vld [vmem:[%s11652_s3 + $0x160] sm:$0xff]  }
 0x1fe   : > { %8035 = vmatprep.mubr.bf16.mxu0 %v3955_v58  ;;  %8044 = vmatpush3.bf16.msra.mxu0 %v10737_v30  ;;  %v5468_v47 = vrot.slane %v5466_v23, 3  ;;  %v5471_v6 = vrot.slane %v5469_v26, 4  ;;  %v7029_v58 = vcombine.low %v10818_v12, %v10818_v12  ;;  %v8968_v36 = vld [vmem:[#allocation2 + $0x58] sm:$0xff]  }
 0x1ff   : > { %8270 = vmatpush3.bf16.msra.mxu1 %v9038_v1  ;;  %8045 = vmatprep.subr.bf16.mxu0 %v10752_v24  ;;  %v5455_v1 = vsel %vm1745_vm5, %v10745_v8, %v5454_v13  ;;  %v5464_v49 = vsel %vm1745_vm5, %v5454_v13, %v5463_v19  ;;  %v10839_v8 = vld [vmem:[%s11652_s3 + $0x140] sm:$0xff]  }
 0x200   : > { %8271 = vmatprep.subr.bf16.mxu1 %v9040_v61  ;;  %v5472_v17 = vor.u32 %v5471_v6, %v5468_v47  ;;  %v5487_v9 = vshll.u32 %v7029_v58, 16  ;;  %v8971_v13 = vld [vmem:[#allocation2 + $0x60] sm:$0xff]   ;;  %v10936_v6 = vpop.permute.xlu1 %4862 }
 0x201   : > { %v4247_v47 = vshll.u32 %v8971_v13, 16 }
 0x202   : > { %8046 = vmatpush3.bf16.msra.mxu0 %v10752_v24  ;;  %8260 = vmatmul.mubr.bf16.gmra.mrb[32].mxu1 %v5284_v34  ;;  %v6994_v34 = vcombine.low %v10620_v15, %v10625_v56  ;;  %v5473_v15 = vsel %vm1745_vm5, %v5463_v19, %v5472_v17  ;;  %v4239_v19 = vshll.u32 %v8968_v36, 16 }
 0x203   : > { %8272 = vmatpush3.bf16.msra.mxu1 %v9040_v61  ;;  %8279 = vmatprep.mubr.bf16.mxu1 %v5446_v4  ;;  %v5480_v61 = vrot.slane %v5478_v45, 4  ;;  %v5484_v4 = vshrl.u32 %v7029_v58, 16  ;;  %v7031_v45 = vcombine.low %v10689_v7, %v10762_v0  ;;  %v4229_v58 = vor.u32 %v4227_v11, %v4225_v52 }
 0x204   : > { %8047 = vmatprep.subr.bf16.mxu0 %v10777_v27  ;;  %8273 = vmatprep.subr.bf16.mxu1 %v9042_v51 }
 0x205   : > { %8036 = vmatmul.mubr.bf16.gmra.mrb[44].mxu0 %v3964_v43  ;;  %v5481_v40 = vor.u32 %v5480_v61, %v5477_v54  ;;  %v5486_v56 = vrot.slane %v5484_v4, 3  ;;  %v5489_v43 = vrot.slane %v5487_v9, 4  ;;  %v4241_v54 = vrot.slane %v4239_v19, 1  ;;  %v10940_v61 = vld [vmem:[#allocation2 + $0x68] sm:$0xff]  }
 0x206   : > { %8048 = vmatpush3.bf16.msra.mxu0 %v10777_v27  ;;  %8055 = vmatprep.mubr.bf16.mxu0 %v6992_v16  ;;  %v10960_v4 = vld [vmem:[%s11652_s3 + $0x188] sm:$0xff]   ;;  %v4251_v9 = vshrl.u32 %v8971_v13, 16 }
 0x207   : > { %8274 = vmatpush3.bf16.msra.mxu1 %v9042_v51  ;;  %8049 = vmatprep.subr.bf16.mxu0 %v10791_v29  ;;  %v5482_v51 = vsel %vm1745_vm5, %v5472_v17, %v5481_v40  ;;  %v5490_v53 = vor.u32 %v5489_v43, %v5486_v56  ;;  %v7033_v56 = vcombine.low %v10757_v39, %v10801_v32  ;;  %v10970_v43 = vld [vmem:[#allocation2 + $0x78] sm:$0xff]  }
 0x208   : > { %8275 = vmatprep.subr.bf16.mxu1 %v9044_v35  ;;  %v5750_v18 = vshll.u32 %v10970_v43, 16 }
 0x209   : > { %v5491_v63 = vsel %vm1745_vm5, %v5481_v40, %v5490_v53 }
 0x20a   : > { %8050 = vmatpush3.bf16.msra.mxu0 %v10791_v29 }
 0x20b   : > { %8276 = vmatpush3.bf16.msra.mxu1 %v9044_v35  ;;  %8051 = vmatprep.subr.bf16.mxu0 %v10811_v22  ;;  %v7030_v35 = vcombine.low %v10676_v60, %v10678_v20  ;;  %v8967_v20 = vld [vmem:[#allocation2 + $0x50] sm:$0xff]  }
 0x20c   : > { %8277 = vmatprep.subr.bf16.mxu1 %v9046_v46  ;;  %v4235_v26 = vshrl.u32 %v8967_v20, 16 }
 0x20e   : > { %8052 = vmatpush3.bf16.msra.mxu0 %v10811_v22 }
 0x20f   : > { %8278 = vmatpush3.bf16.msra.mxu1 %v9046_v46  ;;  %8053 = vmatprep.subr.bf16.mxu0 %v10823_v55 }
 0x210   : > { %8291 = vmatprep.subr.bf16.mxu1 %v10710_v38 }
 0x212   : > { %8054 = vmatpush3.bf16.msra.mxu0 %v10823_v55  ;;  %8280 = vmatmul.mubr.bf16.vlgmr.msra.gmra.mrb[24].mxu1 %v5455_v1  ;;  %v7032_v1 = vcombine.low %v10747_v41, %v10755_v42  ;;  %v10948_v41 = vld [vmem:[%s11652_s3 + $0x180] sm:$0xff]   ;;  %v4366_v42 = vld [vmem:[#allocation2 + $0x48] sm:$0xf] }
 0x213   : > { %8283 = vmatprep.mubr.bf16.mxu1 %v5464_v49  ;;  %8292 = vmatpush3.bf16.msra.mxu1 %v10710_v38  ;;  %v8963_v38 = vld [vmem:[#allocation2 + $0x40] sm:$0xff]   ;;  %v8974_v49 = vld [vmem:[#allocation2 + $0x70] sm:$0xff]  }
 0x214   : > { %8067 = vmatprep.subr.bf16.mxu0 %v10839_v8  ;;  %8293 = vmatprep.subr.bf16.mxu1 %v10723_v21  ;;  %v4218_v16 = vshll.u32 %v8963_v38, 16  ;;  %v5745_v17 = vshll.u32 %v8974_v49, 16 }
 0x215   : > { %8056 = vmatmul.mubr.bf16.vlgmr.msra.gmra.mrb[36].mxu0 %v6993_v28  ;;  %v10952_v28 = vld [vmem:[#allocation2 + $0x4c] sm:$0xf] }
 0x216   : > { %8059 = vmatprep.mubr.bf16.mxu0 %v6994_v34  ;;  %8068 = vmatpush3.bf16.msra.mxu0 %v10839_v8  ;;  %v4249_v34 = vrot.slane %v4247_v47, 1  ;;  %v7005_v40 = vcombine.low %v4366_v42, %v10952_v28 }
 0x217   : > { %8294 = vmatpush3.bf16.msra.mxu1 %v10723_v21  ;;  %8069 = vmatprep.subr.bf16.mxu0 %v10850_v44  ;;  %v6995_v21 = vcombine.low %v10627_v3, %v10666_v33  ;;  %v10876_v3 = vld [vmem:[%s11652_s3 + $0x158] sm:$0xff]   ;;  %v4216_v33 = vshrl.u32 %v8963_v38, 16  ;;  %v4255_v38 = vshll.u32 %v10940_v61, 16 }
 0x218   : > { %8295 = vmatprep.subr.bf16.mxu1 %v10737_v30  ;;  %v4415_v32 = vshll.u32 %v7005_v40, 16 }
 0x219   : > { %v4257_v39 = vrot.slane %v4255_v38, 1 }
 0x21a   : > { %8070 = vmatpush3.bf16.msra.mxu0 %v10850_v44  ;;  %8284 = vmatmul.mubr.bf16.gmra.mrb[28].mxu1 %v5473_v15  ;;  %v10965_v15 = vpop.permute.xlu1 %4867 }
 0x21b   : > { %8287 = vmatprep.mubr.bf16.mxu1 %v5482_v51  ;;  %8296 = vmatpush3.bf16.msra.mxu1 %v10737_v30  ;;  %v4220_v30 = vrot.slane %v4218_v16, 1  ;;  %v8976_v16 = vld [vmem:[#allocation2 + $0x70] ss:$0 sps:$4 sm:$0x11]   ;;  %v7034_v51 = vcombine.low %v10786_v10, %v10794_v50  ;;  %v5743_v50 = vshrl.u32 %v8974_v49, 16  ;;  %v11030_v49 = vld [vmem:[%s11652_s3 + $0x1a8] sm:$0xff]  }
 0x21c   : > { %8071 = vmatprep.subr.bf16.mxu0 %v10865_v25  ;;  %8297 = vmatprep.subr.bf16.mxu1 %v10752_v24  ;;  %v10984_v10 = vld [vmem:[%s11652_s3 + $0x190] sm:$0xff]  }
 0x21d   : > { %8060 = vmatmul.mubr.bf16.gmra.mrb[40].mxu0 %v6995_v21  ;;  %v4221_v5 = vor.u32 %v4220_v30, %v4216_v33  ;;  %v4253_v21 = vor.u32 %v4251_v9, %v4249_v34  ;;  %v5747_v30 = vrot.slane %v5745_v17, 1  ;;  %v8983_v9 = vld [vmem:[#allocation2 + $0x90] sm:$0xff]  }
 0x21e   : > { %8063 = vmatprep.mubr.bf16.mxu0 %v6996_v59  ;;  %8072 = vmatpush3.bf16.msra.mxu0 %v10865_v25 }
 0x21f   : > { %8298 = vmatpush3.bf16.msra.mxu1 %v10752_v24  ;;  %8073 = vmatprep.subr.bf16.mxu0 %v10876_v3  ;;  %v6997_v24 = vcombine.low %v10663_v37, %v10696_v62  ;;  %v4226_v60 = vsel %vm2435_vm3, %v4221_v5, %v4225_v52  ;;  %v10903_v37 = vld [vmem:[%s11652_s3 + $0x168] sm:$0xff]   ;;  %v10906_v62 = vpop.permute.xlu0 %4857  ;;  %v10991_v5 = vpop.permute.xlu1 %6389  ;;  %v10998_v52 = vld [vmem:[%s11652_s3 + $0x198] sm:$0xff]  }
 0x220   : > { %8299 = vmatprep.subr.bf16.mxu1 %v10777_v27  ;;  %11676 = vst [vmem:[#allocation7_spill] sm:$0xff] %v10991_v5 }
 0x222   : > { %8074 = vmatpush3.bf16.msra.mxu0 %v10876_v3  ;;  %8288 = vmatmul.mubr.bf16.gmra.mrb[32].mxu1 %v5491_v63  ;;  %v4263_v63 = vshll.u32 %v8976_v16, 16 }
 0x223   : > { %8300 = vmatpush3.bf16.msra.mxu1 %v10777_v27  ;;  %8307 = vmatprep.mubr.bf16.mxu1 %v7030_v35  ;;  %v4231_v27 = vshll.u32 %v8967_v20, 16  ;;  %v10920_v23 = vpop.permute.xlu0 %3340  ;;  %v11663_v35 = vshll.u32 %v10974_v57, 16 }
 0x224   : > { %8075 = vmatprep.subr.bf16.mxu0 %v10893_v48  ;;  %8301 = vmatprep.subr.bf16.mxu1 %v10791_v29  ;;  %v4265_v13 = vrot.slane %v4263_v63, 1 }
 0x225   : > { %8064 = vmatmul.mubr.bf16.gmra.mrb[44].mxu0 %v6997_v24  ;;  %v4233_v46 = vrot.slane %v4231_v27, 1  ;;  %v5748_v24 = vor.u32 %v5747_v30, %v5743_v50  ;;  %v7035_v27 = vcombine.low %v10796_v14, %v10818_v12  ;;  %v11012_v12 = vpop.permute.xlu1 %4872  ;;  %v11076_v50 = vld [vmem:[#allocation2 + $0x68] sm:$0xff]  }
 0x226   : > { %8076 = vmatpush3.bf16.msra.mxu0 %v10893_v48  ;;  %8083 = vmatprep.mubr.bf16.mxu0 %v4226_v60  ;;  %v4417_v60 = vrot.slane %v4415_v32, 1 }
 0x227   : > { %8302 = vmatpush3.bf16.msra.mxu1 %v10791_v29  ;;  %8077 = vmatprep.subr.bf16.mxu0 %v10903_v37  ;;  %v10914_v29 = vld [vmem:[%s11652_s3 + $0x170] sm:$0xff]   ;;  %v10942_v7 = vpop.permute.xlu0 %6384  ;;  %v4234_v0 = vsel %vm2435_vm3, %v4229_v58, %v4233_v46 }
 0x228   : > { %8303 = vmatprep.subr.bf16.mxu1 %v10811_v22  ;;  %11675 = vst [vmem:[#allocation6_spill] sm:$0xff] %v10942_v7 }
 0x22a   : > { %8078 = vmatpush3.bf16.msra.mxu0 %v10903_v37 }
 0x22b   : > { %8304 = vmatpush3.bf16.msra.mxu1 %v10811_v22  ;;  %8079 = vmatprep.subr.bf16.mxu0 %v10914_v29  ;;  %v10927_v22 = vld [vmem:[%s11652_s3 + $0x178] sm:$0xff]   ;;  %v10976_v59 = vpop.permute.xlu0 %3345 }
 0x22c   : > { %8305 = vmatprep.subr.bf16.mxu1 %v10823_v55 }
 0x22e   : > { %8080 = vmatpush3.bf16.msra.mxu0 %v10914_v29 }
 0x22f   : > { %8306 = vmatpush3.bf16.msra.mxu1 %v10823_v55  ;;  %8081 = vmatprep.subr.bf16.mxu0 %v10927_v22  ;;  %v4237_v55 = vor.u32 %v4235_v26, %v4233_v46  ;;  %v11001_v20 = vpop.permute.xlu0 %6394  ;;  %v4259_v46 = vshrl.u32 %v10940_v61, 16  ;;  %v4422_v26 = vrot.slane %v11663_v35, 1 }
 0x230   : > { %8319 = vmatprep.subr.bf16.mxu1 %v10839_v8  ;;  %11677 = vst [vmem:[#allocation8_spill] sm:$0xff] %v11001_v20 }
 0x231   : > { %v4261_v11 = vor.u32 %v4259_v46, %v4257_v39 }
 0x232   : > { %8082 = vmatpush3.bf16.msra.mxu0 %v10927_v22  ;;  %8308 = vmatmul.mubr.bf16.vlgmr.msra.gmra.mrb[24].mxu1 %v7031_v45  ;;  %v8979_v45 = vld [vmem:[#allocation2 + $0x80] sm:$0xff]  }
 0x233   : > { %8311 = vmatprep.mubr.bf16.mxu1 %v7032_v1  ;;  %8320 = vmatpush3.bf16.msra.mxu1 %v10839_v8  ;;  %v4242_v8 = vsel %vm2435_vm3, %v4237_v55, %v4241_v54  ;;  %v4266_v1 = vsel %vm2435_vm3, %v4261_v11, %v4265_v13  ;;  %v11018_v55 = vld [vmem:[%s11652_s3 + $0x1a0] sm:$0xff]   ;;  %v11023_v58 = vpop.permute.xlu0 %4877  ;;  %v5762_v16 = vshrl.u32 %v8979_v45, 16 }
 0x234   : > { %8095 = vmatprep.subr.bf16.mxu0 %v10948_v41  ;;  %8321 = vmatprep.subr.bf16.mxu1 %v10850_v44 }
 0x235   : > { %8084 = vmatmul.mubr.bf16.vlgmr.msra.gmra.mrb[36].mxu0 %v4234_v0  ;;  %v11038_v0 = vld [vmem:[#allocation2 + $0x88] sm:$0xff]  }
 0x236   : > { %8087 = vmatprep.mubr.bf16.mxu0 %v4242_v8  ;;  %8096 = vmatpush3.bf16.msra.mxu0 %v10948_v41  ;;  %v11042_v8 = vld [vmem:[#allocation2 + $0x60] sm:$0xff]  }
 0x237   : > { %8322 = vmatpush3.bf16.msra.mxu1 %v10850_v44  ;;  %8097 = vmatprep.subr.bf16.mxu0 %v10960_v4  ;;  %v4243_v44 = vshrl.u32 %v8968_v36, 16  ;;  %v5752_v36 = vrot.slane %v5750_v18, 1  ;;  %v11689_v7 = vrot.slane %v11042_v8, 1 }
 0x238   : > { %8323 = vmatprep.subr.bf16.mxu1 %v10865_v25 }
 0x239   : > { %v4245_v53 = vor.u32 %v4243_v44, %v4241_v54  ;;  %v5753_v19 = vsel %vm2435_vm3, %v5748_v24, %v5752_v36  ;;  %v11033_v54 = vld [vmem:[#allocation2 + $0x58] sm:$0xff]   ;;  %v11059_v44 = vpop.permute.xlu0 %3355 }
 0x23a   : > { %8098 = vmatpush3.bf16.msra.mxu0 %v10960_v4  ;;  %8312 = vmatmul.mubr.bf16.gmra.mrb[28].mxu1 %v7033_v56  ;;  %v11660_v56 = vshll.u32 %v11033_v54, 16  ;;  %v11085_v24 = vld [vmem:[#allocation2 + $0x98] sm:$0xff]   ;;  %v11661_v46 = vshrl.u32 %v11033_v54, 16 }
 0x23b   : > { %8315 = vmatprep.mubr.bf16.mxu1 %v7034_v51  ;;  %8324 = vmatpush3.bf16.msra.mxu1 %v10865_v25  ;;  %v4250_v33 = vsel %vm2435_vm3, %v4245_v53, %v4249_v34  ;;  %v4258_v25 = vsel %vm2435_vm3, %v4253_v21, %v4257_v39  ;;  %v5766_v51 = vshll.u32 %v11038_v0, 16  ;;  %v5754_v21 = vshrl.u32 %v10970_v43, 16 }
 0x23c   : > { %8099 = vmatprep.subr.bf16.mxu0 %v10984_v10  ;;  %8325 = vmatprep.subr.bf16.mxu1 %v10876_v3  ;;  %v11665_v53 = vshrl.u32 %v10974_v57, 16  ;;  %v5774_v39 = vshll.u32 %v8983_v9, 16  ;;  %v4430_v43 = vrot.slane %v11660_v56, 1 }
 0x23d   : > { %8088 = vmatmul.mubr.bf16.gmra.mrb[40].mxu0 %v4250_v33  ;;  %v5756_v32 = vor.u32 %v5754_v21, %v5752_v36  ;;  %v11071_v33 = vld [vmem:[%s11652_s3 + $0x1b8] sm:$0xff]   ;;  %v5782_v21 = vshll.u32 %v11085_v24, 16 }
 0x23e   : > { %8091 = vmatprep.mubr.bf16.mxu0 %v4258_v25  ;;  %8100 = vmatpush3.bf16.msra.mxu0 %v10984_v10  ;;  %v4426_v63 = vor.u32 %v11665_v53, %v4422_v26 }
 0x23f   : > { %8326 = vmatpush3.bf16.msra.mxu1 %v10876_v3  ;;  %8101 = vmatprep.subr.bf16.mxu0 %v10998_v52  ;;  %v4413_v3 = vshrl.u32 %v7005_v40, 16  ;;  %v11055_v40 = vld [vmem:[%s11652_s3 + $0x1b0] sm:$0xff]  }
 0x240   : > { %8327 = vmatprep.subr.bf16.mxu1 %v10893_v48 }
 0x241   : > { %v4418_v14 = vor.u32 %v4417_v60, %v4413_v3  ;;  %v5893_v60 = vld [vmem:[#allocation2 + $0x78] sm:$0xf]  ;;  %v11093_v3 = vld [vmem:[#allocation2 + $0x70] sm:$0xff]  }
 0x242   : > { %8102 = vmatpush3.bf16.msra.mxu0 %v10998_v52  ;;  %8316 = vmatmul.mubr.bf16.gmra.mrb[32].mxu1 %v7035_v27 }
 0x243   : > { %8328 = vmatpush3.bf16.msra.mxu1 %v10893_v48  ;;  %8335 = vmatprep.mubr.bf16.mxu1 %v5753_v19  ;;  %v4423_v47 = vsel %vm2435_vm3, %v4418_v14, %v4422_v26  ;;  %v5758_v48 = vshll.u32 %v8979_v45, 16  ;;  %v11095_v26 = vld [vmem:[#allocation2 + $0x7c] sm:$0xf]  ;;  %v11097_v19 = vpop.permute.xlu0 %6404  ;;  %v5776_v14 = vrot.slane %v5774_v39, 1  ;;  %v5770_v39 = vshrl.u32 %v11038_v0, 16 }
 0x244   : > { %8103 = vmatprep.subr.bf16.mxu0 %v11018_v55  ;;  %8329 = vmatprep.subr.bf16.mxu1 %v10903_v37  ;;  %11679 = vst [vmem:[#allocation10_spill] sm:$0xff] %v11097_v19 }
 0x245   : > { %8092 = vmatmul.mubr.bf16.gmra.mrb[44].mxu0 %v4266_v1  ;;  %v5760_v17 = vrot.slane %v5758_v48, 1  ;;  %v11662_v48 = vshll.u32 %v11076_v50, 16 }
 0x246   : > { %8104 = vmatpush3.bf16.msra.mxu0 %v11018_v55  ;;  %8111 = vmatprep.mubr.bf16.mxu0 %v4423_v47  ;;  %v4434_v47 = vor.u32 %v11661_v46, %v4430_v43 }
 0x247   : > { %8330 = vmatpush3.bf16.msra.mxu1 %v10903_v37  ;;  %8105 = vmatprep.subr.bf16.mxu0 %v11030_v49  ;;  %v11044_v37 = vpop.permute.xlu1 %3350  ;;  %v5764_v30 = vor.u32 %v5762_v16, %v5760_v17  ;;  %v5761_v36 = vsel %vm2435_vm3, %v5756_v32, %v5760_v17  ;;  %v4431_v17 = vsel %vm2435_vm3, %v4426_v63, %v4430_v43  ;;  %v11113_v16 = vld [vmem:[%s11652_s3 + $0x1c0] sm:$0xff]   ;;  %v11666_v32 = vshll.u32 %v11093_v3, 16 }
 0x248   : > { %v11035_v61 = vpop.f32.mrb[24].mxu0  ;;  %8331 = vmatprep.subr.bf16.mxu1 %v10914_v29  ;;  %v8987_v43 = vld [vmem:[#allocation2 + $0xa0] ss:$0 sps:$4 sm:$0x11]  }
 0x249   : > { %v11040_v42 = vpop.f32.mrb[25].mxu0 }
 0x24a   : > { %v11046_v34 = vpop.f32.mrb[26].mxu0  ;;  %8106 = vmatpush3.bf16.msra.mxu0 %v11030_v49 }
 0x24b   : > { %v11049_v38 = vpop.f32.mrb[27].mxu0  ;;  %8332 = vmatpush3.bf16.msra.mxu1 %v10914_v29  ;;  %8107 = vmatprep.subr.bf16.mxu0 %v11055_v40  ;;  %v11659_v29 = vshll.u32 %v11042_v8, 16  ;;  %v11078_v18 = vpop.permute.xlu1 %6399 }
 0x24c   : > { %8333 = vmatprep.subr.bf16.mxu1 %v10927_v22  ;;  %11678 = vst [vmem:[#allocation9_spill] sm:$0xff] %v11078_v18  ;;  %v11668_v18 = vshrl.u32 %v11093_v3, 16 }
 0x24d   : > { %v4438_v13 = vrot.slane %v11659_v29, 1 }
 0x24e   : > { %8108 = vmatpush3.bf16.msra.mxu0 %v11055_v40 }
 0x24f   : > { %8334 = vmatpush3.bf16.msra.mxu1 %v10927_v22  ;;  %8109 = vmatprep.subr.bf16.mxu0 %v11071_v33  ;;  %v5768_v22 = vrot.slane %v5766_v51, 1  ;;  %v5778_v51 = vshrl.u32 %v8983_v9, 16  ;;  %v11124_v63 = vpop.permute.xlu1 %4882  ;;  %v11664_v9 = vshrl.u32 %v11042_v8, 16 }
 0x250   : > { %v11082_v25 = vpop.f32.mrb[28].mxu0  ;;  %8347 = vmatprep.subr.bf16.mxu1 %v10948_v41  ;;  %11680 = vst [vmem:[#allocation11_spill] sm:$0xff] %v11124_v63 }
 0x251   : > { %v11087_v27 = vpop.f32.mrb[29].mxu0  ;;  %v5769_v45 = vsel %vm2435_vm3, %v5764_v30, %v5768_v22  ;;  %v4439_v30 = vsel %vm2435_vm3, %v4434_v47, %v4438_v13  ;;  %v5772_v0 = vor.u32 %v5770_v39, %v5768_v22  ;;  %v4446_v47 = vrot.slane %v11662_v48, 1 }
 0x252   : > { %v11099_v11 = vpop.f32.mrb[30].mxu0  ;;  %8110 = vmatpush3.bf16.msra.mxu0 %v11071_v33  ;;  %8336 = vmatmul.mubr.bf16.vlgmr.msra.gmra.mrb[24].mxu1 %v5761_v36  ;;  %v5780_v36 = vor.u32 %v5778_v51, %v5776_v14  ;;  %v11667_v22 = vshrl.u32 %v11076_v50, 16  ;;  %v4454_v39 = vrot.slane %v11666_v32, 1  ;;  %v5790_v48 = vshll.u32 %v8987_v43, 16 }
 0x253   : > { %v11103_v1 = vpop.f32.mrb[31].mxu0  ;;  %8339 = vmatprep.mubr.bf16.mxu1 %v5769_v45  ;;  %8348 = vmatpush3.bf16.msra.mxu1 %v10948_v41  ;;  %v11119_v41 = vcombine.low %v5893_v60, %v11095_v26  ;;  %v11128_v45 = vld [vmem:[#allocation2 + $0x80] sm:$0xff]   ;;  %v11134_v60 = vld [vmem:[%s11652_s3 + $0x1c8] sm:$0xff]   ;;  %v5777_v46 = vsel %vm2435_vm3, %v5772_v0, %v5776_v14  ;;  %v5786_v43 = vshrl.u32 %v11085_v24, 16  ;;  %v11166_v0 = vpop.permute.xlu1 %3360 }
 0x254   : > { %8123 = vmatprep.subr.bf16.mxu0 %v11113_v16  ;;  %8349 = vmatprep.subr.bf16.mxu1 %v10960_v4  ;;  %v4450_v14 = vor.u32 %v11667_v22, %v4446_v47  ;;  %v5792_v24 = vrot.slane %v5790_v48, 1  ;;  %v11189_v48 = vld [vmem:[%s11652_s3 + $0x1d8] sm:$0xff]  }
 0x255   : > { %8112 = vmatmul.mubr.bf16.vlgmr.msra.gmra.mrb[36].mxu0 %v4431_v17  ;;  %v11139_v17 = vpop.permute.xlu0 %4887  ;;  %v5942_v29 = vshll.u32 %v11119_v41, 16 }
 0x256   : > { %8115 = vmatprep.mubr.bf16.mxu0 %v4439_v30  ;;  %8124 = vmatpush3.bf16.msra.mxu0 %v11113_v16  ;;  %11681 = vst [vmem:[#allocation12_spill] sm:$0xff] %v11139_v17  ;;  %v5784_v30 = vrot.slane %v5782_v21, 1  ;;  %v4455_v32 = vsel %vm2435_vm3, %v4450_v14, %v4454_v39  ;;  %v11198_v14 = vld [vmem:[#allocation2 + $0x88] sm:$0xff]  }
 0x257   : > { %8350 = vmatpush3.bf16.msra.mxu1 %v10960_v4  ;;  %8125 = vmatprep.subr.bf16.mxu0 %v11134_v60  ;;  %v4442_v4 = vor.u32 %v11664_v9, %v4438_v13  ;;  %v11158_v9 = vld [vmem:[#allocation2 + $0x78] ss:$0 sps:$4 sm:$0x11]  }
 0x258   : > { %v11141_v51 = vpop.f32.mrb[32].mxu0  ;;  %8351 = vmatprep.subr.bf16.mxu1 %v10984_v10  ;;  %v5785_v21 = vsel %vm2435_vm3, %v5780_v36, %v5784_v30  ;;  %v11172_v36 = vld [vmem:[%s11652_s3 + $0x1d0] sm:$0xff]   ;;  %v5788_v22 = vor.u32 %v5786_v43, %v5784_v30  ;;  %v4458_v30 = vor.u32 %v11668_v18, %v4454_v39  ;;  %v4568_v43 = vrot.slane %v10974_v57, 1 }
 0x259   : > { %v11147_v56 = vpop.f32.mrb[33].mxu0  ;;  %v11177_v13 = vpop.permute.xlu0 %3365 }
 0x25a   : > { %v11153_v35 = vpop.f32.mrb[34].mxu0  ;;  %8126 = vmatpush3.bf16.msra.mxu0 %v11134_v60  ;;  %8340 = vmatmul.mubr.bf16.gmra.mrb[28].mxu1 %v5777_v46  ;;  %v4447_v46 = vsel %vm2435_vm3, %v4442_v4, %v4446_v47  ;;  %v5940_v47 = vshrl.u32 %v11119_v41, 16  ;;  %v11682_v4 = vshll.u32 %v11128_v45, 16 }
 0x25b   : > { %v11160_v53 = vpop.f32.mrb[35].mxu0  ;;  %8343 = vmatprep.mubr.bf16.mxu1 %v5785_v21  ;;  %8352 = vmatpush3.bf16.msra.mxu1 %v10984_v10  ;;  %v5944_v21 = vrot.slane %v5942_v29, 1  ;;  %v4563_v10 = vld [vmem:[#allocation2 + $0x48] sm:$0xe]  ;;  %v4460_v29 = vshll.u32 %v11158_v9, 16 }
 0x25c   : > { %8127 = vmatprep.subr.bf16.mxu0 %v11172_v36  ;;  %8353 = vmatprep.subr.bf16.mxu1 %v10998_v52  ;;  %v5949_v19 = vrot.slane %v11682_v4, 1  ;;  %v11219_v4 = vld [vmem:[#allocation2 + $0x90] sm:$0xff]  }
 0x25d   : > { %8116 = vmatmul.mubr.bf16.gmra.mrb[40].mxu0 %v4447_v46  ;;  %v5945_v41 = vor.u32 %v5944_v21, %v5940_v47  ;;  %v11202_v46 = vpop.permute.xlu1 %6409  ;;  %v11208_v39 = vpop.permute.xlu0 %6414 }
 0x25e   : > { %8119 = vmatprep.mubr.bf16.mxu0 %v4455_v32  ;;  %8128 = vmatpush3.bf16.msra.mxu0 %v11172_v36  ;;  %v11193_v32 = vcombine.low %v4563_v10, %v10952_v28  ;;  %11683 = vst [vmem:[#allocation13_spill] sm:$0xff] %v11202_v46  ;;  %v4462_v10 = vrot.slane %v4460_v29, 1  ;;  %11684 = vst [vmem:[#allocation14_spill] sm:$0xff] %v11208_v39 }
 0x25f   : > { %8354 = vmatpush3.bf16.msra.mxu1 %v10998_v52  ;;  %8129 = vmatprep.subr.bf16.mxu0 %v11189_v48  ;;  %v5793_v52 = vsel %vm2435_vm3, %v5788_v22, %v5792_v24  ;;  %v5950_v28 = vsel %vm2435_vm3, %v5945_v41, %v5949_v19  ;;  %v11214_v22 = vld [vmem:[%s11652_s3 + $0x1e0] sm:$0xff]  }
 0x260   : > { %8355 = vmatprep.subr.bf16.mxu1 %v11018_v55  ;;  %v4567_v21 = vrot.slane %v11193_v32, 1  ;;  %v4463_v47 = vsel %vm2435_vm3, %v4458_v30, %v4462_v10 }
 0x261   : > { %v11252_v20 = vpop.permute.xlu0 %4897 }
 0x262   : > { %8130 = vmatpush3.bf16.msra.mxu0 %v11189_v48  ;;  %8344 = vmatmul.mubr.bf16.gmra.mrb[32].mxu1 %v5793_v52  ;;  %v4569_v41 = vsel %vm2918_vm6, %v4567_v21, %v4568_v43  ;;  %v11227_v52 = vld [vmem:[%s11653_s4] ss:$0 sm:$0xff]  ;;  %v11240_v21 = vpop.permute.xlu1 %4892  ;;  %11687 = vst [vmem:[#allocation16_spill] sm:$0xff] %v11252_v20 }
 0x263   : > { %8356 = vmatpush3.bf16.msra.mxu1 %v11018_v55  ;;  %8363 = vmatprep.mubr.bf16.mxu1 %v5950_v28  ;;  %v11669_v55 = vshrl.u32 %v11128_v45, 16  ;;  %11685 = vst [vmem:[#allocation15_spill] sm:$0xff] %v11240_v21 }
 0x264   : > { %8131 = vmatprep.subr.bf16.mxu0 %v11214_v22  ;;  %8357 = vmatprep.subr.bf16.mxu1 %v11030_v49 }
 0x265   : > { %v7917_v29 = vpop.f32.mrb[12].mxu1  ;;  %8120 = vmatmul.mubr.bf16.gmra.mrb[44].mxu0 %v4463_v47  ;;  %v5953_v10 = vor.u32 %v11669_v55, %v5949_v19  ;;  %v11686_v19 = vshll.u32 %v11198_v14, 16 }
 0x266   : > { %v8451_v30 = vadd.f32 %v7917_v29, %v11035_v61  ;;  %v3226_v28 = vpop.f32.mrb[13].mxu1  ;;  %8132 = vmatpush3.bf16.msra.mxu0 %v11214_v22  ;;  %8139 = vmatprep.mubr.bf16.mxu0 %v4569_v41  ;;  %v11237_v61 = vld [vmem:[%s11652_s3 + $0x1e8] sm:$0xff]   ;;  %v11277_v21 = vpop.permute.xlu1 %3370 }
 0x267   : > { %v8452_v18 = vadd.f32 %v3226_v28, %v11040_v42  ;;  %v7918_v24 = vpop.f32.mrb[14].mxu1  ;;  %8358 = vmatpush3.bf16.msra.mxu1 %v11030_v49  ;;  %8133 = vmatprep.subr.bf16.mxu0 %v11237_v61  ;;  %v5957_v42 = vrot.slane %v11686_v19, 1  ;;  %v4570_v49 = vrot.slane %v11033_v54, 1 }
 0x268   : > { %v8453_v47 = vadd.f32 %v7918_v24, %v11046_v34  ;;  %v3229_v29 = vpop.f32.mrb[15].mxu1  ;;  %8359 = vmatprep.subr.bf16.mxu1 %v11055_v40  ;;  %v3294_v28 = vadd.f32 %v8451_v30, %v11227_v52  ;;  %v11670_v34 = vshrl.u32 %v11198_v14, 16  ;;  %v11256_v24 = vld [vmem:[#allocation2 + $0x98] sm:$0xff]   ;;  %v11688_v30 = vshll.u32 %v11219_v4, 16 }
 0x269   : > { %v3292_v55 = vadd.f32 %v8452_v18, %v11227_v52  ;;  %v8454_v39 = vadd.f32 %v3229_v29, %v11049_v38  ;;  %v11264_v38 = vld [vmem:[%s11652_s3 + $0x1f0] sm:$0xff]   ;;  %v5958_v18 = vsel %vm2435_vm3, %v5953_v10, %v5957_v42  ;;  %v4571_v46 = vsel %vm2918_vm6, %v4568_v43, %v4570_v49 }
 0x26a   : > { %8134 = vmatpush3.bf16.msra.mxu0 %v11237_v61  ;;  %v3295_v41 = vadd.f32 %v8453_v47, %v11227_v52  ;;  %v5965_v47 = vrot.slane %v11688_v30, 1  ;;  %v4573_v20 = vsel %vm2918_vm6, %v4570_v49, %v11689_v7  ;;  %v6090_v30 = vld [vmem:[#allocation2 + $0x78] sm:$0xe] }
 0x26b   : > { %v3304_v19 = vmax.f32 %v3292_v55, 0.0  ;;  %v3293_v5 = vadd.f32 %v8454_v39, %v11227_v52  ;;  %8360 = vmatpush3.bf16.msra.mxu1 %v11055_v40  ;;  %8135 = vmatprep.subr.bf16.mxu0 %v11264_v38  ;;  %v5961_v55 = vor.u32 %v11670_v34, %v5957_v42  ;;  %v3306_v39 = vmax.f32 %v3294_v28, 0.0  ;;  %v11283_v28 = vld [vmem:[#allocation2 + $0xa0] sm:$0xff]  }
 0x26c   : > { %8361 = vmatprep.subr.bf16.mxu1 %v11071_v33  ;;  %v11671_v42 = vshrl.u32 %v11219_v4, 16  ;;  %v3307_v34 = vmax.f32 %v3295_v41, 0.0 }
 0x26d   : > { %v3305_v29 = vmax.f32 %v3293_v5, 0.0  ;;  %v7921_v40 = vpop.f32.mrb[16].mxu1  ;;  %v3388_v43 = vmul.f32 %v10884_v31, %v3304_v19 }
 0x26e   : > { %v8455_v17 = vadd.f32 %v7921_v40, %v11082_v25  ;;  %v3242_v10 = vpop.f32.mrb[17].mxu1  ;;  %8136 = vmatpush3.bf16.msra.mxu0 %v11264_v38  ;;  %v11293_v25 = vld [vmem:[%s11652_s3 + $0x1f8] sm:$0xff]   ;;  %v11296_v40 = vpop.permute.xlu0 %3375 }
 0x26f   : > { %v3389_v7 = vmul.f32 %v10917_v2, %v3305_v29  ;;  %v8456_v49 = vadd.f32 %v3242_v10, %v11087_v27  ;;  %v7922_v63 = vpop.f32.mrb[18].mxu1  ;;  %8362 = vmatpush3.bf16.msra.mxu1 %v11071_v33  ;;  %8137 = vmatprep.subr.bf16.mxu0 %v11293_v25  ;;  %v5966_v2 = vsel %vm2435_vm3, %v5961_v55, %v5965_v47  ;;  %v5979_v55 = vshll.u32 %v11283_v28, 16 }
 0x270   : > { %v3298_v5 = vadd.f32 %v8455_v17, %v11227_v52  ;;  %v8457_v31 = vadd.f32 %v7922_v63, %v11099_v11  ;;  %v3245_v41 = vpop.f32.mrb[19].mxu1  ;;  %8375 = vmatprep.subr.bf16.mxu1 %v11113_v16  ;;  %v5969_v33 = vor.u32 %v11671_v42, %v5965_v47  ;;  %v3390_v27 = vmul.f32 %v10920_v23, %v3306_v39  ;;  %v11313_v42 = vld [vmem:[#allocation2 + $0xa8] ss:$0 sps:$4 sm:$0x11]  }
 0x271   : > { %v3400_v19 = vadd.f32 %v3389_v7, %v3388_v43  ;;  %v3296_v29 = vadd.f32 %v8456_v49, %v11227_v52  ;;  %v8458_v10 = vadd.f32 %v3245_v41, %v11103_v1  ;;  %v11690_v11 = vshll.u32 %v11256_v24, 16  ;;  %v11318_v7 = vpop.permute.xlu1 %6419  ;;  %v11323_v49 = vld [vmem:[%s11652_s3 + $0x200] sm:$0xff]  }
 0x272   : > { %v3299_v17 = vadd.f32 %v8457_v31, %v11227_v52  ;;  %8138 = vmatpush3.bf16.msra.mxu0 %v11293_v25  ;;  %8364 = vmatmul.mubr.bf16.vlgmr.msra.gmra.mrb[24].mxu1 %v5958_v18  ;;  %v4574_v47 = vrot.slane %v11076_v50, 1  ;;  %v3391_v23 = vmul.f32 %v10976_v59, %v3307_v34  ;;  %v3310_v18 = vmax.f32 %v3298_v5, 0.0 }
 0x273   : > { %v5973_v63 = vrot.slane %v11690_v11, 1  ;;  %v3401_v39 = vadd.f32 %v3400_v19, %v3390_v27  ;;  %v3308_v43 = vmax.f32 %v3296_v29, 0.0  ;;  %v3297_v1 = vadd.f32 %v8458_v10, %v11227_v52  ;;  %8367 = vmatprep.mubr.bf16.mxu1 %v5966_v2  ;;  %8376 = vmatpush3.bf16.msra.mxu1 %v11113_v16  ;;  %v11335_v19 = vpop.permute.xlu0 %6424 }
 0x274   : > { %8151 = vmatprep.subr.bf16.mxu0 %v11323_v49  ;;  %8377 = vmatprep.subr.bf16.mxu1 %v11134_v60  ;;  %v5981_v59 = vrot.slane %v5979_v55, 1  ;;  %v4576_v34 = vrot.slane %v11093_v3, 1  ;;  %v11331_v31 = vcombine.low %v6090_v30, %v11095_v26  ;;  %v3311_v29 = vmax.f32 %v3299_v17, 0.0 }
 0x275   : > { %v3392_v16 = vmul.f32 %v11044_v37, %v3308_v43  ;;  %v3402_v5 = vadd.f32 %v3401_v39, %v3391_v23  ;;  %v3309_v41 = vmax.f32 %v3297_v1, 0.0  ;;  %v7925_v2 = vpop.f32.mrb[20].mxu1  ;;  %8140 = vmatmul.mubr.bf16.vlgmr.msra.gmra.mrb[36].mxu0 %v4571_v46  ;;  %v5974_v27 = vsel %vm2435_vm3, %v5969_v33, %v5973_v63 }
 0x276   : > { %v8459_v10 = vadd.f32 %v7925_v2, %v11141_v51  ;;  %v3258_v11 = vpop.f32.mrb[21].mxu1  ;;  %8143 = vmatprep.mubr.bf16.mxu0 %v4573_v20  ;;  %8152 = vmatpush3.bf16.msra.mxu0 %v11323_v49  ;;  %v11691_v26 = vshrl.u32 %v11256_v24, 16  ;;  %v5987_v37 = vshll.u32 %v11313_v42, 16  ;;  %v11348_v51 = vld [vmem:[%s11652_s3 + $0x208] sm:$0xff]   ;;  %v5983_v20 = vshrl.u32 %v11283_v28, 16 }
 0x277   : > { %v3403_v23 = vadd.f32 %v3402_v5, %v3392_v16  ;;  %v3393_v39 = vmul.f32 %v11059_v44, %v3309_v41  ;;  %v8460_v46 = vadd.f32 %v3258_v11, %v11147_v56  ;;  %v7926_v33 = vpop.f32.mrb[22].mxu1  ;;  %8378 = vmatpush3.bf16.msra.mxu1 %v11134_v60  ;;  %8153 = vmatprep.subr.bf16.mxu0 %v11348_v51  ;;  %v4684_v56 = vshrl.u32 %v11193_v32, 16  ;;  %v11360_v41 = vpop.permute.xlu1 %4902 }
 0x278   : > { %v5977_v30 = vor.u32 %v11691_v26, %v5973_v63  ;;  %v3394_v17 = vmul.f32 %v11166_v0, %v3310_v18  ;;  %v8461_v63 = vadd.f32 %v7926_v33, %v11153_v35  ;;  %v3261_v43 = vpop.f32.mrb[23].mxu1  ;;  %8379 = vmatprep.subr.bf16.mxu1 %v11172_v36  ;;  %v4687_v44 = vshll.u32 %v11193_v32, 16 }
 0x279   : > { %v3404_v60 = vadd.f32 %v3403_v23, %v3393_v39  ;;  %v3302_v1 = vadd.f32 %v8459_v10, %v11227_v52  ;;  %v3300_v16 = vadd.f32 %v8460_v46, %v11227_v52  ;;  %v8462_v5 = vadd.f32 %v3261_v43, %v11160_v53  ;;  %v11370_v53 = vpop.permute.xlu0 %4907 }
 0x27a   : > { %v3395_v0 = vmul.f32 %v11177_v13, %v3311_v29  ;;  %8154 = vmatpush3.bf16.msra.mxu0 %v11348_v51  ;;  %8368 = vmatmul.mubr.bf16.gmra.mrb[28].mxu1 %v5974_v27  ;;  %v5982_v35 = vsel %vm2435_vm3, %v5977_v30, %v5981_v59  ;;  %v5985_v18 = vor.u32 %v5983_v20, %v5981_v59  ;;  %v5989_v32 = vrot.slane %v5987_v37, 1  ;;  %v11380_v59 = vld [vmem:[%s11652_s3 + $0x210] sm:$0xff]  }
 0x27b   : > { %v3405_v2 = vadd.f32 %v3404_v60, %v3394_v17  ;;  %v3312_v11 = vmax.f32 %v3300_v16, 0.0  ;;  %v3303_v10 = vadd.f32 %v8461_v63, %v11227_v52  ;;  %v3301_v26 = vadd.f32 %v8462_v5, %v11227_v52  ;;  %8371 = vmatprep.mubr.bf16.mxu1 %v5982_v35  ;;  %8380 = vmatpush3.bf16.msra.mxu1 %v11172_v36 }
 0x27c   : > { %v11692_v13 = vrot.slane %v11042_v8, 1  ;;  %8155 = vmatprep.subr.bf16.mxu0 %v11380_v59  ;;  %v4577_v36 = vsel %vm2918_vm6, %v4574_v47, %v4576_v34  ;;  %8381 = vmatprep.subr.bf16.mxu1 %v11189_v48  ;;  %v11693_v29 = vshrl.u32 %v10974_v57, 16  ;;  %v11694_v37 = vshll.u32 %v10974_v57, 16  ;;  %v11401_v57 = vld [vmem:[%s11652_s3 + $0x218] sm:$0xff]  }
 0x27d   : > { %v3314_v39 = vmax.f32 %v3302_v1, 0.0  ;;  %v3396_v46 = vmul.f32 %v11277_v21, %v3312_v11  ;;  %v3406_v33 = vadd.f32 %v3405_v2, %v3395_v0  ;;  %v3313_v17 = vmax.f32 %v3301_v26, 0.0  ;;  %v3381_v1 = vpop.permute.xlu1 %3380 }
 0x27e   : > { %v4575_v27 = vsel %vm2918_vm6, %v11692_v13, %v4574_v47  ;;  %v4691_v30 = vrot.slane %v11693_v29, 1  ;;  %v4692_v23 = vrot.slane %v11694_v37, 2  ;;  %8156 = vmatpush3.bf16.msra.mxu0 %v11380_v59  ;;  %v6095_v63 = vrot.slane %v11128_v45, 1  ;;  %v11438_v13 = vld [vmem:[%s11652_s3 + $0x230] sm:$0xff]  }
 0x27f   : > { %8144 = vmatmul.mubr.bf16.gmra.mrb[40].mxu0 %v4575_v27  ;;  %v4686_v47 = vrot.slane %v4684_v56, 1  ;;  %v4689_v43 = vrot.slane %v4687_v44, 2  ;;  %v3407_v60 = vadd.f32 %v3406_v33, %v3396_v46  ;;  %v3315_v16 = vmax.f32 %v3303_v10, 0.0  ;;  %8382 = vmatpush3.bf16.msra.mxu1 %v11189_v48  ;;  %v3386_v48 = vpop.permute.xlu0 %3385  ;;  %v11457_v33 = vld [vmem:[%s11652_s3 + $0x238] sm:$0xff]  }
 0x280   : > { %8147 = vmatprep.mubr.bf16.mxu0 %v4577_v36  ;;  %v3397_v5 = vmul.f32 %v11296_v40, %v3313_v17  ;;  %8157 = vmatprep.subr.bf16.mxu0 %v11401_v57  ;;  %v5990_v21 = vsel %vm2435_vm3, %v5985_v18, %v5989_v32  ;;  %v6094_v56 = vrot.slane %v11331_v31, 1  ;;  %v4578_v44 = vrot.slane %v11158_v9, 1  ;;  %v11417_v9 = vld [vmem:[%s11652_s3 + $0x220] sm:$0xff]  }
 0x281   : > { %8383 = vmatprep.subr.bf16.mxu1 %v11214_v22  ;;  %v3398_v0 = vmul.f32 %v3381_v1, %v3314_v39  ;;  %v4693_v35 = vor.u32 %v4692_v23, %v4691_v30  ;;  %v3399_v11 = vmul.f32 %v3386_v48, %v3315_v16  ;;  %v4690_v18 = vor.u32 %v4689_v43, %v4686_v47 }
 0x282   : > { %v3408_v40 = vadd.f32 %v3407_v60, %v3397_v5  ;;  %8158 = vmatpush3.bf16.msra.mxu0 %v11401_v57  ;;  %8372 = vmatmul.mubr.bf16.gmra.mrb[32].mxu1 %v5990_v21  ;;  %v6096_v2 = vsel %vm2918_vm6, %v6094_v56, %v6095_v63  ;;  %v4579_v32 = vsel %vm2918_vm6, %v4576_v34, %v4578_v44  ;;  %v11429_v34 = vld [vmem:[%s11652_s3 + $0x228] sm:$0xff]   ;;  %v11696_v36 = vshll.u32 %v11033_v54, 16 }
 0x283   : > { %8384 = vmatpush3.bf16.msra.mxu1 %v11214_v22  ;;  %8391 = vmatprep.mubr.bf16.mxu1 %v6096_v2  ;;  %v4694_v22 = vsel %vm3100_vm7, %v4690_v18, %v4693_v35  ;;  %v6097_v30 = vrot.slane %v11198_v14, 1  ;;  %v11697_v37 = vshrl.u32 %v11042_v8, 16  ;;  %v11698_v23 = vshll.u32 %v11042_v8, 16 }
 0x284   : > { %v3409_v10 = vadd.f32 %v3408_v40, %v3398_v0  ;;  %8159 = vmatprep.subr.bf16.mxu0 %v11417_v9  ;;  %8385 = vmatprep.subr.bf16.mxu1 %v11237_v61  ;;  %v4696_v29 = vrot.slane %v11696_v36, 2  ;;  %v6099_v46 = vrot.slane %v11219_v4, 1  ;;  %v11700_v60 = vshll.u32 %v11076_v50, 16 }
 0x285   : > { %v4700_v39 = vrot.slane %v11698_v23, 2  ;;  %v6098_v17 = vsel %vm2918_vm6, %v6095_v63, %v6097_v30  ;;  %v8998_v63 = vld [vmem:[#allocation2 + $0x78] ss:$0 sps:$4 sm:$0x33]   ;;  %v6101_v1 = vrot.slane %v11256_v24, 1  ;;  %v11701_v56 = vshrl.u32 %v11093_v3, 16 }
 0x286   : > { %v11421_v26 = vadd.f32 %v3409_v10, %v3399_v11  ;;  %8160 = vmatpush3.bf16.msra.mxu0 %v11417_v9  ;;  %v6100_v47 = vsel %vm2918_vm6, %v6097_v30, %v6099_v46  ;;  %v4704_v16 = vrot.slane %v11700_v60, 2  ;;  %v6214_v48 = vshll.u32 %v11331_v31, 16 }
 0x287   : > { %8148 = vmatmul.mubr.bf16.gmra.mrb[44].mxu0 %v4579_v32  ;;  %8386 = vmatpush3.bf16.msra.mxu1 %v11237_v61  ;;  %v11695_v61 = vshrl.u32 %v11033_v54, 16  ;;  %v4707_v44 = vrot.slane %v11701_v56, 1  ;;  %v4712_v2 = vshrl.u32 %v8998_v63, 16  ;;  %v4715_v11 = vshll.u32 %v8998_v63, 16 }
 0x288   : > { %8167 = vmatprep.mubr.bf16.mxu0 %v4694_v22  ;;  %8161 = vmatprep.subr.bf16.mxu0 %v11429_v34  ;;  %v6102_v10 = vsel %vm2918_vm6, %v6099_v46, %v6101_v1  ;;  %v11703_v32 = vshrl.u32 %v11128_v45, 16  ;;  %v6235_v56 = vrot.slane %v5979_v55, 2  ;;  %v9001_v55 = vld [vmem:[%s11655_s6 + $0x8] sm:$0xff]  }
 0x289   : > { %8387 = vmatprep.subr.bf16.mxu1 %v11264_v38  ;;  %v4695_v27 = vrot.slane %v11695_v61, 1  ;;  %v4714_v30 = vrot.slane %v4712_v2, 1 }
 0x28a   : > { %8162 = vmatpush3.bf16.msra.mxu0 %v11429_v34  ;;  %v6218_v22 = vrot.slane %v11703_v32, 1  ;;  %v9006_v32 = vld [vmem:[%s11655_s6 + $0x30] sm:$0xff]  }
 0x28b   : > { %8388 = vmatpush3.bf16.msra.mxu1 %v11264_v38  ;;  %8163 = vmatprep.subr.bf16.mxu0 %v11438_v13  ;;  %v4699_v38 = vrot.slane %v11697_v37, 1  ;;  %v4697_v54 = vor.u32 %v4696_v29, %v4695_v27  ;;  %v6216_v29 = vrot.slane %v6214_v48, 2  ;;  %v4717_v37 = vrot.slane %v4715_v11, 2  ;;  %v9002_v11 = vld [vmem:[%s11655_s6 + $0x10] sm:$0xff]  }
 0x28c   : > { %8389 = vmatprep.subr.bf16.mxu1 %v11293_v25 }
 0x28d   : > { %v4701_v8 = vor.u32 %v4700_v39, %v4699_v38  ;;  %v4698_v5 = vsel %vm3100_vm7, %v4693_v35, %v4697_v54  ;;  %v6211_v35 = vshrl.u32 %v11331_v31, 16  ;;  %v6105_v31 = vrot.slane %v11313_v42, 1 }
 0x28e   : > { %8164 = vmatpush3.bf16.msra.mxu0 %v11438_v13  ;;  %v4718_v39 = vor.u32 %v4717_v37, %v4714_v30 }
 0x28f   : > { %8390 = vmatpush3.bf16.msra.mxu1 %v11293_v25  ;;  %8165 = vmatprep.subr.bf16.mxu0 %v11457_v33  ;;  %v11699_v25 = vshrl.u32 %v11076_v50, 16  ;;  %v4702_v21 = vsel %vm3100_vm7, %v4697_v54, %v4701_v8  ;;  %v6103_v50 = vrot.slane %v11283_v28, 1  ;;  %v6213_v36 = vrot.slane %v6211_v35, 1  ;;  %v9000_v28 = vld [vmem:[%s11655_s6] sm:$0xff]  }
 0x290   : > { %8403 = vmatprep.subr.bf16.mxu1 %v11323_v49 }
 0x291   : > { %v4703_v43 = vrot.slane %v11699_v25, 1 }
 0x292   : > { %8166 = vmatpush3.bf16.msra.mxu0 %v11457_v33  ;;  %8392 = vmatmul.mubr.bf16.vlgmr.msra.gmra.mrb[24].mxu1 %v6098_v17  ;;  %v11706_v17 = vshll.u32 %v11198_v14, 16 }
 0x293   : > { %8395 = vmatprep.mubr.bf16.mxu1 %v6100_v47  ;;  %8404 = vmatpush3.bf16.msra.mxu1 %v11323_v49  ;;  %v11702_v49 = vshll.u32 %v11093_v3, 16  ;;  %v4705_v40 = vor.u32 %v4704_v16, %v4703_v43  ;;  %v6104_v3 = vsel %vm2918_vm6, %v6101_v1, %v6103_v50  ;;  %v11707_v47 = vshrl.u32 %v11219_v4, 16  ;;  %v8999_v16 = vld [vmem:[#allocation2 + $0xa8] ss:$0 sps:$4 sm:$0x33]  }
 0x294   : > { %8405 = vmatprep.subr.bf16.mxu1 %v11348_v51 }
 0x295   : > { %8168 = vmatmul.mubr.bf16.vlgmr.msra.gmra.mrb[36].mxu0 %v4698_v5  ;;  %v4708_v0 = vrot.slane %v11702_v49, 2  ;;  %v4706_v27 = vsel %vm3100_vm7, %v4701_v8, %v4705_v40  ;;  %v6223_v8 = vrot.slane %v11706_v17, 2  ;;  %v6226_v25 = vrot.slane %v11707_v47, 1 }
 0x296   : > { %8171 = vmatprep.mubr.bf16.mxu0 %v4702_v21  ;;  %v11710_v21 = vshll.u32 %v11256_v24, 16 }
 0x297   : > { %8406 = vmatpush3.bf16.msra.mxu1 %v11348_v51  ;;  %v4709_v18 = vor.u32 %v4708_v0, %v4707_v44  ;;  %v11704_v51 = vshll.u32 %v11128_v45, 16  ;;  %v6106_v45 = vsel %vm2918_vm6, %v6103_v50, %v6105_v31  ;;  %v6242_v44 = vshll.u32 %v8999_v16, 16 }
 0x298   : > { %8407 = vmatprep.subr.bf16.mxu1 %v11380_v59  ;;  %v6231_v1 = vrot.slane %v11710_v21, 2 }
 0x299   : > { %v6219_v61 = vrot.slane %v11704_v51, 2  ;;  %v4710_v38 = vsel %vm3100_vm7, %v4705_v40, %v4709_v18  ;;  %v4719_v46 = vsel %vm3100_vm7, %v4709_v18, %v4718_v39  ;;  %v6244_v40 = vrot.slane %v6242_v44, 2  ;;  %v9004_v18 = vld [vmem:[%s11655_s6 + $0x20] sm:$0xff]  }
 0x29a   : > { %8396 = vmatmul.mubr.bf16.gmra.mrb[28].mxu1 %v6102_v10  ;;  %v9003_v10 = vld [vmem:[%s11655_s6 + $0x18] sm:$0xff]  }
 0x29b   : > { %8399 = vmatprep.mubr.bf16.mxu1 %v6104_v3  ;;  %8408 = vmatpush3.bf16.msra.mxu1 %v11380_v59  ;;  %v6220_v23 = vor.u32 %v6219_v61, %v6218_v22  ;;  %v6217_v59 = vor.u32 %v6216_v29, %v6213_v36  ;;  %v9005_v3 = vld [vmem:[%s11655_s6 + $0x28] sm:$0xff]   ;;  %v9007_v22 = vld [vmem:[%s11655_s6 + $0x38] sm:$0xff]  }
 0x29c   : > { %8409 = vmatprep.subr.bf16.mxu1 %v11401_v57 }
 0x29d   : > { %8172 = vmatmul.mubr.bf16.gmra.mrb[40].mxu0 %v4706_v27  ;;  %v6221_v42 = vsel %vm3100_vm7, %v6217_v59, %v6220_v23 }
 0x29e   : > { %8175 = vmatprep.mubr.bf16.mxu0 %v4710_v38 }
 0x29f   : > { %8410 = vmatpush3.bf16.msra.mxu1 %v11401_v57  ;;  %v11705_v57 = vshrl.u32 %v11198_v14, 16  ;;  %v11709_v14 = vshrl.u32 %v11256_v24, 16 }
 0x2a0   : > { %8411 = vmatprep.subr.bf16.mxu1 %v11417_v9 }
 0x2a1   : > { %v6222_v54 = vrot.slane %v11705_v57, 1  ;;  %v6230_v63 = vrot.slane %v11709_v14, 1 }
 0x2a2   : > { %8400 = vmatmul.mubr.bf16.gmra.mrb[32].mxu1 %v6106_v45 }
 0x2a3   : > { %8412 = vmatpush3.bf16.msra.mxu1 %v11417_v9  ;;  %8419 = vmatprep.mubr.bf16.mxu1 %v6221_v42  ;;  %v11708_v9 = vshll.u32 %v11219_v4, 16  ;;  %v6224_v60 = vor.u32 %v6223_v8, %v6222_v54  ;;  %v6232_v49 = vor.u32 %v6231_v1, %v6230_v63  ;;  %v11711_v1 = vld [vmem:[#allocation11_spill] sm:$0xff] }
 0x2a4   : > { %8413 = vmatprep.subr.bf16.mxu1 %v11429_v34 }
 0x2a5   : > { %8176 = vmatmul.mubr.bf16.gmra.mrb[44].mxu0 %v4719_v46  ;;  %v6227_v43 = vrot.slane %v11708_v9, 2  ;;  %v6225_v5 = vsel %vm3100_vm7, %v6220_v23, %v6224_v60 }
 0x2a7   : > { %8414 = vmatpush3.bf16.msra.mxu1 %v11429_v34  ;;  %v6228_v34 = vor.u32 %v6227_v43, %v6226_v25 }
 0x2a8   : > { %8415 = vmatprep.subr.bf16.mxu1 %v11438_v13 }
 0x2a9   : > { %v6229_v4 = vsel %vm3100_vm7, %v6224_v60, %v6228_v34  ;;  %v6233_v35 = vsel %vm3100_vm7, %v6228_v34, %v6232_v49 }
 0x2ab   : > { %8416 = vmatpush3.bf16.msra.mxu1 %v11438_v13  ;;  %v6234_v13 = vrot.slane %v5983_v20, 1  ;;  %v9145_v20 = vmov 0.0  }
 0x2ac   : > { %8417 = vmatprep.subr.bf16.mxu1 %v11457_v33  ;;  %8431 = vmatprep.subr.bf16.mxu0 %v9145_v20 }
 0x2ad   : > { %v6236_v0 = vor.u32 %v6235_v56, %v6234_v13  ;;  %8447 = vmatprep.mubr.msk.bf16.mxu0 %vm9146_vm8, %v9145_v20  ;;  %8432 = vmatpush3.bf16.msra.mxu0 %v9000_v28  ;;  %v11570_v28 = vpop.permute.xlu1 %6429 }
 0x2ae   : > { %8433 = vmatprep.subr.bf16.mxu0 %v9145_v20 }
 0x2af   : > { %8418 = vmatpush3.bf16.msra.mxu1 %v11457_v33  ;;  %v6239_v33 = vshrl.u32 %v8999_v16, 16  ;;  %v6237_v24 = vsel %vm3100_vm7, %v6232_v49, %v6236_v0 }
 0x2b1   : > { %v6241_v50 = vrot.slane %v6239_v33, 1  ;;  %8434 = vmatpush3.bf16.msra.mxu0 %v9001_v55  ;;  %v11712_v33 = vld [vmem:[#allocation12_spill] sm:$0xff]  ;;  %v3411_v55 = vrot.slane %v11421_v26, 4 }
 0x2b2   : > { %8420 = vmatmul.mubr.bf16.vlgmr.msra.gmra.mrb[24].mxu1 %v6225_v5  ;;  %8435 = vmatprep.subr.bf16.mxu0 %v9145_v20 }
 0x2b3   : > { %8423 = vmatprep.mubr.bf16.mxu1 %v6229_v4  ;;  %v6245_v48 = vor.u32 %v6244_v40, %v6241_v50  ;;  %v11713_v40 = vld [vmem:[#allocation15_spill] sm:$0xff] }
 0x2b5   : > { %v6246_v2 = vsel %vm3100_vm7, %v6236_v0, %v6245_v48  ;;  %8436 = vmatpush3.bf16.msra.mxu0 %v9002_v11 }
 0x2b6   : > { %8437 = vmatprep.subr.bf16.mxu0 %v9145_v20 }
 0x2b9   : > { %8438 = vmatpush3.bf16.msra.mxu0 %v9003_v10  ;;  %v11714_v10 = vld [vmem:[#allocation16_spill] sm:$0xff] }
 0x2ba   : > { %8424 = vmatmul.mubr.bf16.gmra.mrb[28].mxu1 %v6233_v35  ;;  %8439 = vmatprep.subr.bf16.mxu0 %v9145_v20 }
 0x2bb   : > { %8427 = vmatprep.mubr.bf16.mxu1 %v6237_v24 }
 0x2bd   : > { %8440 = vmatpush3.bf16.msra.mxu0 %v9004_v18 }
 0x2be   : > { %8441 = vmatprep.subr.bf16.mxu0 %v9145_v20 }
 0x2c1   : > { %8442 = vmatpush3.bf16.msra.mxu0 %v9005_v3 }
 0x2c2   : > { %8428 = vmatmul.mubr.bf16.gmra.mrb[32].mxu1 %v6246_v2  ;;  %8443 = vmatprep.subr.bf16.mxu0 %v9145_v20 }
 0x2c5   : > { %8444 = vmatpush3.bf16.msra.mxu0 %v9006_v32 }
 0x2c6   : > { %8445 = vmatprep.subr.bf16.mxu0 %v9145_v20 }
 0x2c9   : > { %8446 = vmatpush3.bf16.msra.mxu0 %v9007_v22 }
 0x368   : > { %v8169_v51 = vpop.f32.mrb[36].mxu0 }
 0x369   : > { %v4760_v61 = vpop.f32.mrb[37].mxu0  ;;  %v4821_v27 = vadd.f32 %v8169_v51, %v11227_v52 }
 0x36a   : > { %v4819_v31 = vadd.f32 %v11227_v52, %v4760_v61  ;;  %v8170_v36 = vpop.f32.mrb[38].mxu0 }
 0x36b   : > { %v4763_v29 = vpop.f32.mrb[39].mxu0  ;;  %v4822_v37 = vadd.f32 %v8170_v36, %v11227_v52  ;;  %v4833_v23 = vmax.f32 %v4821_v27, 0.0  ;;  %v3412_v27 = vadd.f32 %v3411_v55, %v11421_v26 }
 0x36c   : > { %v4831_v30 = vmax.f32 %v4819_v31, 0.0  ;;  %v4820_v38 = vadd.f32 %v11227_v52, %v4763_v29  ;;  %v4913_v29 = vpop.permute.xlu1 %4912 }
 0x36d   : > { %v4834_v39 = vmax.f32 %v4822_v37, 0.0  ;;  %v4917_v54 = vmul.f32 %v10965_v15, %v4833_v23  ;;  %v3413_v23 = vrot.slane %v3412_v27, 2 }
 0x36e   : > { %v4832_v45 = vmax.f32 %v4820_v38, 0.0  ;;  %v4915_v59 = vmul.f32 %v10906_v62, %v4831_v30 }
 0x36f   : > { %v4918_v60 = vmul.f32 %v11012_v12, %v4834_v39 }
 0x370   : > { %v4916_v42 = vmul.f32 %v10936_v6, %v4832_v45  ;;  %v8173_v46 = vpop.f32.mrb[40].mxu0 }
 0x371   : > { %v4776_v57 = vpop.f32.mrb[41].mxu0  ;;  %v4825_v8 = vadd.f32 %v8173_v46, %v11227_v52 }
 0x372   : > { %v4927_v17 = vadd.f32 %v4916_v42, %v4915_v59  ;;  %v4823_v47 = vadd.f32 %v11227_v52, %v4776_v57  ;;  %v8174_v25 = vpop.f32.mrb[42].mxu0 }
 0x373   : > { %v4826_v9 = vadd.f32 %v8174_v25, %v11227_v52  ;;  %v4779_v43 = vpop.f32.mrb[43].mxu0  ;;  %v4837_v6 = vmax.f32 %v4825_v8, 0.0 }
 0x374   : > { %v4928_v34 = vadd.f32 %v4927_v17, %v4917_v54  ;;  %v4835_v62 = vmax.f32 %v4823_v47, 0.0  ;;  %v4824_v16 = vadd.f32 %v11227_v52, %v4779_v43  ;;  %v3414_v17 = vadd.f32 %v3413_v23, %v3412_v27  ;;  %v11715_v43 = vld [vmem:[#allocation6_spill] sm:$0xff] }
 0x375   : > { %v4838_v63 = vmax.f32 %v4826_v9, 0.0  ;;  %v4921_v44 = vmul.f32 %v11712_v33, %v4837_v6  ;;  %v11721_v27 = vld [vmem:[#allocation14_spill] sm:$0xff] }
 0x376   : > { %v4919_v5 = vmul.f32 %v11023_v58, %v4835_v62  ;;  %v4929_v14 = vadd.f32 %v4928_v34, %v4918_v60  ;;  %v4836_v15 = vmax.f32 %v4824_v16, 0.0  ;;  %v11716_v62 = vld [vmem:[#allocation7_spill] sm:$0xff] }
 0x377   : > { %v4922_v35 = vmul.f32 %v11713_v40, %v4838_v63  ;;  %v11717_v63 = vld [vmem:[#allocation8_spill] sm:$0xff] }
 0x378   : > { %v4930_v21 = vadd.f32 %v4929_v14, %v4919_v5  ;;  %v4920_v4 = vmul.f32 %v11711_v1, %v4836_v15  ;;  %v8177_v13 = vpop.f32.mrb[44].mxu0  ;;  %v3415_v5 = vrot.slane %v3414_v17, 1 }
 0x379   : > { %v4792_v56 = vpop.f32.mrb[45].mxu0  ;;  %v4829_v12 = vadd.f32 %v8177_v13, %v11227_v52 }
 0x37a   : > { %v4931_v49 = vadd.f32 %v4930_v21, %v4920_v4  ;;  %v4827_v0 = vadd.f32 %v11227_v52, %v4792_v56  ;;  %v8178_v50 = vpop.f32.mrb[46].mxu0 }
 0x37b   : > { %v4795_v24 = vpop.f32.mrb[47].mxu0  ;;  %v4830_v2 = vadd.f32 %v8178_v50, %v11227_v52  ;;  %v4841_v11 = vmax.f32 %v4829_v12, 0.0  ;;  %v11718_v12 = vld [vmem:[#allocation9_spill] sm:$0xff] }
 0x37c   : > { %v4932_v58 = vadd.f32 %v4931_v49, %v4921_v44  ;;  %v4839_v48 = vmax.f32 %v4827_v0, 0.0  ;;  %v4828_v20 = vadd.f32 %v11227_v52, %v4795_v24 }
 0x37d   : > { %v4842_v51 = vmax.f32 %v4830_v2, 0.0  ;;  %v4925_v31 = vmul.f32 %v11370_v53, %v4841_v11  ;;  %v11719_v2 = vld [vmem:[#allocation10_spill] sm:$0xff] }
 0x37e   : > { %v4923_v18 = vmul.f32 %v11714_v10, %v4839_v48  ;;  %v4933_v3 = vadd.f32 %v4932_v58, %v4922_v35  ;;  %v4840_v32 = vmax.f32 %v4828_v20, 0.0  ;;  %v3416_v58 = vadd.f32 %v3415_v5, %v3414_v17 }
 0x37f   : > { %v4926_v30 = vmul.f32 %v4913_v29, %v4842_v51 }
 0x380   : > { %v4934_v22 = vadd.f32 %v4933_v3, %v4923_v18  ;;  %v4924_v61 = vmul.f32 %v11360_v41, %v4840_v32  ;;  %v11720_v32 = vld [vmem:[#allocation13_spill] sm:$0xff] }
 0x382   : > { %v4935_v36 = vadd.f32 %v4934_v22, %v4924_v61 }
 0x384   : > { %v4936_v37 = vadd.f32 %v4935_v36, %v4925_v31 }
 0x385   : > { %v8421_v38 = vpop.f32.mrb[24].mxu1 }
 0x386   : > { %v4937_v45 = vadd.f32 %v4936_v37, %v4926_v30  ;;  %v6287_v59 = vpop.f32.mrb[25].mxu1  ;;  %v6348_v39 = vadd.f32 %v8421_v38, %v11227_v52 }
 0x387   : > { %v6346_v42 = vadd.f32 %v11227_v52, %v6287_v59  ;;  %v8422_v46 = vpop.f32.mrb[26].mxu1 }
 0x388   : > { %v4938_v57 = vrot.slane %v4937_v45, 4  ;;  %v6290_v54 = vpop.f32.mrb[27].mxu1  ;;  %v6349_v26 = vadd.f32 %v8422_v46, %v11227_v52  ;;  %v6360_v47 = vmax.f32 %v6348_v39, 0.0 }
 0x389   : > { %v6358_v41 = vmax.f32 %v6346_v42, 0.0  ;;  %v6347_v53 = vadd.f32 %v11227_v52, %v6290_v54 }
 0x38a   : > { %v4939_v8 = vadd.f32 %v4938_v57, %v4937_v45  ;;  %v6361_v34 = vmax.f32 %v6349_v26, 0.0  ;;  %v6444_v21 = vmul.f32 %v11717_v63, %v6360_v47 }
 0x38b   : > { %v6359_v25 = vmax.f32 %v6347_v53, 0.0  ;;  %v6442_v60 = vmul.f32 %v11715_v43, %v6358_v41 }
 0x38c   : > { %v4940_v9 = vrot.slane %v4939_v8, 2  ;;  %v6445_v0 = vmul.f32 %v11718_v12, %v6361_v34 }
 0x38d   : > { %v6443_v16 = vmul.f32 %v11716_v62, %v6359_v25  ;;  %v8425_v6 = vpop.f32.mrb[28].mxu1  ;;  %v6440_v25 = vpop.permute.xlu1 %6439 }
 0x38e   : > { %v4941_v14 = vadd.f32 %v4940_v9, %v4939_v8  ;;  %v6303_v15 = vpop.f32.mrb[29].mxu1  ;;  %v6352_v4 = vadd.f32 %v8425_v6, %v11227_v52  ;;  %v6435_v8 = vpop.permute.xlu0 %6434 }
 0x38f   : > { %v6454_v1 = vadd.f32 %v6443_v16, %v6442_v60  ;;  %v6350_v13 = vadd.f32 %v11227_v52, %v6303_v15  ;;  %v8426_v56 = vpop.f32.mrb[30].mxu1 }
 0x390   : > { %v4942_v33 = vrot.slane %v4941_v14, 1  ;;  %v6353_v44 = vadd.f32 %v8426_v56, %v11227_v52  ;;  %v6306_v49 = vpop.f32.mrb[31].mxu1  ;;  %v6364_v48 = vmax.f32 %v6352_v4, 0.0 }
 0x391   : > { %v6455_v50 = vadd.f32 %v6454_v1, %v6444_v21  ;;  %v6362_v40 = vmax.f32 %v6350_v13, 0.0  ;;  %v6351_v35 = vadd.f32 %v11227_v52, %v6306_v49 }
 0x392   : > { %v4943_v24 = vadd.f32 %v4942_v33, %v4941_v14  ;;  %v6365_v10 = vmax.f32 %v6353_v44, 0.0  ;;  %v6448_v31 = vmul.f32 %v11721_v27, %v6364_v48 }
 0x393   : > { %v6446_v20 = vmul.f32 %v11719_v2, %v6362_v40  ;;  %v6456_v55 = vadd.f32 %v6455_v50, %v6445_v0  ;;  %v6363_v11 = vmax.f32 %v6351_v35, 0.0 }
 0x394   : > { %v4944_v18 = vadd.f32 %v4943_v24, %v3416_v58  ;;  %v6449_v38 = vmul.f32 %v11318_v7, %v6365_v10 }
 0x395   : > { %v6457_v3 = vadd.f32 %v6456_v55, %v6446_v20  ;;  %v6447_v22 = vmul.f32 %v11720_v32, %v6363_v11  ;;  %v8429_v51 = vpop.f32.mrb[32].mxu1 }
 0x396   : > { %v6319_v61 = vpop.f32.mrb[33].mxu1  ;;  %v6356_v29 = vadd.f32 %v8429_v51, %v11227_v52 }
 0x397   : > { %v6458_v36 = vadd.f32 %v6457_v3, %v6447_v22  ;;  %v6354_v30 = vadd.f32 %v11227_v52, %v6319_v61  ;;  %v8430_v37 = vpop.f32.mrb[34].mxu1 }
 0x398   : > { %v6322_v23 = vpop.f32.mrb[35].mxu1  ;;  %v6357_v39 = vadd.f32 %v8430_v37, %v11227_v52  ;;  %v6368_v46 = vmax.f32 %v6356_v29, 0.0 }
 0x399   : > { %v6459_v45 = vadd.f32 %v6458_v36, %v6448_v31  ;;  %v6366_v59 = vmax.f32 %v6354_v30, 0.0  ;;  %v6355_v42 = vadd.f32 %v11227_v52, %v6322_v23 }
 0x39a   : > { %v6369_v53 = vmax.f32 %v6357_v39, 0.0  ;;  %v6452_v47 = vmul.f32 %v6435_v8, %v6368_v46 }
 0x39b   : > { %v6450_v57 = vmul.f32 %v11335_v19, %v6366_v59  ;;  %v6460_v54 = vadd.f32 %v6459_v45, %v6449_v38  ;;  %v6367_v41 = vmax.f32 %v6355_v42, 0.0 }
 0x39c   : > { %v6453_v9 = vmul.f32 %v6440_v25, %v6369_v53 }
 0x39d   : > { %v6461_v26 = vadd.f32 %v6460_v54, %v6450_v57  ;;  %v6451_v17 = vmul.f32 %v11570_v28, %v6367_v41  ;;  %v6490_v28 = vld [vmem:[%s11656_s7] sm:$0x1] }
 0x39f   : > { %v6462_v7 = vadd.f32 %v6461_v26, %v6451_v17 }
 0x3a1   : > { %v6463_v43 = vadd.f32 %v6462_v7, %v6452_v47 }
 0x3a3   : > { %v6464_v60 = vadd.f32 %v6463_v43, %v6453_v9 }
 0x3a5   : > { %v6465_v34 = vrot.slane %v6464_v60, 4 }
 0x3a7   : > { %v6466_v52 = vadd.f32 %v6465_v34, %v6464_v60 }
 0x3a9   : > { %v6467_v62 = vrot.slane %v6466_v52, 2 }
 0x3ab   : > { %v6468_v16 = vadd.f32 %v6467_v62, %v6466_v52 }
 0x3ad   : > { %v6469_v19 = vrot.slane %v6468_v16, 1 }
 0x3af   : > { %v6470_v6 = vadd.f32 %v6469_v19, %v6468_v16 }
 0x3b1   : > { %v6471_v5 = vadd.f32 %v6470_v6, %v4944_v18 }
 0x3b3   : > { %v6472_v14 = vmul.f32 0.00390625, %v6471_v5 }
 0x3b5   : > { %v6473_v15 = vpack.c.bf16 %v6472_v14, %v6472_v14 }
 0x3b7   : > { %8448 = vmatmul.mubr.bf16.vlgmr.msra.gmra.mrb[48].mxu0 %v6473_v15 }
 0x48a   : > { %v6573_v63 = vpop.f32.mrb[48].mxu0 }
 0x48b   : > { %v6574_v21 = vadd.f32 %v6573_v63, %v6490_v28  ;;  %v8449_v1 = vpop.f32.mrb[49].mxu0 }
 0x48c   : > { %v6576_v4 = vpop.f32.mrb[50].mxu0 }
 0x48d   : > { %6579 = vst [vmem:[%s297_s25] sm:$0x1] %v6574_v21  ;;  %v8450_v13 = vpop.f32.mrb[51].mxu0 }
 0x48e   : > { %9093 = shalt.err (!%p9090_p3)
}
 0x48f   : > { %s9094_s22 = scalar_lea.hbm %s11607_s12, 16  ;;  %s9098_s24 = scalar_lea.hbm %s11657_s8, 32 }
 0x490   : > { %p9095_p4 = scmp.ne.s32.totalorder %s11607_s12, %s9094_s22  ;;  %p9099_p9 = scmp.lt.u32.totalorder %s11607_s12, %s11657_s8 }
 0x491   : > { %p9100_p10 = scmp.lt.u32.totalorder %s9098_s24, %s9094_s22  ;;  %p9102_p12 = scmp.lt.u32.totalorder %s9094_s22, %s11607_s12 }
 0x492   : > { %p9096_p7 = pnand %p9095_p4, %p9231_p5 }
 0x493   : > { %p9101_p11 = por %p9100_p10, %p9099_p9 }
 0x494   : > { %p9097_p8 = pneg %p9096_p7 }
 0x495   : > { %p9103_p13 = por %p9102_p12, %p9101_p11 }
 0x497   : > { %p9104_p0 = pnand %p9103_p13, %p9097_p8 }
 0x499   : > { %9107 = shalt.err (!%p9104_p0)
}
 0x49a   : > { %8743 = dma.vmem_to_hbm [thread:$0]  (%p9231_p5), %s11609_s26, 16, %s11607_s12, %s6581_s13  }
 0x49b PF: > { %p8749_p1 = scmp.ge.s32.totalorder %s9142_s30, 2  ;;  %s6605_s10 = sand.u32 1, %s9130_s27  }
 0x49c   : > { %s6606_s9 = scalar_lea.sflag [#allocation4], %s6605_s10 }
 0x49d   : > { %p8746_p2 = pnand %p8749_p1, %p9235_p6 }
 0x49f   : > { %9125 = dma.done.wait (!%p8746_p2), %s6606_s9, 16  }
 0x4a0   : > { %9127 = vsyncadd (!%p8746_p2), %s6606_s9, 4294967280  ;;  %p18_p3 = scmp.ge.s32.totalorder %s9218_s11, 4   ;;  %s11722_s27 = smov %s9134_s28 }
 0x4a1   : > { %s11723_s28 = smov %s9138_s29  ;;  %s11724_s29 = smov %s9229_s14 }
 0x4a2   : > { %s11725_s30 = smov %s9218_s11  ;;  %20 = sbr.rel (!%p18_p3) target bundleno = 3 (0x3), region = 95 }
 0x4a9   :  { %6610 = vsyncpa [#allocation4], 1 }
 0x4aa   :  { %6612 = vsyncpa [#allocation4 + $0x1], 1 }

</bundles_post_ra>
